<compile_context>
chip_gen: v7x
topology: tpu7x:2x2x1
jax: 0.10.0
libtpu: 0.0.40
codegen_flags: <defaults>
</compile_context>

<pallas_src>
import jax
import jax.numpy as jnp
from jax import lax
from jax.experimental import pallas as pl
from jax.experimental.pallas import tpu as pltpu


# ------------------------------- fused kernel --------------------------------

def _make_block_kernel(H, W, Cout, n_cl, cw, has_shortcut):
    HW = H * W

    def kernel(colidx_ref, x_ref, wcat_ref, g1_ref, b1_ref, wg_ref,
               g2_ref, b2_ref, ws1_ref, ws2_ref, o_ref, tap_ref):
        # ---- fused 1x1 convs: ConvBaseBlock conv (+ shortcut conv) in one MXU pass ----
        x = x_ref[...]                                              # [HW, Cin] f32
        acc01 = jnp.dot(x.astype(jnp.bfloat16), wcat_ref[...],
                        preferred_element_type=jnp.float32)
        if has_shortcut:
            h_raw = acc01[:, :Cout]                                 # cb output
            skip = acc01[:, Cout:]                                  # shortcut output
        else:
            h_raw = acc01
            skip = x                                                # exact f32 identity skip

        # InstanceNorm2d(affine, eps=1e-5, biased var) + LeakyReLU(0.2), single-pass stats
        mean1 = jnp.mean(h_raw, axis=0, keepdims=True)
        ex21 = jnp.mean(h_raw * h_raw, axis=0, keepdims=True)
        var1 = jnp.maximum(ex21 - mean1 * mean1, 0.0)
        a1 = g1_ref[...] * lax.rsqrt(var1 + 1e-5)
        c1 = b1_ref[...] - mean1 * a1
        h = h_raw * a1 + c1
        h = jnp.where(h >= 0.0, h, 0.2 * h)                         # [HW, Cout] f32

        # ---- grouped 3x3 conv: roll-based tap extraction, taps K-folded per cluster ----
        row = lax.broadcasted_iota(jnp.int32, (HW, 1), 0)           # flat spatial index
        xx = colidx_ref[...]                                        # x coordinate per row
        shifts, masks = [], []
        for t in range(9):
            dh, dw = t // 3, t % 3                                  # tap reads in[y+dh-1, x+dw-1]
            shifts.append(((1 - dh) * W + (1 - dw)) % HW)
            conds = []
            if dh == 0:
                conds.append(row >= W)                              # y-1 >= 0
            elif dh == 2:
                conds.append(row < HW - W)                          # y+1 <= H-1
            if dw == 0:
                conds.append(xx >= 1)                               # x-1 >= 0
            elif dw == 2:
                conds.append(xx < W - 1)                            # x+1 <= W-1
            m = None
            for cnd in conds:
                m = cnd if m is None else jnp.logical_and(m, cnd)
            masks.append(m)

        pooled_parts = []
        for c in range(n_cl):                                       # static loop over clusters
            c0 = c * cw
            hc = h[:, c0:c0 + cw]                                   # 128-aligned lane slice
            for t in range(9):                                      # static loop over taps
                src = hc if shifts[t] == 0 else pltpu.roll(hc, shift=shifts[t], axis=0)
                if masks[t] is not None:
                    src = jnp.where(masks[t], src, 0.0)
                tap_ref[:, t * cw:(t + 1) * cw] = src.astype(jnp.bfloat16)
            # one MXU pass per cluster, K = 9*cw
            g_c = jnp.dot(tap_ref[...], wg_ref[c], preferred_element_type=jnp.float32)

            # grouped-conv bias intentionally dropped (cancelled exactly by InstanceNorm below)
            mean2 = jnp.mean(g_c, axis=0, keepdims=True)
            ex22 = jnp.mean(g_c * g_c, axis=0, keepdims=True)
            var2 = jnp.maximum(ex22 - mean2 * mean2, 0.0)
            a2 = g2_ref[:, c0:c0 + cw] * lax.rsqrt(var2 + 1e-5)
            c2 = b2_ref[:, c0:c0 + cw] - mean2 * a2
            h2c = g_c * a2 + c2
            h2c = jnp.where(h2c >= 0.0, h2c, 0.2 * h2c)

            pooled_parts.append(jnp.mean(h2c, axis=0, keepdims=True))   # AdaptiveAvgPool2d(1)
            o_ref[:, c0:c0 + cw] = h2c                              # stage pre-gate activation

        # ---- SE block + residual add (fused epilogue) ----
        s = None
        for c in range(n_cl):
            part = jnp.dot(pooled_parts[c].astype(jnp.bfloat16),
                           ws1_ref[c * cw:(c + 1) * cw, :],
                           preferred_element_type=jnp.float32)
            s = part if s is None else s + part
        s = jnp.maximum(s, 0.0)
        gate = jax.nn.sigmoid(jnp.dot(s.astype(jnp.bfloat16), ws2_ref[...],
                                      preferred_element_type=jnp.float32))
        o_ref[...] = o_ref[...] * gate + skip

    return kernel


# ------------------------- one-time parameter packing -------------------------

def _pack_grouped_weight(w_groups, cw):
    """[G, 3, 3, Cg, Cg] grouped-conv weights -> K-folded block-diag [n_cl, 9*cw, cw]."""
    G = w_groups.shape[0]
    Cg = w_groups.shape[3]
    C = G * Cg
    gpc = cw // Cg                        # groups per cluster
    n_cl = C // cw
    wg = jnp.zeros((n_cl, 9, cw, cw), w_groups.dtype)
    for gi in range(G):
        cl, lo = gi // gpc, (gi % gpc) * Cg
        blk = w_groups[gi].reshape(9, Cg, Cg)           # [tap, Cg_in, Cg_out]
        wg = wg.at[cl, :, lo:lo + Cg, lo:lo + Cg].set(blk)
    return wg.reshape(n_cl, 9 * cw, cw)                 # row k = tap*cw + in-channel


def pack_se_resnext_params(params):
    """Hoisted weight prep: pack/cast once, outside the per-call forward path."""
    Cout = int(params["gamma1"].shape[0])
    w_groups = params["w_groups"]
    Cg = int(w_groups.shape[3])
    cw = min(Cout, 128)                                 # MXU-lane-sized group cluster
    if Cout % cw != 0 or cw % Cg != 0:
        cw = Cout                                       # fallback: single full block-diag cluster
    w_cat = params["w_cb"]
    if "w_shortcut" in params:
        w_cat = jnp.concatenate([w_cat, params["w_shortcut"]], axis=1)
    return {
        "w_cat": w_cat.astype(jnp.bfloat16),            # [Cin, Cout (+Cout)]
        "wg": _pack_grouped_weight(w_groups, cw).astype(jnp.bfloat16),
        "g1": params["gamma1"].reshape(1, Cout).astype(jnp.float32),
        "b1": params["beta1"].reshape(1, Cout).astype(jnp.float32),
        "g2": params["gamma2"].reshape(1, Cout).astype(jnp.float32),
        "b2": params["beta2"].reshape(1, Cout).astype(jnp.float32),
        "ws1": params["w_se1"].astype(jnp.bfloat16),    # [Cout, Cout//16]
        "ws2": params["w_se2"].astype(jnp.bfloat16),    # [Cout//16, Cout]
    }


# --------------------------------- forward ------------------------------------

@jax.jit
def se_resnext_forward(packed, x):
    """SEResNextBlock forward. x: [N, H, W, Cin] f32 (NHWC). Returns [N, H, W, Cout] f32."""
    N, H, W, Cin = x.shape
    HW = H * W
    Cout = packed["g1"].shape[1]
    n_cl, _, cw = packed["wg"].shape
    Ccat = packed["w_cat"].shape[1]
    has_shortcut = Ccat != Cout
    Cmid = packed["ws1"].shape[1]

    colidx = (jnp.arange(HW, dtype=jnp.int32) % W).reshape(HW, 1)   # x coordinate per flat row
    x2 = x.reshape(N, HW, Cin)                                      # keep f32; cast in-kernel

    out = pl.pallas_call(
        _make_block_kernel(H, W, Cout, n_cl, cw, has_shortcut),
        out_shape=jax.ShapeDtypeStruct((N, HW, Cout), jnp.float32),
        grid=(N,),
        in_specs=[
            pl.BlockSpec((HW, 1), lambda n: (0, 0)),                # colidx
            pl.BlockSpec((None, HW, Cin), lambda n: (n, 0, 0)),     # x (per sample)
            pl.BlockSpec((Cin, Ccat), lambda n: (0, 0)),            # cb | shortcut 1x1 weights
            pl.BlockSpec((1, Cout), lambda n: (0, 0)),              # gamma1
            pl.BlockSpec((1, Cout), lambda n: (0, 0)),              # beta1
            pl.BlockSpec((n_cl, 9 * cw, cw), lambda n: (0, 0, 0)),  # K-folded grouped-conv weights
            pl.BlockSpec((1, Cout), lambda n: (0, 0)),              # gamma2
            pl.BlockSpec((1, Cout), lambda n: (0, 0)),              # beta2
            pl.BlockSpec((Cout, Cmid), lambda n: (0, 0)),           # SE w1
            pl.BlockSpec((Cmid, Cout), lambda n: (0, 0)),           # SE w2
        ],
        out_specs=pl.BlockSpec((None, HW, Cout), lambda n: (n, 0, 0)),
        scratch_shapes=[pltpu.VMEM((HW, 9 * cw), jnp.bfloat16)],    # K-folded tap staging
        compiler_params=pltpu.CompilerParams(
            dimension_semantics=("parallel",),
            vmem_limit_bytes=48 * 1024 * 1024),
    )(colidx, x2, packed["w_cat"], packed["g1"], packed["b1"], packed["wg"],
      packed["g2"], packed["b2"], packed["ws1"], packed["ws2"])
    return out.reshape(N, H, W, Cout)


# ----------------------------- deterministic init ----------------------------

def init_se_resnext(key, cin, cout, cardinality=16):
    assert cout % cardinality == 0 and cout % 16 == 0
    cg = cout // cardinality
    cmid = cout // 16                                    # int(in_channels / 16) in SEBlock
    k1, k2, k3, k4, k5 = jax.random.split(key, 5)
    p = {
        # ConvBaseBlock(in, out, 1, 1, 0, bias=False): 1x1 conv weight [Cin, Cout]
        "w_cb": jax.random.normal(k1, (cin, cout), jnp.float32) * (cin ** -0.5),
        # InstanceNorm2d(out, affine=True) default init
        "gamma1": jnp.ones((cout,), jnp.float32),
        "beta1": jnp.zeros((cout,), jnp.float32),
        # grouped 3x3 conv weights, per group [kh, kw, Cg_in, Cg_out]
        # (its bias is cancelled exactly by the following InstanceNorm, so it is not created)
        "w_groups": jax.random.normal(k2, (cardinality, 3, 3, cg, cg), jnp.float32)
                    * ((9 * cg) ** -0.5),
        "gamma2": jnp.ones((cout,), jnp.float32),
        "beta2": jnp.zeros((cout,), jnp.float32),
        # SEBlock 1x1 convs (bias=False)
        "w_se1": jax.random.normal(k3, (cout, cmid), jnp.float32) * (cout ** -0.5),
        "w_se2": jax.random.normal(k4, (cmid, cout), jnp.float32) * (cmid ** -0.5),
    }
    if cin != cout:
        p["w_shortcut"] = jax.random.normal(k5, (cin, cout), jnp.float32) * (cin ** -0.5)
    return p


# ------------------------------------ main ------------------------------------

if __name__ == "__main__":
    key = jax.random.PRNGKey(0)
    kp, kx = jax.random.split(key)

    # Small valid config: out_channels must be divisible by 16 (cardinality and SE squeeze).
    N, H, W = 2, 16, 16
    CIN, COUT = 64, 128

    params = init_se_resnext(kp, CIN, COUT, cardinality=16)
    packed = pack_se_resnext_params(params)              # one-time weight packing/casting
    x = jax.random.normal(kx, (N, H, W, CIN), jnp.float32)   # NHWC

    out = se_resnext_forward(packed, x)
    jax.block_until_ready(out)
    assert out.shape == (N, H, W, COUT)
    assert bool(jnp.isfinite(out).all())
    print("KERNEL_OK")
</pallas_src>

<mosaic_0001>
module attributes {stable_mosaic.version = 11 : i64} {
  func.func @kernel(%arg0: i32, %arg1: memref<256x1xi32, #tpu.memory_space<vmem>>, %arg2: memref<1x256x64xf32, #tpu.memory_space<vmem>>, %arg3: memref<64x256xbf16, #tpu.memory_space<vmem>>, %arg4: memref<1x128xf32, #tpu.memory_space<vmem>>, %arg5: memref<1x128xf32, #tpu.memory_space<vmem>>, %arg6: memref<1x1152x128xbf16, #tpu.memory_space<vmem>>, %arg7: memref<1x128xf32, #tpu.memory_space<vmem>>, %arg8: memref<1x128xf32, #tpu.memory_space<vmem>>, %arg9: memref<128x8xbf16, #tpu.memory_space<vmem>>, %arg10: memref<8x128xbf16, #tpu.memory_space<vmem>>, %arg11: memref<1x256x128xf32, #tpu.memory_space<vmem>>, %arg12: memref<256x1152xbf16, #tpu.memory_space<vmem>>) attributes {dimension_semantics = [#tpu.dimension_semantics<parallel>], iteration_bounds = array<i64: 2>, scalar_prefetch = 0 : i64, scratch_operands = 1 : i64, tpu.core_type = #tpu.core_type<tc>, window_params = [{pipeline_mode = #tpu.pipeline_mode<synchronous>, transform_indices = @transform_0, window_bounds = array<i64: 256, 1>}, {transform_indices = @transform_1, window_bounds = array<i64: 1, 256, 64>}, {pipeline_mode = #tpu.pipeline_mode<synchronous>, transform_indices = @transform_2, window_bounds = array<i64: 64, 256>}, {pipeline_mode = #tpu.pipeline_mode<synchronous>, transform_indices = @transform_3, window_bounds = array<i64: 1, 128>}, {pipeline_mode = #tpu.pipeline_mode<synchronous>, transform_indices = @transform_4, window_bounds = array<i64: 1, 128>}, {pipeline_mode = #tpu.pipeline_mode<synchronous>, transform_indices = @transform_5, window_bounds = array<i64: 1, 1152, 128>}, {pipeline_mode = #tpu.pipeline_mode<synchronous>, transform_indices = @transform_6, window_bounds = array<i64: 1, 128>}, {pipeline_mode = #tpu.pipeline_mode<synchronous>, transform_indices = @transform_7, window_bounds = array<i64: 1, 128>}, {pipeline_mode = #tpu.pipeline_mode<synchronous>, transform_indices = @transform_8, window_bounds = array<i64: 128, 8>}, {pipeline_mode = #tpu.pipeline_mode<synchronous>, transform_indices = @transform_9, window_bounds = array<i64: 8, 128>}, {transform_indices = @transform_10, window_bounds = array<i64: 1, 256, 128>}]} {
    %c0 = arith.constant 0 : index
    %c0_0 = arith.constant 0 : index
    %c0_1 = arith.constant 0 : index
    %0 = vector.load %arg2[%c0, %c0_0, %c0_1] : memref<1x256x64xf32, #tpu.memory_space<vmem>>, vector<1x256x64xf32>
    %1 = vector.shape_cast %0 : vector<1x256x64xf32> to vector<256x64xf32>
    %2 = arith.truncf %1 : vector<256x64xf32> to vector<256x64xbf16>
    %c0_2 = arith.constant 0 : index
    %c0_3 = arith.constant 0 : index
    %3 = vector.load %arg3[%c0_2, %c0_3] : memref<64x256xbf16, #tpu.memory_space<vmem>>, vector<64x256xbf16>
    %cst = arith.constant dense<0.000000e+00> : vector<256x256xf32>
    %4 = tpu.matmul %2, %3, %cst {dimension_numbers = #tpu.dot_dimension_numbers<[1], [0], [0], [1], [0, 0, 1, 1], [], []>} : vector<256x64xbf16>, vector<64x256xbf16>, vector<256x256xf32> -> vector<256x256xf32>
    %5 = vector.extract_strided_slice %4 {offsets = [0, 0], sizes = [256, 128], strides = [1, 1]} : vector<256x256xf32> to vector<256x128xf32>
    %6 = vector.extract_strided_slice %4 {offsets = [0, 128], sizes = [256, 128], strides = [1, 1]} : vector<256x256xf32> to vector<256x128xf32>
    %cst_4 = arith.constant dense<0.000000e+00> : vector<128xf32>
    %7 = vector.multi_reduction <add>, %5, %cst_4 [0] : vector<256x128xf32> to vector<128xf32>
    %8 = vector.shape_cast %7 : vector<128xf32> to vector<1x128xf32>
    %cst_5 = arith.constant 2.560000e+02 : f32
    %9 = vector.broadcast %cst_5 : f32 to vector<1x128xf32>
    %10 = arith.divf %8, %9 : vector<1x128xf32>
    %11 = arith.mulf %5, %5 : vector<256x128xf32>
    %cst_6 = arith.constant dense<0.000000e+00> : vector<128xf32>
    %12 = vector.multi_reduction <add>, %11, %cst_6 [0] : vector<256x128xf32> to vector<128xf32>
    %13 = vector.shape_cast %12 : vector<128xf32> to vector<1x128xf32>
    %cst_7 = arith.constant 2.560000e+02 : f32
    %14 = vector.broadcast %cst_7 : f32 to vector<1x128xf32>
    %15 = arith.divf %13, %14 : vector<1x128xf32>
    %16 = arith.mulf %10, %10 : vector<1x128xf32>
    %17 = arith.subf %15, %16 : vector<1x128xf32>
    %cst_8 = arith.constant 0.000000e+00 : f32
    %18 = vector.broadcast %cst_8 : f32 to vector<1x128xf32>
    %19 = arith.maximumf %17, %18 : vector<1x128xf32>
    %c0_9 = arith.constant 0 : index
    %c0_10 = arith.constant 0 : index
    %20 = vector.load %arg4[%c0_9, %c0_10] : memref<1x128xf32, #tpu.memory_space<vmem>>, vector<1x128xf32>
    %cst_11 = arith.constant 9.99999974E-6 : f32
    %21 = vector.broadcast %cst_11 : f32 to vector<1x128xf32>
    %22 = arith.addf %19, %21 : vector<1x128xf32>
    %23 = math.rsqrt %22 : vector<1x128xf32>
    %24 = arith.mulf %20, %23 : vector<1x128xf32>
    %c0_12 = arith.constant 0 : index
    %c0_13 = arith.constant 0 : index
    %25 = vector.load %arg5[%c0_12, %c0_13] : memref<1x128xf32, #tpu.memory_space<vmem>>, vector<1x128xf32>
    %26 = arith.mulf %10, %24 : vector<1x128xf32>
    %27 = arith.subf %25, %26 : vector<1x128xf32>
    %28 = vector.broadcast %24 : vector<1x128xf32> to vector<256x128xf32>
    %29 = arith.mulf %5, %28 : vector<256x128xf32>
    %30 = vector.broadcast %27 : vector<1x128xf32> to vector<256x128xf32>
    %31 = arith.addf %29, %30 : vector<256x128xf32>
    %cst_14 = arith.constant 0.000000e+00 : f32
    %32 = vector.broadcast %cst_14 : f32 to vector<256x128xf32>
    %33 = arith.cmpf oge, %31, %32 : vector<256x128xf32>
    %cst_15 = arith.constant 2.000000e-01 : f32
    %34 = vector.broadcast %cst_15 : f32 to vector<256x128xf32>
    %35 = arith.mulf %34, %31 : vector<256x128xf32>
    %36 = arith.select %33, %31, %35 : vector<256x128xi1>, vector<256x128xf32>
    %37 = tpu.iota {dimensions = array<i32: 0>} : vector<256x1xi32>
    %c0_16 = arith.constant 0 : index
    %c0_17 = arith.constant 0 : index
    %38 = vector.load %arg1[%c0_16, %c0_17] : memref<256x1xi32, #tpu.memory_space<vmem>>, vector<256x1xi32>
    %c16_i32 = arith.constant 16 : i32
    %39 = vector.broadcast %c16_i32 : i32 to vector<256x1xi32>
    %40 = arith.cmpi sge, %37, %39 : vector<256x1xi32>
    %c1_i32 = arith.constant 1 : i32
    %41 = vector.broadcast %c1_i32 : i32 to vector<256x1xi32>
    %42 = arith.cmpi sge, %38, %41 : vector<256x1xi32>
    %43 = arith.andi %40, %42 : vector<256x1xi1>
    %c16_i32_18 = arith.constant 16 : i32
    %44 = vector.broadcast %c16_i32_18 : i32 to vector<256x1xi32>
    %45 = arith.cmpi sge, %37, %44 : vector<256x1xi32>
    %c16_i32_19 = arith.constant 16 : i32
    %46 = vector.broadcast %c16_i32_19 : i32 to vector<256x1xi32>
    %47 = arith.cmpi sge, %37, %46 : vector<256x1xi32>
    %c15_i32 = arith.constant 15 : i32
    %48 = vector.broadcast %c15_i32 : i32 to vector<256x1xi32>
    %49 = arith.cmpi slt, %38, %48 : vector<256x1xi32>
    %50 = arith.andi %47, %49 : vector<256x1xi1>
    %c1_i32_20 = arith.constant 1 : i32
    %51 = vector.broadcast %c1_i32_20 : i32 to vector<256x1xi32>
    %52 = arith.cmpi sge, %38, %51 : vector<256x1xi32>
    %c15_i32_21 = arith.constant 15 : i32
    %53 = vector.broadcast %c15_i32_21 : i32 to vector<256x1xi32>
    %54 = arith.cmpi slt, %38, %53 : vector<256x1xi32>
    %c240_i32 = arith.constant 240 : i32
    %55 = vector.broadcast %c240_i32 : i32 to vector<256x1xi32>
    %56 = arith.cmpi slt, %37, %55 : vector<256x1xi32>
    %c1_i32_22 = arith.constant 1 : i32
    %57 = vector.broadcast %c1_i32_22 : i32 to vector<256x1xi32>
    %58 = arith.cmpi sge, %38, %57 : vector<256x1xi32>
    %59 = arith.andi %56, %58 : vector<256x1xi1>
    %c240_i32_23 = arith.constant 240 : i32
    %60 = vector.broadcast %c240_i32_23 : i32 to vector<256x1xi32>
    %61 = arith.cmpi slt, %37, %60 : vector<256x1xi32>
    %c240_i32_24 = arith.constant 240 : i32
    %62 = vector.broadcast %c240_i32_24 : i32 to vector<256x1xi32>
    %63 = arith.cmpi slt, %37, %62 : vector<256x1xi32>
    %c15_i32_25 = arith.constant 15 : i32
    %64 = vector.broadcast %c15_i32_25 : i32 to vector<256x1xi32>
    %65 = arith.cmpi slt, %38, %64 : vector<256x1xi32>
    %66 = arith.andi %63, %65 : vector<256x1xi1>
    %c17_i32 = arith.constant 17 : i32
    %67 = tpu.dynamic_rotate %36 by %c17_i32 dim 0 : vector<256x128xf32>, i32 -> vector<256x128xf32>
    %cst_26 = arith.constant 0.000000e+00 : f32
    %68 = vector.shape_cast %43 : vector<256x1xi1> to vector<256x1xi1>
    %69 = vector.broadcast %68 : vector<256x1xi1> to vector<256x128xi1>
    %70 = vector.broadcast %cst_26 : f32 to vector<256x128xf32>
    %71 = arith.select %69, %67, %70 : vector<256x128xi1>, vector<256x128xf32>
    %72 = arith.truncf %71 : vector<256x128xf32> to vector<256x128xbf16>
    %c0_27 = arith.constant 0 : index
    %c0_28 = arith.constant 0 : index
    %73 = vector.load %arg12[%c0_27, %c0_28] : memref<256x1152xbf16, #tpu.memory_space<vmem>>, vector<256x128xbf16>
    tpu.vector_store %arg12[%c0_27, %c0_28], %72 {strides = array<i32>} : memref<256x1152xbf16, #tpu.memory_space<vmem>>, vector<256x128xbf16>,
    %c16_i32_29 = arith.constant 16 : i32
    %74 = tpu.dynamic_rotate %36 by %c16_i32_29 dim 0 : vector<256x128xf32>, i32 -> vector<256x128xf32>
    %cst_30 = arith.constant 0.000000e+00 : f32
    %75 = vector.shape_cast %45 : vector<256x1xi1> to vector<256x1xi1>
    %76 = vector.broadcast %75 : vector<256x1xi1> to vector<256x128xi1>
    %77 = vector.broadcast %cst_30 : f32 to vector<256x128xf32>
    %78 = arith.select %76, %74, %77 : vector<256x128xi1>, vector<256x128xf32>
    %79 = arith.truncf %78 : vector<256x128xf32> to vector<256x128xbf16>
    %c0_31 = arith.constant 0 : index
    %c128 = arith.constant 128 : index
    %80 = vector.load %arg12[%c0_31, %c128] : memref<256x1152xbf16, #tpu.memory_space<vmem>>, vector<256x128xbf16>
    tpu.vector_store %arg12[%c0_31, %c128], %79 {strides = array<i32>} : memref<256x1152xbf16, #tpu.memory_space<vmem>>, vector<256x128xbf16>,
    %c15_i32_32 = arith.constant 15 : i32
    %81 = tpu.dynamic_rotate %36 by %c15_i32_32 dim 0 : vector<256x128xf32>, i32 -> vector<256x128xf32>
    %cst_33 = arith.constant 0.000000e+00 : f32
    %82 = vector.shape_cast %50 : vector<256x1xi1> to vector<256x1xi1>
    %83 = vector.broadcast %82 : vector<256x1xi1> to vector<256x128xi1>
    %84 = vector.broadcast %cst_33 : f32 to vector<256x128xf32>
    %85 = arith.select %83, %81, %84 : vector<256x128xi1>, vector<256x128xf32>
    %86 = arith.truncf %85 : vector<256x128xf32> to vector<256x128xbf16>
    %c0_34 = arith.constant 0 : index
    %c256 = arith.constant 256 : index
    %87 = vector.load %arg12[%c0_34, %c256] : memref<256x1152xbf16, #tpu.memory_space<vmem>>, vector<256x128xbf16>
    tpu.vector_store %arg12[%c0_34, %c256], %86 {strides = array<i32>} : memref<256x1152xbf16, #tpu.memory_space<vmem>>, vector<256x128xbf16>,
    %c1_i32_35 = arith.constant 1 : i32
    %88 = tpu.dynamic_rotate %36 by %c1_i32_35 dim 0 : vector<256x128xf32>, i32 -> vector<256x128xf32>
    %cst_36 = arith.constant 0.000000e+00 : f32
    %89 = vector.shape_cast %52 : vector<256x1xi1> to vector<256x1xi1>
    %90 = vector.broadcast %89 : vector<256x1xi1> to vector<256x128xi1>
    %91 = vector.broadcast %cst_36 : f32 to vector<256x128xf32>
    %92 = arith.select %90, %88, %91 : vector<256x128xi1>, vector<256x128xf32>
    %93 = arith.truncf %92 : vector<256x128xf32> to vector<256x128xbf16>
    %c0_37 = arith.constant 0 : index
    %c384 = arith.constant 384 : index
    %94 = vector.load %arg12[%c0_37, %c384] : memref<256x1152xbf16, #tpu.memory_space<vmem>>, vector<256x128xbf16>
    tpu.vector_store %arg12[%c0_37, %c384], %93 {strides = array<i32>} : memref<256x1152xbf16, #tpu.memory_space<vmem>>, vector<256x128xbf16>,
    %95 = arith.truncf %36 : vector<256x128xf32> to vector<256x128xbf16>
    %c0_38 = arith.constant 0 : index
    %c512 = arith.constant 512 : index
    %96 = vector.load %arg12[%c0_38, %c512] : memref<256x1152xbf16, #tpu.memory_space<vmem>>, vector<256x128xbf16>
    tpu.vector_store %arg12[%c0_38, %c512], %95 {strides = array<i32>} : memref<256x1152xbf16, #tpu.memory_space<vmem>>, vector<256x128xbf16>,
    %c255_i32 = arith.constant 255 : i32
    %97 = tpu.dynamic_rotate %36 by %c255_i32 dim 0 : vector<256x128xf32>, i32 -> vector<256x128xf32>
    %cst_39 = arith.constant 0.000000e+00 : f32
    %98 = vector.shape_cast %54 : vector<256x1xi1> to vector<256x1xi1>
    %99 = vector.broadcast %98 : vector<256x1xi1> to vector<256x128xi1>
    %100 = vector.broadcast %cst_39 : f32 to vector<256x128xf32>
    %101 = arith.select %99, %97, %100 : vector<256x128xi1>, vector<256x128xf32>
    %102 = arith.truncf %101 : vector<256x128xf32> to vector<256x128xbf16>
    %c0_40 = arith.constant 0 : index
    %c640 = arith.constant 640 : index
    %103 = vector.load %arg12[%c0_40, %c640] : memref<256x1152xbf16, #tpu.memory_space<vmem>>, vector<256x128xbf16>
    tpu.vector_store %arg12[%c0_40, %c640], %102 {strides = array<i32>} : memref<256x1152xbf16, #tpu.memory_space<vmem>>, vector<256x128xbf16>,
    %c241_i32 = arith.constant 241 : i32
    %104 = tpu.dynamic_rotate %36 by %c241_i32 dim 0 : vector<256x128xf32>, i32 -> vector<256x128xf32>
    %cst_41 = arith.constant 0.000000e+00 : f32
    %105 = vector.shape_cast %59 : vector<256x1xi1> to vector<256x1xi1>
    %106 = vector.broadcast %105 : vector<256x1xi1> to vector<256x128xi1>
    %107 = vector.broadcast %cst_41 : f32 to vector<256x128xf32>
    %108 = arith.select %106, %104, %107 : vector<256x128xi1>, vector<256x128xf32>
    %109 = arith.truncf %108 : vector<256x128xf32> to vector<256x128xbf16>
    %c0_42 = arith.constant 0 : index
    %c768 = arith.constant 768 : index
    %110 = vector.load %arg12[%c0_42, %c768] : memref<256x1152xbf16, #tpu.memory_space<vmem>>, vector<256x128xbf16>
    tpu.vector_store %arg12[%c0_42, %c768], %109 {strides = array<i32>} : memref<256x1152xbf16, #tpu.memory_space<vmem>>, vector<256x128xbf16>,
    %c240_i32_43 = arith.constant 240 : i32
    %111 = tpu.dynamic_rotate %36 by %c240_i32_43 dim 0 : vector<256x128xf32>, i32 -> vector<256x128xf32>
    %cst_44 = arith.constant 0.000000e+00 : f32
    %112 = vector.shape_cast %61 : vector<256x1xi1> to vector<256x1xi1>
    %113 = vector.broadcast %112 : vector<256x1xi1> to vector<256x128xi1>
    %114 = vector.broadcast %cst_44 : f32 to vector<256x128xf32>
    %115 = arith.select %113, %111, %114 : vector<256x128xi1>, vector<256x128xf32>
    %116 = arith.truncf %115 : vector<256x128xf32> to vector<256x128xbf16>
    %c0_45 = arith.constant 0 : index
    %c896 = arith.constant 896 : index
    %117 = vector.load %arg12[%c0_45, %c896] : memref<256x1152xbf16, #tpu.memory_space<vmem>>, vector<256x128xbf16>
    tpu.vector_store %arg12[%c0_45, %c896], %116 {strides = array<i32>} : memref<256x1152xbf16, #tpu.memory_space<vmem>>, vector<256x128xbf16>,
    %c239_i32 = arith.constant 239 : i32
    %118 = tpu.dynamic_rotate %36 by %c239_i32 dim 0 : vector<256x128xf32>, i32 -> vector<256x128xf32>
    %cst_46 = arith.constant 0.000000e+00 : f32
    %119 = vector.shape_cast %66 : vector<256x1xi1> to vector<256x1xi1>
    %120 = vector.broadcast %119 : vector<256x1xi1> to vector<256x128xi1>
    %121 = vector.broadcast %cst_46 : f32 to vector<256x128xf32>
    %122 = arith.select %120, %118, %121 : vector<256x128xi1>, vector<256x128xf32>
    %123 = arith.truncf %122 : vector<256x128xf32> to vector<256x128xbf16>
    %c0_47 = arith.constant 0 : index
    %c1024 = arith.constant 1024 : index
    %124 = vector.load %arg12[%c0_47, %c1024] : memref<256x1152xbf16, #tpu.memory_space<vmem>>, vector<256x128xbf16>
    tpu.vector_store %arg12[%c0_47, %c1024], %123 {strides = array<i32>} : memref<256x1152xbf16, #tpu.memory_space<vmem>>, vector<256x128xbf16>,
    %c0_48 = arith.constant 0 : index
    %c0_49 = arith.constant 0 : index
    %125 = vector.load %arg12[%c0_48, %c0_49] : memref<256x1152xbf16, #tpu.memory_space<vmem>>, vector<256x1152xbf16>
    %c0_50 = arith.constant 0 : index
    %c0_51 = arith.constant 0 : index
    %c0_52 = arith.constant 0 : index
    %126 = vector.load %arg6[%c0_50, %c0_51, %c0_52] : memref<1x1152x128xbf16, #tpu.memory_space<vmem>>, vector<1x1152x128xbf16>
    %127 = vector.shape_cast %126 : vector<1x1152x128xbf16> to vector<1152x128xbf16>
    %cst_53 = arith.constant dense<0.000000e+00> : vector<256x128xf32>
    %128 = tpu.matmul %125, %127, %cst_53 {dimension_numbers = #tpu.dot_dimension_numbers<[1], [0], [0], [1], [0, 0, 1, 1], [], []>} : vector<256x1152xbf16>, vector<1152x128xbf16>, vector<256x128xf32> -> vector<256x128xf32>
    %cst_54 = arith.constant dense<0.000000e+00> : vector<128xf32>
    %129 = vector.multi_reduction <add>, %128, %cst_54 [0] : vector<256x128xf32> to vector<128xf32>
    %130 = vector.shape_cast %129 : vector<128xf32> to vector<1x128xf32>
    %cst_55 = arith.constant 2.560000e+02 : f32
    %131 = vector.broadcast %cst_55 : f32 to vector<1x128xf32>
    %132 = arith.divf %130, %131 : vector<1x128xf32>
    %133 = arith.mulf %128, %128 : vector<256x128xf32>
    %cst_56 = arith.constant dense<0.000000e+00> : vector<128xf32>
    %134 = vector.multi_reduction <add>, %133, %cst_56 [0] : vector<256x128xf32> to vector<128xf32>
    %135 = vector.shape_cast %134 : vector<128xf32> to vector<1x128xf32>
    %cst_57 = arith.constant 2.560000e+02 : f32
    %136 = vector.broadcast %cst_57 : f32 to vector<1x128xf32>
    %137 = arith.divf %135, %136 : vector<1x128xf32>
    %138 = arith.mulf %132, %132 : vector<1x128xf32>
    %139 = arith.subf %137, %138 : vector<1x128xf32>
    %cst_58 = arith.constant 0.000000e+00 : f32
    %140 = vector.broadcast %cst_58 : f32 to vector<1x128xf32>
    %141 = arith.maximumf %139, %140 : vector<1x128xf32>
    %c0_59 = arith.constant 0 : index
    %c0_60 = arith.constant 0 : index
    %142 = vector.load %arg7[%c0_59, %c0_60] : memref<1x128xf32, #tpu.memory_space<vmem>>, vector<1x128xf32>
    %cst_61 = arith.constant 9.99999974E-6 : f32
    %143 = vector.broadcast %cst_61 : f32 to vector<1x128xf32>
    %144 = arith.addf %141, %143 : vector<1x128xf32>
    %145 = math.rsqrt %144 : vector<1x128xf32>
    %146 = arith.mulf %142, %145 : vector<1x128xf32>
    %c0_62 = arith.constant 0 : index
    %c0_63 = arith.constant 0 : index
    %147 = vector.load %arg8[%c0_62, %c0_63] : memref<1x128xf32, #tpu.memory_space<vmem>>, vector<1x128xf32>
    %148 = arith.mulf %132, %146 : vector<1x128xf32>
    %149 = arith.subf %147, %148 : vector<1x128xf32>
    %150 = vector.broadcast %146 : vector<1x128xf32> to vector<256x128xf32>
    %151 = arith.mulf %128, %150 : vector<256x128xf32>
    %152 = vector.broadcast %149 : vector<1x128xf32> to vector<256x128xf32>
    %153 = arith.addf %151, %152 : vector<256x128xf32>
    %cst_64 = arith.constant 0.000000e+00 : f32
    %154 = vector.broadcast %cst_64 : f32 to vector<256x128xf32>
    %155 = arith.cmpf oge, %153, %154 : vector<256x128xf32>
    %cst_65 = arith.constant 2.000000e-01 : f32
    %156 = vector.broadcast %cst_65 : f32 to vector<256x128xf32>
    %157 = arith.mulf %156, %153 : vector<256x128xf32>
    %158 = arith.select %155, %153, %157 : vector<256x128xi1>, vector<256x128xf32>
    %cst_66 = arith.constant dense<0.000000e+00> : vector<128xf32>
    %159 = vector.multi_reduction <add>, %158, %cst_66 [0] : vector<256x128xf32> to vector<128xf32>
    %160 = vector.shape_cast %159 : vector<128xf32> to vector<1x128xf32>
    %cst_67 = arith.constant 2.560000e+02 : f32
    %161 = vector.broadcast %cst_67 : f32 to vector<1x128xf32>
    %162 = arith.divf %160, %161 : vector<1x128xf32>
    %c0_68 = arith.constant 0 : index
    %c0_69 = arith.constant 0 : index
    %c0_70 = arith.constant 0 : index
    %163 = vector.load %arg11[%c0_68, %c0_69, %c0_70] : memref<1x256x128xf32, #tpu.memory_space<vmem>>, vector<1x256x128xf32>
    %164 = vector.shape_cast %163 : vector<1x256x128xf32> to vector<256x128xf32>
    %165 = vector.shape_cast %158 : vector<256x128xf32> to vector<1x256x128xf32>
    tpu.vector_store %arg11[%c0_68, %c0_69, %c0_70], %165 {strides = array<i32>} : memref<1x256x128xf32, #tpu.memory_space<vmem>>, vector<1x256x128xf32>,
    %166 = arith.truncf %162 : vector<1x128xf32> to vector<1x128xbf16>
    %c0_71 = arith.constant 0 : index
    %c0_72 = arith.constant 0 : index
    %167 = vector.load %arg9[%c0_71, %c0_72] : memref<128x8xbf16, #tpu.memory_space<vmem>>, vector<128x8xbf16>
    %cst_73 = arith.constant dense<0.000000e+00> : vector<1x8xf32>
    %168 = tpu.matmul %166, %167, %cst_73 {dimension_numbers = #tpu.dot_dimension_numbers<[1], [0], [0], [1], [0, 0, 1, 1], [], []>} : vector<1x128xbf16>, vector<128x8xbf16>, vector<1x8xf32> -> vector<1x8xf32>
    %cst_74 = arith.constant 0.000000e+00 : f32
    %169 = vector.broadcast %cst_74 : f32 to vector<1x8xf32>
    %170 = arith.maximumf %168, %169 : vector<1x8xf32>
    %171 = arith.truncf %170 : vector<1x8xf32> to vector<1x8xbf16>
    %c0_75 = arith.constant 0 : index
    %c0_76 = arith.constant 0 : index
    %172 = vector.load %arg10[%c0_75, %c0_76] : memref<8x128xbf16, #tpu.memory_space<vmem>>, vector<8x128xbf16>
    %cst_77 = arith.constant dense<0.000000e+00> : vector<1x128xf32>
    %173 = tpu.matmul %171, %172, %cst_77 {dimension_numbers = #tpu.dot_dimension_numbers<[1], [0], [0], [1], [0, 0, 1, 1], [], []>} : vector<1x8xbf16>, vector<8x128xbf16>, vector<1x128xf32> -> vector<1x128xf32>
    %174 = arith.negf %173 : vector<1x128xf32>
    %175 = math.exp %174 : vector<1x128xf32>
    %cst_78 = arith.constant 1.000000e+00 : f32
    %176 = vector.broadcast %cst_78 : f32 to vector<1x128xf32>
    %177 = arith.addf %176, %175 : vector<1x128xf32>
    %178 = arith.divf %176, %177 : vector<1x128xf32>
    %c0_79 = arith.constant 0 : index
    %c0_80 = arith.constant 0 : index
    %c0_81 = arith.constant 0 : index
    %179 = vector.load %arg11[%c0_79, %c0_80, %c0_81] : memref<1x256x128xf32, #tpu.memory_space<vmem>>, vector<1x256x128xf32>
    %180 = vector.shape_cast %179 : vector<1x256x128xf32> to vector<256x128xf32>
    %181 = vector.broadcast %178 : vector<1x128xf32> to vector<256x128xf32>
    %182 = arith.mulf %180, %181 : vector<256x128xf32>
    %183 = arith.addf %182, %6 : vector<256x128xf32>
    %c0_82 = arith.constant 0 : index
    %c0_83 = arith.constant 0 : index
    %c0_84 = arith.constant 0 : index
    %184 = vector.load %arg11[%c0_82, %c0_83, %c0_84] : memref<1x256x128xf32, #tpu.memory_space<vmem>>, vector<1x256x128xf32>
    %185 = vector.shape_cast %184 : vector<1x256x128xf32> to vector<256x128xf32>
    %186 = vector.shape_cast %183 : vector<256x128xf32> to vector<1x256x128xf32>
    tpu.vector_store %arg11[%c0_82, %c0_83, %c0_84], %186 {strides = array<i32>} : memref<1x256x128xf32, #tpu.memory_space<vmem>>, vector<1x256x128xf32>,
    return
  }
  func.func @transform_0(%arg0: i32) -> (i32, i32) {
    %c0_i32 = arith.constant 0 : i32
    %c0_i32_0 = arith.constant 0 : i32
    %c0_i32_1 = arith.constant 0 : i32
    return %c0_i32, %c0_i32_0 : i32, i32
  }
  func.func @transform_1(%arg0: i32) -> (i32, i32, i32) {
    %c0_i32 = arith.constant 0 : i32
    %c0_i32_0 = arith.constant 0 : i32
    %c0_i32_1 = arith.constant 0 : i32
    return %arg0, %c0_i32, %c0_i32_0 : i32, i32, i32
  }
  func.func @transform_2(%arg0: i32) -> (i32, i32) {
    %c0_i32 = arith.constant 0 : i32
    %c0_i32_0 = arith.constant 0 : i32
    %c0_i32_1 = arith.constant 0 : i32
    return %c0_i32, %c0_i32_0 : i32, i32
  }
  func.func @transform_3(%arg0: i32) -> (i32, i32) {
    %c0_i32 = arith.constant 0 : i32
    %c0_i32_0 = arith.constant 0 : i32
    %c0_i32_1 = arith.constant 0 : i32
    return %c0_i32, %c0_i32_0 : i32, i32
  }
  func.func @transform_4(%arg0: i32) -> (i32, i32) {
    %c0_i32 = arith.constant 0 : i32
    %c0_i32_0 = arith.constant 0 : i32
    %c0_i32_1 = arith.constant 0 : i32
    return %c0_i32, %c0_i32_0 : i32, i32
  }
  func.func @transform_5(%arg0: i32) -> (i32, i32, i32) {
    %c0_i32 = arith.constant 0 : i32
    %c0_i32_0 = arith.constant 0 : i32
    %c0_i32_1 = arith.constant 0 : i32
    %c0_i32_2 = arith.constant 0 : i32
    return %c0_i32, %c0_i32_0, %c0_i32_1 : i32, i32, i32
  }
  func.func @transform_6(%arg0: i32) -> (i32, i32) {
    %c0_i32 = arith.constant 0 : i32
    %c0_i32_0 = arith.constant 0 : i32
    %c0_i32_1 = arith.constant 0 : i32
    return %c0_i32, %c0_i32_0 : i32, i32
  }
  func.func @transform_7(%arg0: i32) -> (i32, i32) {
    %c0_i32 = arith.constant 0 : i32
    %c0_i32_0 = arith.constant 0 : i32
    %c0_i32_1 = arith.constant 0 : i32
    return %c0_i32, %c0_i32_0 : i32, i32
  }
  func.func @transform_8(%arg0: i32) -> (i32, i32) {
    %c0_i32 = arith.constant 0 : i32
    %c0_i32_0 = arith.constant 0 : i32
    %c0_i32_1 = arith.constant 0 : i32
    return %c0_i32, %c0_i32_0 : i32, i32
  }
  func.func @transform_9(%arg0: i32) -> (i32, i32) {
    %c0_i32 = arith.constant 0 : i32
    %c0_i32_0 = arith.constant 0 : i32
    %c0_i32_1 = arith.constant 0 : i32
    return %c0_i32, %c0_i32_0 : i32, i32
  }
  func.func @transform_10(%arg0: i32) -> (i32, i32, i32) {
    %c0_i32 = arith.constant 0 : i32
    %c0_i32_0 = arith.constant 0 : i32
    %c0_i32_1 = arith.constant 0 : i32
    return %arg0, %c0_i32, %c0_i32_0 : i32, i32, i32
  }
}

</mosaic_0001>

<bundles_post_ra>
// kernel: se_resnext_forward.1
= control target key start
LH: loop header
LB: loop body
LE: loop exit
PB: predicated region body
PF: predicated region fallthrough
CT: control target
= control target key end

     0   :  { %15 = vsyncpa [#allocation4], 0  ;;  %s10434_s0 = inlined_call_operand.vmem [shape: s32[256,1], index: 0, kind: input, shape index: {}]   ;;  %s10435_s1 = inlined_call_operand.hbm [shape: f32[2,256,64], index: 1, kind: input, shape index: {}]   ;;  %s10436_s2 = inlined_call_operand.vmem [shape: bf16[64,256], index: 2, kind: input, shape index: {}]   ;;  %s10437_s3 = inlined_call_operand.vmem [shape: f32[1,128], index: 3, kind: input, shape index: {}]   ;;  %s10438_s4 = inlined_call_operand.vmem [shape: f32[1,128], index: 4, kind: input, shape index: {}]   ;;  %s10439_s5 = inlined_call_operand.hbm [shape: bf16[1,1152,128], index: 5, kind: input, shape index: {}]   ;;  %s10440_s6 = inlined_call_operand.vmem [shape: f32[1,128], index: 6, kind: input, shape index: {}]   ;;  %s10441_s7 = inlined_call_operand.vmem [shape: f32[1,128], index: 7, kind: input, shape index: {}]   ;;  %s10442_s8 = inlined_call_operand.vmem [shape: bf16[128,8], index: 8, kind: input, shape index: {}]   ;;  %s10443_s9 = inlined_call_operand.vmem [shape: bf16[8,128], index: 9, kind: input, shape index: {}]   ;;  %s10444_s10 = inlined_call_operand.hbm [shape: f32[2,256,128], index: 10, kind: output, shape index: {}]  }
   0x1   :  { %17 = vsyncpa [#allocation4 + $0x1], 0 }
   0x2   :  { %18 = vsyncpa [#allocation7], 0 }
   0x3   :  { %19 = vsyncpa [#allocation5], 0 }
   0x4   :  { %21 = vsyncpa [#allocation5 + $0x1], 0  ;;  %s6738_s13 = smov 0   ;;  %s6740_s14 = smov 0  }
   0x5   :  { %s6742_s15 = smov 0   ;;  %s6744_s16 = smov 0  }
   0x6 LB: > { %10558 = sst [smem:[#allocation12_spill]] %s6656_s13  ;;  %s6759_s17 = sadd.s32 4294967295, %s6668_s16   ;;  %s6668_s16 = sphi %s6744_s16, %s11335_s16   ;;  %s6664_s15 = sphi %s6742_s15, %s11338_s15   ;;  %s6660_s14 = sphi %s6740_s14, %s11337_s14   ;;  %s6656_s13 = sphi %s6738_s13, %s11336_s13  }
   0x7   : > { %s5382_s18 = sadd.s32 4294967294, %s6668_s16   ;;  %p68_p0 = scmp.ne.s32.totalorder %s6660_s14, %s6656_s13 }
   0x8   : > { %p10447_p1 = scmp.eq.s32.totalorder %s6759_s17, 0  ;;  %p266_p3 = scmp.eq.s32.totalorder %s5382_s18, 1 }
   0x9   : > { %p5383_p5 = scmp.ge.s32.totalorder %s6668_s16, 1  ;;  %p273_p7 = scmp.lt.s32.totalorder %s6668_s16, 3 }
   0xa   : > { %p6768_p4 = por %p10447_p1, %p68_p0  ;;  %p6773_p6 = por %p266_p3, %p68_p0 }
   0xb   : > { %p6778_p8 = pnand %p5383_p5, %p273_p7  ;;  %s6670_s22 = smov [#allocation6]  }
   0xc   : > { %s10559_s19 = scalar_select %p6768_p4, 1, 0 }
   0xd   : > { %s10560_s20 = scalar_select %p6773_p6, 1, 0 }
   0xe   : > { %s10562_s21 = scalar_select %p6778_p8, 1, 0 }
   0xf   : > { %10561 = sst [smem:[#allocation13_spill]] %s10560_s20  ;;  %s297_s23 = sshll.u32 %s6670_s22, 4  ;;  %s6782_s23 = int_to_ptr.vmem [resolvable:$true] %s297_s23 }
  0x10   : > { %p6359_p9 = pneg %p6778_p8  ;;  %s6794_s25 = sadd.s32 1, %s6668_s16  }
  0x11   : > { %10564 = sst [smem:[#allocation14_spill]] %s6794_s25  ;;  %s55_s26 = sadd.s32 1, %s6664_s15 }
  0x12   : > { %p6789_p11 = pnand %p6359_p9, %p10447_p1  ;;  %s52_s27 = ssub.s32 %s6668_s16, %s6794_s25 }
  0x13   : > { %s6540_s30 = scalar_lea.hbm %s10439_s5, 9216 }
  0x14   : > { %p6541_p12 = scmp.ne.s32.totalorder %s10439_s5, %s6540_s30  ;;  %p6542_p13 = pneg %p6789_p11 }
  0x15   : > { %p6547_p5 = scmp.lt.u32.totalorder %s6540_s30, %s10439_s5 }
  0x16   : > { %p6543_p0 = pnand %p6542_p13, %p6541_p12 }
  0x18   : > { %p6544_p3 = pneg %p6543_p0 }
  0x1a   : > { %p6549_p7 = pnand %p6547_p5, %p6544_p3 }
  0x1c   : > { %6552 = shalt.err (!%p6549_p7)
}
  0x1d   : > { %s6553_s25 = scalar_lea.vmem %s6782_s23, 9216  ;;  %p6561_p2 = scmp.lt.s32.totalorder %s6782_s23, %s6782_s23 }
  0x1e   : > { %p6554_p9 = scmp.ne.s32.totalorder %s6782_s23, %s6553_s25  ;;  %p6562_p6 = scmp.lt.s32.totalorder %s6553_s25, %s6553_s25 }
  0x20   : > { %p6556_p10 = pnand %p6554_p9, %p6542_p13  ;;  %p6563_p4 = por %p6562_p6, %p6561_p2 }
  0x22   : > { %p6557_p1 = pneg %p6556_p10 }
  0x24   : > { %p6564_p8 = pnand %p6563_p4, %p6557_p1 }
  0x26   : > { %6567 = shalt.err (!%p6564_p8)
}
  0x27   : > { %s6671_s28 = smov 64   ;;  %s6672_s29 = smov 4  }
  0x28   : > { %6362 = dma.hbm_to_vmem [thread:$0]  (!%p6789_p11), %s10439_s5, 9216, %s6782_s23, [#allocation7], %s6671_s28, %s6671_s28, %s6672_s29  }
  0x29   : > { %p53_p2 = scmp.eq.s32.totalorder %s52_s27, 0  ;;  %p62_p1 = scmp.ne.s32.totalorder %s6664_s15, %s6660_s14 }
  0x2a   : > { %p63_p4 = scmp.eq.s32.totalorder %s6668_s16, 0  ;;  %p6372_p6 = scmp.lt.s32.totalorder %s6668_s16, 2 }
  0x2b   : > { %s6825_s25 = scalar_select %p53_p2, %s6664_s15, %s55_s26  }
  0x2c   : > { %p64_p8 = por %p63_p4, %p62_p1  ;;  %p10565_p10 = scmp.eq.s32.totalorder %s6759_s17, 1 }
  0x2d   : > { %s323_s18 = sand.u32 1, %s6664_s15   ;;  %s5504_s22 = sshll.u32 %s6668_s16, 12 }
  0x2e   : > { %p6829_p12 = por %p10565_p10, %p62_p1  ;;  %s5386_s20 = sshll.u32 %s323_s18, 8 }
  0x2f   : > { %s6838_s30 = scalar_lea.hbm %s10435_s1, %s5504_s22  ;;  %s327_s23 = scalar_lea.vmem [#allocation3], %s5386_s20 }
  0x30   : > { %s334_s26 = sshll.u32 %s327_s23, 4  ;;  %p6840_p11 = pnand %p6372_p6, %p64_p8  ;;  %s6844_s26 = int_to_ptr.vmem [resolvable:$true] %s334_s26 }
  0x31   : > { %s6846_s28 = scalar_lea.sflag [#allocation4], %s323_s18  ;;  %s6568_s29 = scalar_lea.hbm %s6838_s30, 4096 }
  0x32   : > { %p6569_p13 = scmp.ne.s32.totalorder %s6838_s30, %s6568_s29  ;;  %p6570_p0 = pneg %p6840_p11 }
  0x33   : > { %s6573_s11 = scalar_lea.hbm %s10435_s1, 8192  ;;  %p6574_p7 = scmp.lt.u32.totalorder %s6838_s30, %s10435_s1 }
  0x34   : > { %p6571_p3 = pnand %p6570_p0, %p6569_p13  ;;  %p6575_p9 = scmp.lt.u32.totalorder %s6573_s11, %s6568_s29 }
  0x35   : > { %p6577_p1 = scmp.lt.u32.totalorder %s6568_s29, %s6838_s30 }
  0x36   : > { %p6572_p5 = pneg %p6571_p3  ;;  %p6576_p2 = por %p6575_p9, %p6574_p7 }
  0x38   : > { %p6578_p4 = por %p6577_p1, %p6576_p2 }
  0x3a   : > { %p6579_p6 = pnand %p6578_p4, %p6572_p5 }
  0x3c   : > { %6582 = shalt.err (!%p6579_p6)
}
  0x3d   : > { %s6583_s18 = scalar_lea.vmem %s6844_s26, 4096  ;;  %s6673_s23 = smov [#allocation3]  }
  0x3e   : > { %p6584_p8 = scmp.ne.s32.totalorder %s6844_s26, %s6583_s18  ;;  %s6588_s13 = sshll.u32 %s6673_s23, 4  ;;  %s6589_s13 = int_to_ptr.vmem [resolvable:$false] %s6588_s13 }
  0x3f   : > { %s6590_s20 = scalar_lea.vmem %s6589_s13, 8192  ;;  %p6591_p3 = scmp.lt.s32.totalorder %s6844_s26, %s6589_s13 }
  0x40   : > { %p6586_p10 = pnand %p6584_p8, %p6570_p0  ;;  %p6592_p7 = scmp.lt.s32.totalorder %s6590_s20, %s6583_s18 }
  0x42   : > { %p6587_p13 = pneg %p6586_p10  ;;  %p6593_p9 = por %p6592_p7, %p6591_p3 }
  0x44   : > { %p6594_p2 = pnand %p6593_p9, %p6587_p13 }
  0x46   : > { %6597 = shalt.err (!%p6594_p2)
}
  0x47   : > { %s6674_s29 = smov 128   ;;  %s6675_s11 = smov 8  }
  0x48   : > { %6366 = dma.hbm_to_vmem [thread:$0]  (!%p6840_p11), %s6838_s30, 4096, %s6844_s26, %s6846_s28, %s6674_s29, %s6674_s29, %s6675_s11  }
  0x49   : > { %p10568_p0 = scmp.ne.s32.totalorder %s10562_s21, 0 }
  0x4b   : > { %346 = sbr.rel (%p10568_p0) target bundleno = 1746 (0x6d2), region = 60 }
  0x52   : > { %s6877_s22 = sand.u32 1, %s6660_s14   ;;  %p10569_p5 = scmp.ne.s32.totalorder %s10559_s19, 0 }
  0x53   : > { %s5390_s24 = sshll.u32 %s6877_s22, 8  ;;  %s349_s18 = scalar_lea.sflag [#allocation4], %s6877_s22 }
  0x54   : > { %s6883_s23 = scalar_lea.vmem [#allocation3], %s5390_s24 }
  0x55   : > { %6643 = dma.done.wait (%p10569_p5), %s349_s18, 4096  }
  0x56   : > { %6645 = vsyncadd (%p10569_p5), %s349_s18, 4294963200  ;;  %p10570_p11 = scmp.eq.s32.totalorder %s6759_s17, 0 }
  0x58   : > { %6647 = dma.done.wait (%p10570_p11), [#allocation7], 9216   ;;  %p10571_p1 = pmov %p10570_p11 }
  0x59   : > { %v10486_v0 = vmov 0   ;;  %v6900_v1 = vld [vmem:[%s10434_s0 + $0x18] sm:$0xff]  ;;  %v6905_v2 = vld [vmem:[%s10434_s0 + $0x10] sm:$0xff]  ;;  %v6440_v3 = vld [vmem:[%s10436_s2 + $0x4] ss:$8 sps:$4 sm:$0xff]   ;;  %vm490_vm10 = vcmask 523264  }
  0x5a   : > { %6649 = vsyncadd (%p10571_p1), [#allocation7], 4294958080  ;;  %6418 = vset.pattern.permute.xlu0 %v10486_v0  ;;  %6424 = vset.pattern.permute.xlu1 %v10486_v0  ;;  %vm1123_vm0 = vcmp.ge.s32.totalorder %v6900_v1, 1  ;;  %vm1122_vm1 = vcmp.ge.s32.totalorder %v6905_v2, 1  ;;  %v6915_v4 = vld [vmem:[%s10434_s0 + $0x20] sm:$0xff]  ;;  %v6930_v8 = vld [vmem:[%s10434_s0 + $0x28] sm:$0xff] }
  0x5b   : > { %571 = vmatprep.mubr.bf16.mxu0 %v10486_v0  ;;  %6420 = vperm.xlu0 %6418, %v10486_v0   ;;  %v6918_v5 = vsel %vm1123_vm0, 1, %v10486_v0  ;;  %v6921_v6 = vsel %vm1122_vm1, 1, %v10486_v0  ;;  %v6442_v7 = vld [vmem:[%s10436_s2] ss:$8 sps:$4 sm:$0xff]   ;;  %vm1124_vm2 = vcmp.ge.s32.totalorder %v6915_v4, 1  ;;  %vm1125_vm3 = vcmp.ge.s32.totalorder %v6930_v8, 1 }
  0x5c   : > { %1451 = vperm.xlu1 %6424, %v6918_v5   ;;  %v6443_v9 = vld [vmem:[%s10436_s2 + $0x14] ss:$8 sps:$4 sm:$0xff]   ;;  %539 = vmatprep.subr.bf16.mxu0 %v6440_v3  ;;  %v6939_v10 = vsel %vm1124_vm2, 1, %v10486_v0  ;;  %v6942_v11 = vsel %vm1125_vm3, 1, %v10486_v0  ;;  %v6445_v14 = vld [vmem:[%s10436_s2 + $0x10] ss:$8 sps:$4 sm:$0xff]  }
  0x5d   : > { %v6947_v12 = vld [vmem:[%s10434_s0 + $0x30] sm:$0xff]  ;;  %v6952_v13 = vld [vmem:[%s10434_s0 + $0x38] sm:$0xff]  ;;  %540 = vmatpush1.bf16.msra.mxu0 %v6442_v7  ;;  %v6446_v15 = vld [vmem:[%s10436_s2 + $0x24] ss:$8 sps:$4 sm:$0xff]   ;;  %vm1186_vm3 = vcmp.lt.s32.totalorder %v6905_v2, 15  ;;  %s10329_s27 = scalar_lea.vmem [#allocation8], %s5390_s24 }
  0x5e   : > { %vm1126_vm4 = vcmp.ge.s32.totalorder %v6947_v12, 1  ;;  %vm1127_vm5 = vcmp.ge.s32.totalorder %v6952_v13, 1  ;;  %541 = vmatprep.subr.bf16.mxu0 %v6443_v9  ;;  %v6965_v16 = vld [vmem:[%s10434_s0 + $0x40] sm:$0xff]  ;;  %v6970_v17 = vld [vmem:[%s10434_s0 + $0x48] sm:$0xff]  ;;  %v6449_v21 = vld [vmem:[%s10436_s2 + $0x34] ss:$8 sps:$4 sm:$0xff]  }
  0x5f   : > { %1448 = vperm.xlu0 %6418, %v6921_v6   ;;  %v6975_v18 = vsel %vm1126_vm4, 1, %v10486_v0  ;;  %v6978_v19 = vsel %vm1127_vm5, 1, %v10486_v0  ;;  %v6448_v20 = vld [vmem:[%s10436_s2 + $0x20] ss:$8 sps:$4 sm:$0xff]   ;;  %vm1128_vm6 = vcmp.ge.s32.totalorder %v6965_v16, 1  ;;  %vm1129_vm7 = vcmp.ge.s32.totalorder %v6970_v17, 1 }
  0x60   : > { %1454 = vperm.xlu1 %6424, %v6939_v10   ;;  %v6991_v22 = vld [vmem:[%s10434_s0 + $0x50] sm:$0xff]  ;;  %v6996_v23 = vld [vmem:[%s10434_s0 + $0x58] sm:$0xff]  ;;  %v7001_v24 = vsel %vm1128_vm6, 1, %v10486_v0  ;;  %v7004_v25 = vsel %vm1129_vm7, 1, %v10486_v0  ;;  %v394_v27 = vld [vmem:[%s6883_s23] sm:$0xff]  ;;  %v7121_v57 = vsel %vm1186_vm3, 1, %v10486_v0 }
  0x61   : > { %542 = vmatpush1.bf16.msra.mxu0 %v6445_v14  ;;  %v6451_v26 = vld [vmem:[%s10436_s2 + $0x30] ss:$8 sps:$4 sm:$0xff]   ;;  %vm1130_vm8 = vcmp.ge.s32.totalorder %v6991_v22, 1  ;;  %vm1131_vm9 = vcmp.ge.s32.totalorder %v6996_v23, 1  ;;  %v395_v28 = vld [vmem:[%s6883_s23 + $0x8] sm:$0xff]  ;;  %v7016_v29 = vld [vmem:[%s10434_s0 + $0x60] sm:$0xff] }
  0x62   : > { %543 = vmatprep.subr.bf16.mxu0 %v6446_v15  ;;  %v7021_v30 = vld [vmem:[%s10434_s0 + $0x68] sm:$0xff]  ;;  %v7026_v31 = vsel %vm1130_vm8, 1, %v10486_v0  ;;  %v7029_v32 = vsel %vm1131_vm9, 1, %v10486_v0  ;;  %v426_v33 = vpack.c.bf16 %v395_v28, %v394_v27  ;;  %vm1132_vm11 = vcmp.ge.s32.totalorder %v7016_v29, 1  ;;  %v7036_v34 = vld [vmem:[%s10434_s0 + $0x70] sm:$0xff]  ;;  %v7041_v35 = vld [vmem:[%s10434_s0 + $0x78] sm:$0xff] }
  0x63   : > { %1457 = vperm.xlu0 %6418, %v6942_v11   ;;  %10572 = vst [vmem:[#allocation15_spill] sm:$0xff] %v7026_v31  ;;  %10573 = vst [vmem:[#allocation16_spill] sm:$0xff] %v7029_v32  ;;  %vm1133_vm12 = vcmp.ge.s32.totalorder %v7021_v30, 1  ;;  %v7047_v36 = vsel %vm1132_vm11, 1, %v10486_v0  ;;  %vm1134_vm13 = vcmp.ge.s32.totalorder %v7036_v34, 1  ;;  %vm1135_vm14 = vcmp.ge.s32.totalorder %v7041_v35, 1 }
  0x64   : > { %1460 = vperm.xlu1 %6424, %v6975_v18   ;;  %10574 = vst [vmem:[#allocation17_spill] sm:$0xff] %v7047_v36  ;;  %v7050_v37 = vsel %vm1133_vm12, 1, %v10486_v0  ;;  %v396_v38 = vld [vmem:[%s6883_s23 + $0x10] sm:$0xff]  ;;  %v397_v39 = vld [vmem:[%s6883_s23 + $0x18] sm:$0xff]  ;;  %v7060_v40 = vld [vmem:[%s10434_s0 + $0x8] sm:$0xff]  ;;  %v7070_v42 = vsel %vm1134_vm13, 1, %v10486_v0 }
  0x65   : > { %544 = vmatpush1.bf16.msra.mxu0 %v6448_v20  ;;  %10575 = vst [vmem:[#allocation18_spill] sm:$0xff] %v7050_v37  ;;  %v7065_v41 = vld [vmem:[%s10434_s0] sm:$0xff]  ;;  %10576 = vst [vmem:[#allocation19_spill] sm:$0xff] %v7070_v42  ;;  %v7073_v43 = vsel %vm1135_vm14, 1, %v10486_v0  ;;  %v427_v44 = vpack.c.bf16 %v397_v39, %v396_v38  ;;  %vm1121_vm15 = vcmp.ge.s32.totalorder %v7060_v40, 1  ;;  %v7080_v45 = vld [vmem:[%s10434_s0 + $0x88] sm:$0xff] }
  0x66   : > { %545 = vmatprep.subr.bf16.mxu0 %v6449_v21  ;;  %10577 = vst [vmem:[#allocation20_spill] sm:$0xff] %v7073_v43  ;;  %vm1120_vm0 = vcmp.ge.s32.totalorder %v7065_v41, 1  ;;  %v7085_v46 = vld [vmem:[%s10434_s0 + $0x80] sm:$0xff]  ;;  %v7091_v47 = vsel %vm1121_vm15, 1, %v10486_v0  ;;  %vm1137_vm1 = vcmp.ge.s32.totalorder %v7080_v45, 1  ;;  %v399_v50 = vld [vmem:[%s6883_s23 + $0x28] sm:$0xff] }
  0x67   : > { %1463 = vperm.xlu0 %6418, %v6978_v19   ;;  %v7094_v48 = vsel %vm1120_vm0, 1, %v10486_v0  ;;  %vm1136_vm2 = vcmp.ge.s32.totalorder %v7085_v46, 1  ;;  %v398_v49 = vld [vmem:[%s6883_s23 + $0x20] sm:$0xff]  ;;  %v7104_v51 = vsel %vm1137_vm1, 1, %v10486_v0  ;;  %v7112_v54 = vld [vmem:[%s10434_s0 + $0x90] sm:$0xff]  ;;  %v401_v56 = vld [vmem:[%s6883_s23 + $0x38] sm:$0xff] }
  0x68   : > { %1466 = vperm.xlu1 %6424, %v7001_v24   ;;  %10578 = vst [vmem:[#allocation21_spill] sm:$0xff] %v7104_v51  ;;  %v7107_v52 = vsel %vm1136_vm2, 1, %v10486_v0  ;;  %v428_v53 = vpack.c.bf16 %v399_v50, %v398_v49  ;;  %vm1138_vm4 = vcmp.ge.s32.totalorder %v7112_v54, 1  ;;  %v400_v55 = vld [vmem:[%s6883_s23 + $0x30] sm:$0xff]  ;;  %v7127_v58 = vld [vmem:[%s10434_s0 + $0x98] sm:$0xff]  ;;  %vm1187_vm5 = vcmp.lt.s32.totalorder %v6900_v1, 15 }
  0x69   : > { %546 = vmatpush1.bf16.msra.mxu0 %v6451_v26  ;;  %10579 = vst [vmem:[#allocation22_spill] sm:$0xff] %v7107_v52  ;;  %v7134_v59 = vsel %vm1138_vm4, 1, %v10486_v0  ;;  %vm1139_vm6 = vcmp.ge.s32.totalorder %v7127_v58, 1  ;;  %v429_v60 = vpack.c.bf16 %v401_v56, %v400_v55  ;;  %v7138_v61 = vsel %vm1187_vm5, 1, %v10486_v0  ;;  %v7143_v62 = vld [vmem:[%s10434_s0 + $0xa0] sm:$0xff]  ;;  %v403_v2 = vld [vmem:[%s6883_s23 + $0x48] sm:$0xff] }
  0x6a   : > { %v7148_v63 = vsel %vm1139_vm6, 1, %v10486_v0  ;;  %v402_v1 = vld [vmem:[%s6883_s23 + $0x40] sm:$0xff]  ;;  %vm1140_vm7 = vcmp.ge.s32.totalorder %v7143_v62, 1  ;;  %vm1188_vm8 = vcmp.lt.s32.totalorder %v6915_v4, 15  ;;  %v7161_v3 = vld [vmem:[%s10434_s0 + $0xa8] sm:$0xff]  ;;  %v404_v14 = vld [vmem:[%s6883_s23 + $0x50] sm:$0xff] }
  0x6b   : > { %1469 = vperm.xlu0 %6418, %v7004_v25   ;;  %v430_v7 = vpack.c.bf16 %v403_v2, %v402_v1  ;;  %v7166_v9 = vsel %vm1140_vm7, 1, %v10486_v0  ;;  %v405_v15 = vld [vmem:[%s6883_s23 + $0x58] sm:$0xff]  ;;  %v7173_v20 = vld [vmem:[%s10434_s0 + $0xb0] sm:$0xff]  ;;  %vm1141_vm9 = vcmp.ge.s32.totalorder %v7161_v3, 1  ;;  %vm1189_vm11 = vcmp.lt.s32.totalorder %v6930_v8, 15  ;;  %v406_v8 = vld [vmem:[%s6883_s23 + $0x60] sm:$0xff] }
  0x6c   : > { %1472 = vperm.xlu1 %6424, %v7026_v31   ;;  %5401 = vmatmul.mubr.msk.bf16.vlgmr.msra.gmra.mrb[0].mxu0 %vm490_vm10, %v426_v33  ;;  %v7184_v21 = vsel %vm1188_vm8, 1, %v10486_v0  ;;  %v7187_v26 = vsel %vm1141_vm9, 1, %v10486_v0  ;;  %v431_v27 = vpack.c.bf16 %v405_v15, %v404_v14  ;;  %v7190_v28 = vsel %vm1189_vm11, 1, %v10486_v0  ;;  %v407_v33 = vld [vmem:[%s6883_s23 + $0x68] sm:$0xff]  ;;  %v7200_v4 = vld [vmem:[%s10434_s0 + $0xb8] sm:$0xff]  ;;  %v7213_v39 = vld [vmem:[%s10434_s0 + $0xc0] sm:$0xff] }
  0x6d   : > { %581 = vmatprep.mubr.bf16.mxu0 %v10486_v0  ;;  %vm1142_vm12 = vcmp.ge.s32.totalorder %v7173_v20, 1  ;;  %vm1190_vm13 = vcmp.lt.s32.totalorder %v6947_v12, 15  ;;  %vm1143_vm14 = vcmp.ge.s32.totalorder %v7200_v4, 1  ;;  %vm1191_vm15 = vcmp.lt.s32.totalorder %v6952_v13, 15  ;;  %v408_v50 = vld [vmem:[%s6883_s23 + $0x70] sm:$0xff]  ;;  %v7236_v13 = vld [vmem:[%s10434_s0 + $0xc8] sm:$0xff] }
  0x6e   : > { %v7207_v38 = vsel %vm1142_vm12, 1, %v10486_v0  ;;  %v7220_v49 = vsel %vm1190_vm13, 1, %v10486_v0  ;;  %v7223_v12 = vsel %vm1143_vm14, 1, %v10486_v0  ;;  %v7229_v55 = vsel %vm1191_vm15, 1, %v10486_v0  ;;  %v411_v1 = vld [vmem:[%s6883_s23 + $0x88] sm:$0xff]  ;;  %v7249_v2 = vld [vmem:[%s10434_s0 + $0xd0] sm:$0xff] }
  0x6f   : > { %1475 = vperm.xlu0 %6418, %v7029_v32   ;;  %vm1144_vm0 = vcmp.ge.s32.totalorder %v7213_v39, 1  ;;  %vm1192_vm1 = vcmp.lt.s32.totalorder %v6965_v16, 15  ;;  %vm1145_vm2 = vcmp.ge.s32.totalorder %v7236_v13, 1  ;;  %vm1193_vm3 = vcmp.lt.s32.totalorder %v6970_v17, 15  ;;  %v412_v17 = vld [vmem:[%s6883_s23 + $0x90] sm:$0xff]  ;;  %s5505_s24 = sshll.u32 %s6759_s17, 12 }
  0x70   : > { %1478 = vperm.xlu1 %6424, %v7047_v36   ;;  %v7260_v16 = vsel %vm1192_vm1, 1, %v10486_v0  ;;  %v7263_v14 = vsel %vm1145_vm2, 1, %v10486_v0  ;;  %vm1146_vm4 = vcmp.ge.s32.totalorder %v7249_v2, 1  ;;  %vm1194_vm5 = vcmp.lt.s32.totalorder %v6991_v22, 15  ;;  %v7303_v22 = vld [vmem:[%s10434_s0 + $0xe0] sm:$0xff]  ;;  %s5299_s28 = sshll.u32 %s10329_s27, 4  ;;  %s10372_s20 = scalar_lea.hbm %s10444_s10, %s5505_s24  ;;  %s10374_s28 = int_to_ptr.vmem [resolvable:$true] %s5299_s28 }
  0x71   : > { %vm1195_vm7 = vcmp.lt.s32.totalorder %v6996_v23, 15  ;;  %vm1148_vm8 = vcmp.ge.s32.totalorder %v7303_v22, 1  ;;  %v7314_v23 = vld [vmem:[%s10434_s0 + $0xe8] sm:$0xff]  ;;  %vm1196_vm9 = vcmp.lt.s32.totalorder %v7016_v29, 15  ;;  %vm1197_vm12 = vcmp.lt.s32.totalorder %v7021_v30, 15  ;;  %v7339_v29 = vld [vmem:[%s10434_s0 + $0xf0] sm:$0xff] }
  0x72   : > { %vm1149_vm11 = vcmp.ge.s32.totalorder %v7314_v23, 1  ;;  %vm1150_vm13 = vcmp.ge.s32.totalorder %v7339_v29, 1  ;;  %v419_v30 = vld [vmem:[%s6883_s23 + $0xc8] sm:$0xff]  ;;  %vm1198_vm14 = vcmp.lt.s32.totalorder %v7036_v34, 15  ;;  %v420_v34 = vld [vmem:[%s6883_s23 + $0xd0] sm:$0xff]  ;;  %vm1184_vm1 = vcmp.lt.s32.totalorder %v7065_v41, 15 }
  0x73   : > { %1481 = vperm.xlu0 %6418, %v7050_v37   ;;  %vm1200_vm2 = vcmp.lt.s32.totalorder %v7085_v46, 15  ;;  %v423_v41 = vld [vmem:[%s6883_s23 + $0xe8] sm:$0xff]  ;;  %s5286_s29 = scalar_lea.sflag [#allocation5], %s6877_s22  ;;  %s6598_s11 = scalar_lea.vmem %s10374_s28, 4096 }
  0x74   : > { %1484 = vperm.xlu1 %6424, %v7070_v42   ;;  %5402 = vmatmul.mubr.msk.bf16.gmra.mrb[4].mxu0 %vm490_vm10, %v427_v44  ;;  %v432_v44 = vpack.c.bf16 %v407_v33, %v406_v8  ;;  %v413_v8 = vld [vmem:[%s6883_s23 + $0x98] sm:$0xff]  ;;  %p6599_p4 = scmp.ne.s32.totalorder %s10374_s28, %s6598_s11  ;;  %s6680_s18 = smov [#allocation8]  }
  0x75   : > { %591 = vmatprep.mubr.bf16.mxu0 %v10486_v0  ;;  %v7276_v33 = vld [vmem:[%s10434_s0 + $0xd8] sm:$0xff]  ;;  %s6602_s21 = sshll.u32 %s6680_s18, 4  ;;  %s6603_s21 = int_to_ptr.vmem [resolvable:$false] %s6602_s21 }
  0x76   : > { %vm1147_vm6 = vcmp.ge.s32.totalorder %v7276_v33, 1  ;;  %p6600_p6 = pnand %p6599_p4, %p6829_p12  ;;  %s6604_s30 = scalar_lea.vmem %s6603_s21, 8192 }
  0x77   : > { %1487 = vperm.xlu0 %6418, %v7073_v43   ;;  %p6605_p10 = scmp.lt.s32.totalorder %s10374_s28, %s6603_s21  ;;  %p6606_p13 = scmp.lt.s32.totalorder %s6604_s30, %s6598_s11 }
  0x78   : > { %2083 = vperm.xlu1 %6424, %v7094_v48   ;;  %p6601_p8 = pneg %p6600_p6 }
  0x79   : > { %p6607_p3 = por %p6606_p13, %p6605_p10 }
  0x7b   : > { %2086 = vperm.xlu0 %6418, %v7091_v47   ;;  %p6608_p7 = pnand %p6607_p3, %p6601_p8 }
  0x7c   : > { %1490 = vperm.xlu1 %6424, %v7107_v52   ;;  %5403 = vmatmul.mubr.msk.bf16.gmra.mrb[8].mxu0 %vm490_vm10, %v428_v53  ;;  %v409_v53 = vld [vmem:[%s6883_s23 + $0x78] sm:$0xff] }
  0x7d   : > { %601 = vmatprep.mubr.bf16.mxu0 %v10486_v0  ;;  %v433_v56 = vpack.c.bf16 %v409_v53, %v408_v50  ;;  %v435_v50 = vpack.c.bf16 %v413_v8, %v412_v17  ;;  %v7290_v53 = vsel %vm1194_vm5, 1, %v10486_v0  ;;  %v7320_v8 = vsel %vm1148_vm8, 1, %v10486_v0 }
  0x7e   : > { %vm1202_vm5 = vcmp.lt.s32.totalorder %v7112_v54, 15  ;;  %vm1206_vm8 = vcmp.lt.s32.totalorder %v7173_v20, 15 }
  0x7f   : > { %1493 = vperm.xlu0 %6418, %v7104_v51  }
  0x80   : > { %6426 = vperm.xlu1 %6424, %v10486_v0  }
  0x83   : > { %2089 = vperm.xlu0 %6418, %v6921_v6  }
  0x84   : > { %2092 = vperm.xlu1 %6424, %v6918_v5   ;;  %5404 = vmatmul.mubr.msk.bf16.gmra.mrb[12].mxu0 %vm490_vm10, %v429_v60  ;;  %v410_v60 = vld [vmem:[%s6883_s23 + $0x80] sm:$0xff] }
  0x85   : > { %611 = vmatprep.mubr.bf16.mxu0 %v10486_v0  ;;  %v434_v15 = vpack.c.bf16 %v411_v1, %v410_v60  ;;  %v415_v60 = vld [vmem:[%s6883_s23 + $0xa8] sm:$0xff]  ;;  %v7296_v1 = vsel %vm1147_vm6, 1, %v10486_v0  ;;  %vm1203_vm6 = vcmp.lt.s32.totalorder %v7127_v58, 15 }
  0x87   : > { %1496 = vperm.xlu0 %6418, %v7134_v59  }
  0x88   : > { %1499 = vperm.xlu1 %6424, %v7148_v63  }
  0x8b   : > { %1865 = vperm.xlu0 %6418, %v7121_v57  }
  0x8c   : > { %1868 = vperm.xlu1 %6424, %v7138_v61   ;;  %5405 = vmatmul.mubr.msk.bf16.gmra.mrb[16].mxu0 %vm490_vm10, %v430_v7  ;;  %v7253_v7 = vsel %vm1144_vm0, 1, %v10486_v0  ;;  %vm1199_vm0 = vcmp.lt.s32.totalorder %v7041_v35, 15 }
  0x8d   : > { %621 = vmatprep.mubr.bf16.mxu0 %v10486_v0 }
  0x8f   : > { %2095 = vperm.xlu0 %6418, %v6939_v10  }
  0x90   : > { %2098 = vperm.xlu1 %6424, %v6942_v11  }
  0x93   : > { %1502 = vperm.xlu0 %6418, %v7166_v9  }
  0x94   : > { %1505 = vperm.xlu1 %6424, %v7187_v26   ;;  %5406 = vmatmul.mubr.msk.bf16.gmra.mrb[20].mxu0 %vm490_vm10, %v431_v27  ;;  %v7266_v27 = vsel %vm1193_vm3, 1, %v10486_v0  ;;  %vm1185_vm3 = vcmp.lt.s32.totalorder %v7060_v40, 15 }
  0x95   : > { %631 = vmatprep.mubr.bf16.mxu0 %v10486_v0 }
  0x97   : > { %1871 = vperm.xlu0 %6418, %v7184_v21  }
  0x98   : > { %1874 = vperm.xlu1 %6424, %v7190_v28  }
  0x9b   : > { %2101 = vperm.xlu0 %6418, %v6975_v18  }
  0x9c   : > { %2104 = vperm.xlu1 %6424, %v6978_v19   ;;  %5407 = vmatmul.mubr.msk.bf16.gmra.mrb[24].mxu0 %vm490_vm10, %v432_v44  ;;  %v7284_v44 = vsel %vm1146_vm4, 1, %v10486_v0  ;;  %vm1201_vm4 = vcmp.lt.s32.totalorder %v7080_v45, 15 }
  0x9d   : > { %641 = vmatprep.mubr.bf16.mxu0 %v10486_v0 }
  0x9f   : > { %1508 = vperm.xlu0 %6418, %v7207_v38  }
  0xa0   : > { %1511 = vperm.xlu1 %6424, %v7223_v12  }
  0xa3   : > { %1877 = vperm.xlu0 %6418, %v7220_v49  }
  0xa4   : > { %1880 = vperm.xlu1 %6424, %v7229_v55   ;;  %5408 = vmatmul.mubr.msk.bf16.gmra.mrb[28].mxu0 %vm490_vm10, %v433_v56  ;;  %v414_v56 = vld [vmem:[%s6883_s23 + $0xa0] sm:$0xff] }
  0xa5   : > { %651 = vmatprep.mubr.bf16.mxu0 %v10486_v0  ;;  %v436_v17 = vpack.c.bf16 %v415_v60, %v414_v56  ;;  %v417_v56 = vld [vmem:[%s6883_s23 + $0xb8] sm:$0xff]  ;;  %v7330_v60 = vsel %vm1196_vm9, 1, %v10486_v0  ;;  %vm1207_vm9 = vcmp.lt.s32.totalorder %v7200_v4, 15 }
  0xa6   : > { %v7494_v20 = vsel %vm1207_vm9, 1, %v10486_v0 }
  0xa7   : > { %2107 = vperm.xlu0 %6418, %v7001_v24  }
  0xa8   : > { %2110 = vperm.xlu1 %6424, %v7004_v25  }
  0xab   : > { %1514 = vperm.xlu0 %6418, %v7253_v7  }
  0xac   : > { %1517 = vperm.xlu1 %6424, %v7263_v14   ;;  %5409 = vmatmul.mubr.msk.bf16.gmra.mrb[32].mxu0 %vm490_vm10, %v434_v15  ;;  %v7308_v15 = vsel %vm1195_vm7, 1, %v10486_v0  ;;  %vm1205_vm7 = vcmp.lt.s32.totalorder %v7161_v3, 15 }
  0xad   : > { %661 = vmatprep.mubr.bf16.mxu0 %v10486_v0 }
  0xaf   : > { %1883 = vperm.xlu0 %6418, %v7260_v16  }
  0xb0   : > { %1886 = vperm.xlu1 %6424, %v7266_v27  }
  0xb3   : > { %2113 = vperm.xlu0 %6418, %v7026_v31   ;;  %v7367_v31 = vsel %vm1198_vm14, 1, %v10486_v0  ;;  %vm1211_vm14 = vcmp.lt.s32.totalorder %v7276_v33, 15 }
  0xb4   : > { %2116 = vperm.xlu1 %6424, %v7029_v32   ;;  %5410 = vmatmul.mubr.msk.bf16.gmra.mrb[36].mxu0 %vm490_vm10, %v435_v50  ;;  %v416_v50 = vld [vmem:[%s6883_s23 + $0xb0] sm:$0xff] }
  0xb5   : > { %671 = vmatprep.mubr.bf16.mxu0 %v10486_v0 }
  0xb7   : > { %1520 = vperm.xlu0 %6418, %v7284_v44  }
  0xb8   : > { %1523 = vperm.xlu1 %6424, %v7296_v1  }
  0xbb   : > { %1889 = vperm.xlu0 %6418, %v7290_v53  }
  0xbc   : > { %1892 = vperm.xlu1 %6424, %v7308_v15   ;;  %5411 = vmatmul.mubr.msk.bf16.gmra.mrb[40].mxu0 %vm490_vm10, %v436_v17  ;;  %v7333_v17 = vsel %vm1149_vm11, 1, %v10486_v0  ;;  %vm1208_vm11 = vcmp.lt.s32.totalorder %v7213_v39, 15 }
  0xbd   : > { %681 = vmatprep.mubr.bf16.mxu0 %v10486_v0 }
  0xbf   : > { %2119 = vperm.xlu0 %6418, %v7047_v36   ;;  %v437_v36 = vpack.c.bf16 %v417_v56, %v416_v50  ;;  %v418_v50 = vld [vmem:[%s6883_s23 + $0xc0] sm:$0xff]  ;;  %v7354_v56 = vld [vmem:[%s10434_s0 + $0xf8] sm:$0xff] }
  0xc0   : > { %2122 = vperm.xlu1 %6424, %v7050_v37   ;;  %v7345_v37 = vsel %vm1197_vm12, 1, %v10486_v0  ;;  %v438_v32 = vpack.c.bf16 %v419_v30, %v418_v50  ;;  %vm1151_vm15 = vcmp.ge.s32.totalorder %v7354_v56, 1  ;;  %v421_v50 = vld [vmem:[%s6883_s23 + $0xd8] sm:$0xff]  ;;  %vm1209_vm12 = vcmp.lt.s32.totalorder %v7236_v13, 15 }
  0xc1   : > { %v439_v30 = vpack.c.bf16 %v421_v50, %v420_v34  ;;  %v422_v34 = vld [vmem:[%s6883_s23 + $0xe0] sm:$0xff]  ;;  %v7398_v50 = vsel %vm1200_vm2, 1, %v10486_v0  ;;  %v7520_v39 = vsel %vm1209_vm12, 1, %v10486_v0  ;;  %vm1215_vm2 = vcmp.lt.s32.totalorder %v7354_v56, 15 }
  0xc3   : > { %1526 = vperm.xlu0 %6418, %v7320_v8  }
  0xc4   : > { %1529 = vperm.xlu1 %6424, %v7333_v17   ;;  %5412 = vmatmul.mubr.msk.bf16.gmra.mrb[44].mxu0 %vm490_vm10, %v437_v36  ;;  %v7359_v36 = vsel %vm1150_vm13, 1, %v10486_v0  ;;  %vm1210_vm13 = vcmp.lt.s32.totalorder %v7249_v2, 15  ;;  %v7546_v2 = vsel %vm1211_vm14, 1, %v10486_v0 }
  0xc5   : > { %691 = vmatprep.mubr.bf16.mxu0 %v10486_v0 }
  0xc7   : > { %1895 = vperm.xlu0 %6418, %v7330_v60  }
  0xc8   : > { %1898 = vperm.xlu1 %6424, %v7345_v37  }
  0xcb   : > { %2125 = vperm.xlu0 %6418, %v7070_v42   ;;  %v7370_v42 = vsel %vm1151_vm15, 1, %v10486_v0  ;;  %vm1212_vm15 = vcmp.lt.s32.totalorder %v7303_v22, 15 }
  0xcc   : > { %2128 = vperm.xlu1 %6424, %v7073_v43   ;;  %5413 = vmatmul.mubr.msk.bf16.gmra.mrb[48].mxu0 %vm490_vm10, %v438_v32  ;;  %v7379_v32 = vsel %vm1199_vm0, 1, %v10486_v0  ;;  %v7388_v43 = vsel %vm1184_vm1, 1, %v10486_v0  ;;  %vm1213_vm0 = vcmp.lt.s32.totalorder %v7314_v23, 15  ;;  %vm1214_vm1 = vcmp.lt.s32.totalorder %v7339_v29, 15 }
  0xcd   : > { %701 = vmatprep.mubr.bf16.mxu0 %v10486_v0  ;;  %10581 = vst [vmem:[#allocation24_spill] sm:$0xff] %v7388_v43  ;;  %v7572_v22 = vsel %vm1213_vm0, 1, %v10486_v0  ;;  %v7598_v29 = vsel %vm1215_vm2, 1, %v10486_v0 }
  0xcf   : > { %1532 = vperm.xlu0 %6418, %v7359_v36  }
  0xd0   : > { %1535 = vperm.xlu1 %6424, %v7370_v42  }
  0xd3   : > { %1901 = vperm.xlu0 %6418, %v7367_v31  }
  0xd4   : > { %1904 = vperm.xlu1 %6424, %v7379_v32   ;;  %5414 = vmatmul.mubr.msk.bf16.gmra.mrb[52].mxu0 %vm490_vm10, %v439_v30  ;;  %v7401_v30 = vsel %vm1185_vm3, 1, %v10486_v0 }
  0xd5   : > { %711 = vmatprep.mubr.bf16.mxu0 %v10486_v0 }
  0xd7   : > { %2131 = vperm.xlu0 %6418, %v7107_v52   ;;  %v424_v52 = vld [vmem:[%s6883_s23 + $0xf0] sm:$0xff] }
  0xd8   : > { %2134 = vperm.xlu1 %6424, %v7104_v51   ;;  %v7412_v51 = vsel %vm1201_vm4, 1, %v10486_v0 }
  0xda   : > { %v7385_v35 = vpop.permute.xlu0 %6420 }
  0xdb   : > { %10580 = vst [vmem:[#allocation23_spill] sm:$0xff] %v7385_v35  ;;  %2339 = vperm.xlu0 %6418, %v7388_v43   ;;  %v440_v35 = vpack.c.bf16 %v423_v41, %v422_v34  ;;  %v7404_v46 = vpop.permute.xlu1 %1451  ;;  %v425_v43 = vld [vmem:[%s6883_s23 + $0xf8] sm:$0xff] }
  0xdc   : > { %10582 = vst [vmem:[#allocation25_spill] sm:$0xff] %v7404_v46  ;;  %2342 = vperm.xlu1 %6424, %v7401_v30   ;;  %v441_v41 = vpack.c.bf16 %v425_v43, %v424_v52  ;;  %v7442_v52 = vsel %vm1203_vm6, 1, %v10486_v0 }
  0xdd   : > { %5415 = vmatmul.mubr.msk.bf16.gmra.mrb[56].mxu0 %vm490_vm10, %v440_v35 }
  0xde   : > { %v7406_v40 = vpop.permute.xlu0 %1448  ;;  %721 = vmatprep.mubr.bf16.mxu0 %v10486_v0 }
  0xdf   : > { %10583 = vst [vmem:[#allocation26_spill] sm:$0xff] %v7406_v40  ;;  %1907 = vperm.xlu0 %6418, %v7398_v50   ;;  %v7417_v34 = vpop.permute.xlu1 %1454 }
  0xe0   : > { %10584 = vst [vmem:[#allocation27_spill] sm:$0xff] %v7417_v34  ;;  %1910 = vperm.xlu1 %6424, %v7412_v51   ;;  %v7432_v34 = vsel %vm1202_vm5, 1, %v10486_v0 }
  0xe2   : > { %v7419_v45 = vpop.permute.xlu0 %1457 }
  0xe3   : > { %10585 = vst [vmem:[#allocation28_spill] sm:$0xff] %v7419_v45  ;;  %2137 = vperm.xlu0 %6418, %v7134_v59   ;;  %v7424_v40 = vpop.permute.xlu1 %1460 }
  0xe4   : > { %10586 = vst [vmem:[#allocation29_spill] sm:$0xff] %v7424_v40  ;;  %2140 = vperm.xlu1 %6424, %v7148_v63  }
  0xe5   : > { %5416 = vmatmul.mubr.msk.bf16.gmra.mrb[60].mxu0 %vm490_vm10, %v441_v41  ;;  %vm1204_vm10 = vcmp.lt.s32.totalorder %v7143_v62, 15  ;;  %v7468_v62 = vsel %vm1205_vm7, 1, %v10486_v0 }
  0xe6   : > { %v7426_v35 = vpop.permute.xlu0 %1463 }
  0xe7   : > { %10587 = vst [vmem:[#allocation30_spill] sm:$0xff] %v7426_v35  ;;  %2345 = vperm.xlu0 %6418, %v7121_v57   ;;  %v7435_v45 = vpop.permute.xlu1 %1466 }
  0xe8   : > { %10588 = vst [vmem:[#allocation31_spill] sm:$0xff] %v7435_v45  ;;  %2348 = vperm.xlu1 %6424, %v7138_v61  }
  0xea   : > { %v7437_v43 = vpop.permute.xlu0 %1469 }
  0xeb   : > { %10589 = vst [vmem:[#allocation32_spill] sm:$0xff] %v7437_v43  ;;  %1913 = vperm.xlu0 %6418, %v7432_v34   ;;  %v7444_v54 = vpop.permute.xlu1 %1472  ;;  %v7458_v43 = vsel %vm1204_vm10, 1, %v10486_v0 }
  0xec   : > { %10590 = vst [vmem:[#allocation33_spill] sm:$0xff] %v7444_v54  ;;  %1916 = vperm.xlu1 %6424, %v7442_v52  }
  0xee   : > { %v7446_v35 = vpop.permute.xlu0 %1475 }
  0xef   : > { %10591 = vst [vmem:[#allocation34_spill] sm:$0xff] %v7446_v35  ;;  %2143 = vperm.xlu0 %6418, %v7166_v9   ;;  %v7451_v58 = vpop.permute.xlu1 %1478 }
  0xf0   : > { %10592 = vst [vmem:[#allocation35_spill] sm:$0xff] %v7451_v58  ;;  %2146 = vperm.xlu1 %6424, %v7187_v26  }
  0xf2   : > { %v7453_v41 = vpop.permute.xlu0 %1481 }
  0xf3   : > { %10593 = vst [vmem:[#allocation36_spill] sm:$0xff] %v7453_v41  ;;  %2351 = vperm.xlu0 %6418, %v7184_v21   ;;  %v7461_v35 = vpop.permute.xlu1 %1484 }
  0xf4   : > { %10594 = vst [vmem:[#allocation37_spill] sm:$0xff] %v7461_v35  ;;  %2354 = vperm.xlu1 %6424, %v7190_v28   ;;  %v7484_v35 = vsel %vm1206_vm8, 1, %v10486_v0 }
  0xf6   : > { %v7463_v54 = vpop.permute.xlu0 %1487 }
  0xf7   : > { %10595 = vst [vmem:[#allocation38_spill] sm:$0xff] %v7463_v54  ;;  %1919 = vperm.xlu0 %6418, %v7458_v43   ;;  %v7472_v58 = vpop.permute.xlu1 %2083 }
  0xf8   : > { %10597 = vst [vmem:[#allocation40_spill] sm:$0xff] %v7472_v58  ;;  %1922 = vperm.xlu1 %6424, %v7468_v62  }
  0xfa   : > { %v7470_v41 = vpop.permute.xlu0 %2086 }
  0xfb   : > { %10596 = vst [vmem:[#allocation39_spill] sm:$0xff] %v7470_v41  ;;  %2149 = vperm.xlu0 %6418, %v7207_v38   ;;  %v7479_v54 = vpop.permute.xlu1 %1490 }
  0xfc   : > { %10599 = vst [vmem:[#allocation42_spill] sm:$0xff] %v7479_v54  ;;  %2152 = vperm.xlu1 %6424, %v7223_v12  }
  0xfe   : > { %v7477_v3 = vpop.permute.xlu0 %1493 }
  0xff   : > { %10598 = vst [vmem:[#allocation41_spill] sm:$0xff] %v7477_v3  ;;  %2357 = vperm.xlu0 %6418, %v7220_v49   ;;  %v7489_v40 = vpop.permute.xlu1 %6426 }
 0x100   : > { %10601 = vst [vmem:[#allocation44_spill] sm:$0xff] %v7489_v40  ;;  %2360 = vperm.xlu1 %6424, %v7229_v55  }
 0x102   : > { %v7487_v45 = vpop.permute.xlu0 %2089 }
 0x103   : > { %10600 = vst [vmem:[#allocation43_spill] sm:$0xff] %v7487_v45  ;;  %1925 = vperm.xlu0 %6418, %v7484_v35   ;;  %v7498_v3 = vpop.permute.xlu1 %2092  ;;  %v7510_v45 = vsel %vm1208_vm11, 1, %v10486_v0 }
 0x104   : > { %10603 = vst [vmem:[#allocation46_spill] sm:$0xff] %v7498_v3  ;;  %1928 = vperm.xlu1 %6424, %v7494_v20  }
 0x106   : > { %v7496_v54 = vpop.permute.xlu0 %1496 }
 0x107   : > { %10602 = vst [vmem:[#allocation45_spill] sm:$0xff] %v7496_v54  ;;  %2155 = vperm.xlu0 %6418, %v7253_v7   ;;  %v7505_v46 = vpop.permute.xlu1 %1499 }
 0x108   : > { %10605 = vst [vmem:[#allocation48_spill] sm:$0xff] %v7505_v46  ;;  %2158 = vperm.xlu1 %6424, %v7263_v14  }
 0x10a   : > { %v7503_v4 = vpop.permute.xlu0 %1865 }
 0x10b   : > { %10604 = vst [vmem:[#allocation47_spill] sm:$0xff] %v7503_v4  ;;  %2363 = vperm.xlu0 %6418, %v7260_v16   ;;  %v7515_v3 = vpop.permute.xlu1 %1868 }
 0x10c   : > { %10607 = vst [vmem:[#allocation50_spill] sm:$0xff] %v7515_v3  ;;  %2366 = vperm.xlu1 %6424, %v7266_v27   ;;  %v7536_v3 = vsel %vm1210_vm13, 1, %v10486_v0 }
 0x10e   : > { %v7513_v54 = vpop.permute.xlu0 %2095 }
 0x10f   : > { %10606 = vst [vmem:[#allocation49_spill] sm:$0xff] %v7513_v54  ;;  %1931 = vperm.xlu0 %6418, %v7510_v45   ;;  %v7524_v4 = vpop.permute.xlu1 %2098 }
 0x110   : > { %10609 = vst [vmem:[#allocation52_spill] sm:$0xff] %v7524_v4  ;;  %1934 = vperm.xlu1 %6424, %v7520_v39  }
 0x112   : > { %v7522_v46 = vpop.permute.xlu0 %1502 }
 0x113   : > { %10608 = vst [vmem:[#allocation51_spill] sm:$0xff] %v7522_v46  ;;  %2161 = vperm.xlu0 %6418, %v7284_v44   ;;  %v7531_v54 = vpop.permute.xlu1 %1505 }
 0x114   : > { %10611 = vst [vmem:[#allocation54_spill] sm:$0xff] %v7531_v54  ;;  %2164 = vperm.xlu1 %6424, %v7296_v1  }
 0x116   : > { %v7529_v13 = vpop.permute.xlu0 %1871 }
 0x117   : > { %10610 = vst [vmem:[#allocation53_spill] sm:$0xff] %v7529_v13  ;;  %2369 = vperm.xlu0 %6418, %v7290_v53   ;;  %v7541_v4 = vpop.permute.xlu1 %1874 }
 0x118   : > { %10613 = vst [vmem:[#allocation56_spill] sm:$0xff] %v7541_v4  ;;  %2372 = vperm.xlu1 %6424, %v7308_v15   ;;  %v7562_v4 = vsel %vm1212_vm15, 1, %v10486_v0 }
 0x11a   : > { %v7539_v46 = vpop.permute.xlu0 %2101 }
 0x11b   : > { %10612 = vst [vmem:[#allocation55_spill] sm:$0xff] %v7539_v46  ;;  %1937 = vperm.xlu0 %6418, %v7536_v3   ;;  %v7550_v13 = vpop.permute.xlu1 %2104 }
 0x11c   : > { %10615 = vst [vmem:[#allocation58_spill] sm:$0xff] %v7550_v13  ;;  %1940 = vperm.xlu1 %6424, %v7546_v2  }
 0x11e   : > { %v7548_v54 = vpop.permute.xlu0 %1508 }
 0x11f   : > { %10614 = vst [vmem:[#allocation57_spill] sm:$0xff] %v7548_v54  ;;  %2167 = vperm.xlu0 %6418, %v7320_v8   ;;  %v7557_v46 = vpop.permute.xlu1 %1511 }
 0x120   : > { %10617 = vst [vmem:[#allocation60_spill] sm:$0xff] %v7557_v46  ;;  %2170 = vperm.xlu1 %6424, %v7333_v17  }
 0x122   : > { %v7555_v33 = vpop.permute.xlu0 %1877 }
 0x123   : > { %10616 = vst [vmem:[#allocation59_spill] sm:$0xff] %v7555_v33  ;;  %2375 = vperm.xlu0 %6418, %v7330_v60   ;;  %v7567_v13 = vpop.permute.xlu1 %1880 }
 0x124   : > { %10619 = vst [vmem:[#allocation62_spill] sm:$0xff] %v7567_v13  ;;  %2378 = vperm.xlu1 %6424, %v7345_v37   ;;  %v7588_v13 = vsel %vm1214_vm1, 1, %v10486_v0 }
 0x126   : > { %v7565_v54 = vpop.permute.xlu0 %2107 }
 0x127   : > { %10618 = vst [vmem:[#allocation61_spill] sm:$0xff] %v7565_v54  ;;  %1943 = vperm.xlu0 %6418, %v7562_v4   ;;  %v7576_v33 = vpop.permute.xlu1 %2110 }
 0x128   : > { %10621 = vst [vmem:[#allocation64_spill] sm:$0xff] %v7576_v33  ;;  %1946 = vperm.xlu1 %6424, %v7572_v22  }
 0x12a   : > { %v7574_v46 = vpop.permute.xlu0 %1514 }
 0x12b   : > { %10620 = vst [vmem:[#allocation63_spill] sm:$0xff] %v7574_v46  ;;  %2173 = vperm.xlu0 %6418, %v7359_v36   ;;  %v7583_v54 = vpop.permute.xlu1 %1517  ;;  %v6452_v46 = vld [vmem:[#allocation6 + $0xc0] sm:$0xff]  }
 0x12c   : > { %10623 = vst [vmem:[#allocation66_spill] sm:$0xff] %v7583_v54  ;;  %2176 = vperm.xlu1 %6424, %v7370_v42   ;;  %5906 = vmatprep.subr.bf16.mxu0 %v6452_v46 }
 0x12e   : > { %v7581_v23 = vpop.permute.xlu0 %1883 }
 0x12f   : > { %10622 = vst [vmem:[#allocation65_spill] sm:$0xff] %v7581_v23  ;;  %2381 = vperm.xlu0 %6418, %v7367_v31   ;;  %v7593_v36 = vpop.permute.xlu1 %1886  ;;  %v6453_v23 = vld [vmem:[#allocation6 + $0x80] sm:$0xff]  }
 0x130   : > { %10625 = vst [vmem:[#allocation68_spill] sm:$0xff] %v7593_v36  ;;  %2384 = vperm.xlu1 %6424, %v7379_v32   ;;  %5907 = vmatpush3.bf16.msra.mxu0 %v6453_v23 }
 0x132   : > { %v7591_v33 = vpop.permute.xlu0 %2113 }
 0x133   : > { %10624 = vst [vmem:[#allocation67_spill] sm:$0xff] %v7591_v33  ;;  %1949 = vperm.xlu0 %6418, %v7588_v13   ;;  %v7602_v42 = vpop.permute.xlu1 %2116 }
 0x134   : > { %10627 = vst [vmem:[#allocation70_spill] sm:$0xff] %v7602_v42  ;;  %1952 = vperm.xlu1 %6424, %v7598_v29  }
 0x136   : > { %v7600_v54 = vpop.permute.xlu0 %1520 }
 0x137   : > { %10626 = vst [vmem:[#allocation69_spill] sm:$0xff] %v7600_v54  ;;  %2387 = vperm.xlu0 %6418, %v7398_v50   ;;  %v7608_v33 = vpop.permute.xlu1 %1523 }
 0x138   : > { %10629 = vst [vmem:[#allocation72_spill] sm:$0xff] %v7608_v33  ;;  %2390 = vperm.xlu1 %6424, %v7412_v51  }
 0x13a   : > { %v7606_v56 = vpop.permute.xlu0 %1889 }
 0x13b   : > { %10628 = vst [vmem:[#allocation71_spill] sm:$0xff] %v7606_v56  ;;  %2563 = vperm.xlu0 %6418, %v7094_v48   ;;  %v7614_v46 = vpop.permute.xlu1 %1892 }
 0x13c   : > { %10631 = vst [vmem:[#allocation74_spill] sm:$0xff] %v7614_v46  ;;  %2566 = vperm.xlu1 %6424, %v7091_v47  }
 0x13e   : > { %v7612_v0 = vpop.permute.xlu0 %2119 }
 0x13f   : > { %10630 = vst [vmem:[#allocation73_spill] sm:$0xff] %v7612_v0  ;;  %2393 = vperm.xlu0 %6418, %v7432_v34   ;;  %v7620_v42 = vpop.permute.xlu1 %2122  ;;  %v7622_v23 = vpop.f32.mrb[0].mxu0 }
 0x140   : > { %10633 = vst [vmem:[#allocation76_spill] sm:$0xff] %v7620_v42  ;;  %2396 = vperm.xlu1 %6424, %v7442_v52   ;;  %v7626_v48 = vpop.f32.mrb[1].mxu0  ;;  %v771_v0 = vmul.f32 %v7622_v23, %v7622_v23 }
 0x141   : > { %10634 = vst [vmem:[#allocation77_spill] sm:$0xff] %v7626_v48  ;;  %v7628_v33 = vpop.f32.mrb[2].mxu0 }
 0x142   : > { %v7618_v54 = vpop.permute.xlu0 %1526  ;;  %v732_v47 = vadd.f32 %v7628_v33, %v7622_v23  ;;  %v7636_v42 = vpop.f32.mrb[3].mxu0 }
 0x143   : > { %10632 = vst [vmem:[#allocation75_spill] sm:$0xff] %v7618_v54  ;;  %2569 = vperm.xlu0 %6418, %v6921_v6   ;;  %v772_v54 = vmul.f32 %v7628_v33, %v7628_v33  ;;  %10635 = vst [vmem:[#allocation78_spill] sm:$0xff] %v7636_v42  ;;  %v7640_v6 = vpop.permute.xlu1 %1529 }
 0x144   : > { %10637 = vst [vmem:[#allocation80_spill] sm:$0xff] %v7640_v6  ;;  %2572 = vperm.xlu1 %6424, %v6918_v5  }
 0x145   : > { %v803_v48 = vadd.f32 %v772_v54, %v771_v0 }
 0x146   : > { %v7638_v46 = vpop.permute.xlu0 %1895 }
 0x147   : > { %10636 = vst [vmem:[#allocation79_spill] sm:$0xff] %v7638_v46  ;;  %2399 = vperm.xlu0 %6418, %v7458_v43   ;;  %v7646_v36 = vpop.permute.xlu1 %1898  ;;  %v7648_v58 = vpop.f32.mrb[4].mxu0 }
 0x148   : > { %10639 = vst [vmem:[#allocation82_spill] sm:$0xff] %v7646_v36  ;;  %2402 = vperm.xlu1 %6424, %v7468_v62   ;;  %v733_v42 = vadd.f32 %v732_v47, %v7648_v58  ;;  %v773_v6 = vmul.f32 %v7648_v58, %v7648_v58  ;;  %v7655_v46 = vpop.f32.mrb[5].mxu0 }
 0x149   : > { %10640 = vst [vmem:[#allocation83_spill] sm:$0xff] %v7655_v46  ;;  %v7657_v41 = vpop.f32.mrb[6].mxu0 }
 0x14a   : > { %v7644_v56 = vpop.permute.xlu0 %2125  ;;  %v804_v0 = vadd.f32 %v803_v48, %v773_v6  ;;  %v734_v5 = vadd.f32 %v733_v42, %v7657_v41  ;;  %v774_v54 = vmul.f32 %v7657_v41, %v7657_v41 }
 0x14b   : > { %10638 = vst [vmem:[#allocation81_spill] sm:$0xff] %v7644_v56  ;;  %2575 = vperm.xlu0 %6418, %v6939_v10   ;;  %v7662_v56 = vpop.f32.mrb[7].mxu0  ;;  %v7666_v36 = vpop.permute.xlu1 %2128 }
 0x14c   : > { %10641 = vst [vmem:[#allocation84_spill] sm:$0xff] %v7662_v56  ;;  %10643 = vst [vmem:[#allocation86_spill] sm:$0xff] %v7666_v36  ;;  %2578 = vperm.xlu1 %6424, %v6942_v11   ;;  %v805_v47 = vadd.f32 %v804_v0, %v774_v54 }
 0x14e   : > { %v7664_v10 = vpop.permute.xlu0 %1532 }
 0x14f   : > { %10642 = vst [vmem:[#allocation85_spill] sm:$0xff] %v7664_v10  ;;  %2405 = vperm.xlu0 %6418, %v7484_v35   ;;  %v7672_v40 = vpop.permute.xlu1 %1535  ;;  %v7674_v48 = vpop.f32.mrb[8].mxu0 }
 0x150   : > { %10645 = vst [vmem:[#allocation88_spill] sm:$0xff] %v7672_v40  ;;  %2408 = vperm.xlu1 %6424, %v7494_v20   ;;  %v735_v42 = vadd.f32 %v734_v5, %v7674_v48  ;;  %v775_v6 = vmul.f32 %v7674_v48, %v7674_v48  ;;  %v7681_v56 = vpop.f32.mrb[9].mxu0 }
 0x151   : > { %10646 = vst [vmem:[#allocation89_spill] sm:$0xff] %v7681_v56  ;;  %v7683_v10 = vpop.f32.mrb[10].mxu0 }
 0x152   : > { %v7670_v46 = vpop.permute.xlu0 %1901  ;;  %v806_v11 = vadd.f32 %v805_v47, %v775_v6  ;;  %v736_v0 = vadd.f32 %v735_v42, %v7683_v10  ;;  %v776_v54 = vmul.f32 %v7683_v10, %v7683_v10  ;;  %v7688_v40 = vpop.f32.mrb[11].mxu0 }
 0x153   : > { %10644 = vst [vmem:[#allocation87_spill] sm:$0xff] %v7670_v46  ;;  %2581 = vperm.xlu0 %6418, %v6975_v18   ;;  %10647 = vst [vmem:[#allocation90_spill] sm:$0xff] %v7688_v40  ;;  %v7692_v46 = vpop.permute.xlu1 %1904 }
 0x154   : > { %10649 = vst [vmem:[#allocation92_spill] sm:$0xff] %v7692_v46  ;;  %2584 = vperm.xlu1 %6424, %v6978_v19   ;;  %v807_v5 = vadd.f32 %v806_v11, %v776_v54 }
 0x156   : > { %v7690_v18 = vpop.permute.xlu0 %2131 }
 0x157   : > { %10648 = vst [vmem:[#allocation91_spill] sm:$0xff] %v7690_v18  ;;  %2411 = vperm.xlu0 %6418, %v7510_v45   ;;  %v7698_v36 = vpop.permute.xlu1 %2134  ;;  %v7700_v47 = vpop.f32.mrb[12].mxu0 }
 0x158   : > { %10651 = vst [vmem:[#allocation94_spill] sm:$0xff] %v7698_v36  ;;  %2414 = vperm.xlu1 %6424, %v7520_v39   ;;  %v737_v42 = vadd.f32 %v736_v0, %v7700_v47  ;;  %v777_v6 = vmul.f32 %v7700_v47, %v7700_v47  ;;  %v7707_v40 = vpop.f32.mrb[13].mxu0 }
 0x159   : > { %10652 = vst [vmem:[#allocation95_spill] sm:$0xff] %v7707_v40  ;;  %v7709_v18 = vpop.f32.mrb[14].mxu0 }
 0x15a   : > { %v7696_v56 = vpop.permute.xlu0 %2339  ;;  %10653 = vst [vmem:[#allocation96_spill] sm:$0xff] %v7709_v18  ;;  %v808_v19 = vadd.f32 %v807_v5, %v777_v6  ;;  %v738_v11 = vadd.f32 %v737_v42, %v7709_v18  ;;  %v778_v54 = vmul.f32 %v7709_v18, %v7709_v18  ;;  %v10660_v42 = vld [vmem:[#allocation15_spill] sm:$0xff] }
 0x15b   : > { %10650 = vst [vmem:[#allocation93_spill] sm:$0xff] %v7696_v56  ;;  %2587 = vperm.xlu0 %6418, %v7001_v24   ;;  %v7714_v56 = vpop.f32.mrb[15].mxu0  ;;  %v7718_v36 = vpop.permute.xlu1 %2342 }
 0x15c   : > { %10654 = vst [vmem:[#allocation97_spill] sm:$0xff] %v7714_v56  ;;  %10656 = vst [vmem:[#allocation99_spill] sm:$0xff] %v7718_v36  ;;  %2590 = vperm.xlu1 %6424, %v7004_v25   ;;  %v809_v0 = vadd.f32 %v808_v19, %v778_v54 }
 0x15e   : > { %v7716_v24 = vpop.permute.xlu0 %1907 }
 0x15f   : > { %10655 = vst [vmem:[#allocation98_spill] sm:$0xff] %v7716_v24  ;;  %2417 = vperm.xlu0 %6418, %v7536_v3   ;;  %v7724_v46 = vpop.permute.xlu1 %1910  ;;  %v7726_v5 = vpop.f32.mrb[16].mxu0 }
 0x160   : > { %10658 = vst [vmem:[#allocation101_spill] sm:$0xff] %v7724_v46  ;;  %10659 = vst [vmem:[#allocation102_spill] sm:$0xff] %v7726_v5  ;;  %2420 = vperm.xlu1 %6424, %v7546_v2   ;;  %v739_v6 = vadd.f32 %v738_v11, %v7726_v5  ;;  %v779_v56 = vmul.f32 %v7726_v5, %v7726_v5  ;;  %v7733_v36 = vpop.f32.mrb[17].mxu0  ;;  %v10666_v11 = vld [vmem:[#allocation16_spill] sm:$0xff] }
 0x161   : > { %10661 = vst [vmem:[#allocation15_spill] sm:$0xff] %v7733_v36  ;;  %v7735_v24 = vpop.f32.mrb[18].mxu0 }
 0x162   : > { %v7722_v40 = vpop.permute.xlu0 %2137  ;;  %10662 = vst [vmem:[#allocation103_spill] sm:$0xff] %v7735_v24  ;;  %v810_v25 = vadd.f32 %v809_v0, %v779_v56  ;;  %v740_v19 = vadd.f32 %v739_v6, %v7735_v24  ;;  %v780_v54 = vmul.f32 %v7735_v24, %v7735_v24  ;;  %v10670_v0 = vld [vmem:[#allocation17_spill] sm:$0xff] }
 0x163   : > { %10657 = vst [vmem:[#allocation100_spill] sm:$0xff] %v7722_v40  ;;  %2593 = vperm.xlu0 %6418, %v10660_v42   ;;  %v7740_v40 = vpop.f32.mrb[19].mxu0  ;;  %v7744_v46 = vpop.permute.xlu1 %2140 }
 0x164   : > { %10663 = vst [vmem:[#allocation104_spill] sm:$0xff] %v7740_v40  ;;  %10665 = vst [vmem:[#allocation106_spill] sm:$0xff] %v7744_v46  ;;  %2596 = vperm.xlu1 %6424, %v10666_v11   ;;  %v811_v5 = vadd.f32 %v810_v25, %v780_v54 }
 0x166   : > { %v7742_v42 = vpop.permute.xlu0 %2345 }
 0x167   : > { %10664 = vst [vmem:[#allocation105_spill] sm:$0xff] %v7742_v42  ;;  %2423 = vperm.xlu0 %6418, %v7562_v4   ;;  %v7750_v18 = vpop.permute.xlu1 %2348  ;;  %v7752_v56 = vpop.f32.mrb[20].mxu0 }
 0x168   : > { %10668 = vst [vmem:[#allocation107_spill] sm:$0xff] %v7750_v18  ;;  %10669 = vst [vmem:[#allocation108_spill] sm:$0xff] %v7752_v56  ;;  %2426 = vperm.xlu1 %6424, %v7572_v22   ;;  %v741_v6 = vadd.f32 %v740_v19, %v7752_v56  ;;  %v781_v40 = vmul.f32 %v7752_v56, %v7752_v56  ;;  %v7759_v42 = vpop.f32.mrb[21].mxu0  ;;  %v10675_v19 = vld [vmem:[#allocation18_spill] sm:$0xff] }
 0x169   : > { %10671 = vst [vmem:[#allocation17_spill] sm:$0xff] %v7759_v42  ;;  %v7761_v46 = vpop.f32.mrb[22].mxu0 }
 0x16a   : > { %v7748_v36 = vpop.permute.xlu0 %1913  ;;  %v812_v25 = vadd.f32 %v811_v5, %v781_v40  ;;  %v742_v54 = vadd.f32 %v741_v6, %v7761_v46  ;;  %v782_v11 = vmul.f32 %v7761_v46, %v7761_v46  ;;  %v7766_v18 = vpop.f32.mrb[23].mxu0  ;;  %v10679_v5 = vld [vmem:[#allocation19_spill] sm:$0xff] }
 0x16b   : > { %10667 = vst [vmem:[#allocation16_spill] sm:$0xff] %v7748_v36  ;;  %2599 = vperm.xlu0 %6418, %v10670_v0   ;;  %10672 = vst [vmem:[#allocation109_spill] sm:$0xff] %v7766_v18  ;;  %v7770_v36 = vpop.permute.xlu1 %1916 }
 0x16c   : > { %10674 = vst [vmem:[#allocation111_spill] sm:$0xff] %v7770_v36  ;;  %2602 = vperm.xlu1 %6424, %v10675_v19   ;;  %v813_v56 = vadd.f32 %v812_v25, %v782_v11 }
 0x16e   : > { %v7768_v0 = vpop.permute.xlu0 %2143 }
 0x16f   : > { %10673 = vst [vmem:[#allocation110_spill] sm:$0xff] %v7768_v0  ;;  %2429 = vperm.xlu0 %6418, %v7588_v13   ;;  %v7776_v24 = vpop.permute.xlu1 %2146  ;;  %v7778_v40 = vpop.f32.mrb[24].mxu0 }
 0x170   : > { %10677 = vst [vmem:[#allocation112_spill] sm:$0xff] %v7776_v24  ;;  %10678 = vst [vmem:[#allocation113_spill] sm:$0xff] %v7778_v40  ;;  %2432 = vperm.xlu1 %6424, %v7598_v29   ;;  %v743_v6 = vadd.f32 %v742_v54, %v7778_v40  ;;  %v783_v18 = vmul.f32 %v7778_v40, %v7778_v40  ;;  %v7785_v0 = vpop.f32.mrb[25].mxu0  ;;  %v10684_v54 = vld [vmem:[#allocation24_spill] sm:$0xff] }
 0x171   : > { %10680 = vst [vmem:[#allocation19_spill] sm:$0xff] %v7785_v0  ;;  %v7787_v13 = vpop.f32.mrb[26].mxu0  ;;  %v10685_v24 = vld [vmem:[#allocation20_spill] sm:$0xff] }
 0x172   : > { %v7774_v42 = vpop.permute.xlu0 %2351  ;;  %v814_v25 = vadd.f32 %v813_v56, %v783_v18  ;;  %v744_v11 = vadd.f32 %v743_v6, %v7787_v13  ;;  %v784_v19 = vmul.f32 %v7787_v13, %v7787_v13  ;;  %v10688_v56 = vld [vmem:[#allocation22_spill] sm:$0xff] }
 0x173   : > { %10676 = vst [vmem:[#allocation18_spill] sm:$0xff] %v7774_v42  ;;  %2605 = vperm.xlu0 %6418, %v10679_v5   ;;  %v7792_v42 = vpop.f32.mrb[27].mxu0  ;;  %v7796_v29 = vpop.permute.xlu1 %2354 }
 0x174   : > { %10681 = vst [vmem:[#allocation114_spill] sm:$0xff] %v7792_v42  ;;  %10683 = vst [vmem:[#allocation116_spill] sm:$0xff] %v7796_v29  ;;  %2608 = vperm.xlu1 %6424, %v10685_v24   ;;  %v815_v36 = vadd.f32 %v814_v25, %v784_v19 }
 0x176   : > { %v7794_v5 = vpop.permute.xlu0 %1919 }
 0x177   : > { %10682 = vst [vmem:[#allocation115_spill] sm:$0xff] %v7794_v5  ;;  %2915 = vperm.xlu0 %6418, %v10684_v54   ;;  %v7802_v40 = vpop.permute.xlu1 %1922  ;;  %v7804_v18 = vpop.f32.mrb[28].mxu0 }
 0x178   : > { %10687 = vst [vmem:[#allocation20_spill] sm:$0xff] %v7802_v40  ;;  %2918 = vperm.xlu1 %6424, %v7401_v30   ;;  %v745_v6 = vadd.f32 %v744_v11, %v7804_v18  ;;  %v785_v42 = vmul.f32 %v7804_v18, %v7804_v18  ;;  %v7811_v29 = vpop.f32.mrb[29].mxu0  ;;  %v10693_v11 = vld [vmem:[#allocation21_spill] sm:$0xff] }
 0x179   : > { %10689 = vst [vmem:[#allocation22_spill] sm:$0xff] %v7811_v29  ;;  %v7813_v54 = vpop.f32.mrb[30].mxu0  ;;  %v6456_v29 = vld [vmem:[#allocation6 + $0x40] sm:$0xff]  }
 0x17a   : > { %v7800_v0 = vpop.permute.xlu0 %2149  ;;  %v816_v24 = vadd.f32 %v815_v36, %v785_v42  ;;  %v746_v25 = vadd.f32 %v745_v6, %v7813_v54  ;;  %v786_v19 = vmul.f32 %v7813_v54, %v7813_v54  ;;  %v6458_v36 = vld [vmem:[#allocation6] sm:$0xff]   ;;  %5794 = vmatprep.subr.bf16.mxu1 %v6456_v29  ;;  %v6455_v29 = vld [vmem:[#allocation6 + $0x88] sm:$0xff]  }
 0x17b   : > { %10686 = vst [vmem:[#allocation24_spill] sm:$0xff] %v7800_v0  ;;  %2611 = vperm.xlu0 %6418, %v10688_v56   ;;  %v7818_v0 = vpop.f32.mrb[31].mxu0  ;;  %v7822_v30 = vpop.permute.xlu1 %2152  ;;  %5795 = vmatpush3.bf16.msra.mxu1 %v6458_v36 }
 0x17c   : > { %10690 = vst [vmem:[#allocation117_spill] sm:$0xff] %v7818_v0  ;;  %10692 = vst [vmem:[#allocation119_spill] sm:$0xff] %v7822_v30  ;;  %2614 = vperm.xlu1 %6424, %v10693_v11   ;;  %v817_v40 = vadd.f32 %v816_v24, %v786_v19  ;;  %v6460_v19 = vld [vmem:[#allocation6 + $0x48] sm:$0xff]  }
 0x17d   : > { %v6461_v30 = vld [vmem:[#allocation6 + $0x8] sm:$0xff]   ;;  %5796 = vmatprep.subr.bf16.mxu1 %v6460_v19 }
 0x17e   : > { %v7820_v56 = vpop.permute.xlu0 %2357 }
 0x17f   : > { %10691 = vst [vmem:[#allocation118_spill] sm:$0xff] %v7820_v56  ;;  %2921 = vperm.xlu0 %6418, %v7121_v57   ;;  %v7828_v42 = vpop.permute.xlu1 %2360  ;;  %v7830_v6 = vpop.f32.mrb[32].mxu0  ;;  %5797 = vmatpush3.bf16.msra.mxu1 %v6461_v30 }
 0x180   : > { %10695 = vst [vmem:[#allocation120_spill] sm:$0xff] %v7828_v42  ;;  %10696 = vst [vmem:[#allocation121_spill] sm:$0xff] %v7830_v6  ;;  %2924 = vperm.xlu1 %6424, %v7138_v61   ;;  %v747_v0 = vadd.f32 %v746_v25, %v7830_v6  ;;  %v787_v57 = vmul.f32 %v7830_v6, %v7830_v6  ;;  %v7837_v56 = vpop.f32.mrb[33].mxu0  ;;  %v6454_v25 = vld [vmem:[#allocation6 + $0xc8] sm:$0xff]  }
 0x181   : > { %10697 = vst [vmem:[#allocation122_spill] sm:$0xff] %v7837_v56  ;;  %v7839_v24 = vpop.f32.mrb[34].mxu0  ;;  %5908 = vmatprep.subr.bf16.mxu0 %v6454_v25 }
 0x182   : > { %v7826_v5 = vpop.permute.xlu0 %1925  ;;  %v818_v11 = vadd.f32 %v817_v40, %v787_v57  ;;  %v748_v42 = vadd.f32 %v747_v0, %v7839_v24  ;;  %5909 = vmatpush3.bf16.msra.mxu0 %v6455_v29  ;;  %v6462_v0 = vld [vmem:[#allocation6 + $0x50] sm:$0xff]  }
 0x183   : > { %10694 = vst [vmem:[#allocation21_spill] sm:$0xff] %v7826_v5  ;;  %2927 = vperm.xlu0 %6418, %v7184_v21   ;;  %v788_v21 = vmul.f32 %v7839_v24, %v7839_v24  ;;  %v7844_v5 = vpop.f32.mrb[35].mxu0  ;;  %v7848_v6 = vpop.permute.xlu1 %1928  ;;  %v6457_v57 = vld [vmem:[#allocation6 + $0xd0] sm:$0xff]   ;;  %5798 = vmatprep.subr.bf16.mxu1 %v6462_v0 }
 0x184   : > { %10698 = vst [vmem:[#allocation123_spill] sm:$0xff] %v7844_v5  ;;  %10700 = vst [vmem:[#allocation125_spill] sm:$0xff] %v7848_v6  ;;  %2930 = vperm.xlu1 %6424, %v7190_v28   ;;  %v6463_v5 = vld [vmem:[#allocation6 + $0x10] sm:$0xff]   ;;  %5910 = vmatprep.subr.bf16.mxu0 %v6457_v57 }
 0x185   : > { %v819_v36 = vadd.f32 %v818_v11, %v788_v21  ;;  %5799 = vmatpush3.bf16.msra.mxu1 %v6463_v5  ;;  %v6464_v21 = vld [vmem:[#allocation6 + $0x58] sm:$0xff]  }
 0x186   : > { %v7846_v61 = vpop.permute.xlu0 %2155  ;;  %v6467_v5 = vld [vmem:[#allocation6 + $0x98] sm:$0xff]   ;;  %5800 = vmatprep.subr.bf16.mxu1 %v6464_v21 }
 0x187   : > { %10699 = vst [vmem:[#allocation124_spill] sm:$0xff] %v7846_v61  ;;  %2617 = vperm.xlu0 %6418, %v7134_v59   ;;  %v7854_v56 = vpop.permute.xlu1 %2158  ;;  %v7856_v61 = vpop.f32.mrb[36].mxu0  ;;  %v6459_v59 = vld [vmem:[#allocation6 + $0x90] sm:$0xff]  }
 0x188   : > { %10702 = vst [vmem:[#allocation127_spill] sm:$0xff] %v7854_v56  ;;  %2620 = vperm.xlu1 %6424, %v7148_v63   ;;  %v749_v28 = vadd.f32 %v748_v42, %v7856_v61  ;;  %v789_v19 = vmul.f32 %v7856_v61, %v7856_v61  ;;  %v7863_v30 = vpop.f32.mrb[37].mxu0  ;;  %5911 = vmatpush3.bf16.msra.mxu0 %v6459_v59  ;;  %v6466_v56 = vld [vmem:[#allocation6 + $0xd8] sm:$0xff]   ;;  %v6469_v59 = vld [vmem:[#allocation6 + $0x20] sm:$0xff]  }
 0x189   : > { %10703 = vst [vmem:[#allocation128_spill] sm:$0xff] %v7863_v30  ;;  %v7865_v11 = vpop.f32.mrb[38].mxu0  ;;  %5912 = vmatprep.subr.bf16.mxu0 %v6466_v56 }
 0x18a   : > { %v7852_v40 = vpop.permute.xlu0 %2363  ;;  %v820_v25 = vadd.f32 %v819_v36, %v789_v19  ;;  %v790_v63 = vmul.f32 %v7865_v11, %v7865_v11  ;;  %v7870_v29 = vpop.f32.mrb[39].mxu0  ;;  %v6468_v36 = vld [vmem:[#allocation6 + $0x60] sm:$0xff]  }
 0x18b   : > { %10701 = vst [vmem:[#allocation126_spill] sm:$0xff] %v7852_v40  ;;  %2933 = vperm.xlu0 %6418, %v7220_v49   ;;  %v750_v49 = vadd.f32 %v749_v28, %v7865_v11  ;;  %10704 = vst [vmem:[#allocation129_spill] sm:$0xff] %v7870_v29  ;;  %v6465_v40 = vld [vmem:[#allocation6 + $0x18] sm:$0xff]   ;;  %v7874_v30 = vpop.permute.xlu1 %2366  ;;  %v6470_v28 = vld [vmem:[#allocation6 + $0xe0] sm:$0xff]  }
 0x18c   : > { %10706 = vst [vmem:[#allocation131_spill] sm:$0xff] %v7874_v30  ;;  %2936 = vperm.xlu1 %6424, %v7229_v55   ;;  %v821_v0 = vadd.f32 %v820_v25, %v790_v63  ;;  %5801 = vmatpush3.bf16.msra.mxu1 %v6465_v40  ;;  %v6471_v55 = vld [vmem:[#allocation6 + $0xa0] sm:$0xff]   ;;  %v6472_v25 = vld [vmem:[#allocation6 + $0x68] sm:$0xff]  }
 0x18d   : > { %5913 = vmatpush3.bf16.msra.mxu0 %v6467_v5  ;;  %5802 = vmatprep.subr.bf16.mxu1 %v6468_v36  ;;  %v6473_v30 = vld [vmem:[#allocation6 + $0x28] sm:$0xff]  }
 0x18e   : > { %v7872_v42 = vpop.permute.xlu0 %1931  ;;  %5914 = vmatprep.subr.bf16.mxu0 %v6470_v28 }
 0x18f   : > { %10705 = vst [vmem:[#allocation130_spill] sm:$0xff] %v7872_v42  ;;  %2939 = vperm.xlu0 %6418, %v7260_v16   ;;  %v7880_v19 = vpop.permute.xlu1 %1934  ;;  %v7882_v29 = vpop.f32.mrb[40].mxu0 }
 0x190   : > { %10708 = vst [vmem:[#allocation133_spill] sm:$0xff] %v7880_v19  ;;  %2942 = vperm.xlu1 %6424, %v7266_v27   ;;  %v751_v16 = vadd.f32 %v750_v49, %v7882_v29  ;;  %v791_v56 = vmul.f32 %v7882_v29, %v7882_v29  ;;  %v7889_v40 = vpop.f32.mrb[41].mxu0  ;;  %5803 = vmatpush3.bf16.msra.mxu1 %v6469_v59 }
 0x191   : > { %10709 = vst [vmem:[#allocation134_spill] sm:$0xff] %v7889_v40  ;;  %v7891_v21 = vpop.f32.mrb[42].mxu0  ;;  %5915 = vmatpush3.bf16.msra.mxu0 %v6471_v55  ;;  %5804 = vmatprep.subr.bf16.mxu1 %v6472_v25  ;;  %v6474_v55 = vld [vmem:[#allocation6 + $0xe8] sm:$0xff]  }
 0x192   : > { %v7878_v57 = vpop.permute.xlu0 %2161  ;;  %v822_v63 = vadd.f32 %v821_v0, %v791_v56  ;;  %v792_v27 = vmul.f32 %v7891_v21, %v7891_v21  ;;  %v7896_v5 = vpop.f32.mrb[43].mxu0  ;;  %v10714_v56 = vmov 0  ;;  %5916 = vmatprep.subr.bf16.mxu0 %v6474_v55  ;;  %v6478_v55 = vld [vmem:[#allocation6 + $0xf0] sm:$0xff]  }
 0x193   : > { %10707 = vst [vmem:[#allocation132_spill] sm:$0xff] %v7878_v57  ;;  %2623 = vperm.xlu0 %6418, %v7166_v9   ;;  %v752_v9 = vadd.f32 %v751_v16, %v7891_v21  ;;  %10710 = vst [vmem:[#allocation135_spill] sm:$0xff] %v7896_v5  ;;  %v7898_v57 = vpop.permute.xlu1 %2164  ;;  %v6481_v5 = vld [vmem:[#allocation6 + $0x38] sm:$0xff]  }
 0x194   : > { %10711 = vst [vmem:[#allocation136_spill] sm:$0xff] %v7898_v57  ;;  %2626 = vperm.xlu1 %6424, %v7187_v26   ;;  %v823_v36 = vadd.f32 %v822_v63, %v792_v27  ;;  %5805 = vmatpush3.bf16.msra.mxu1 %v6473_v30  ;;  %v6475_v30 = vld [vmem:[#allocation6 + $0xa8] sm:$0xff]  }
 0x195   : > { %5917 = vmatpush3.bf16.msra.mxu0 %v6475_v30  ;;  %v6483_v30 = vld [vmem:[#allocation6 + $0xb8] sm:$0xff]  }
 0x196   : > { %v2370_v49 = vpop.permute.xlu0 %2369  ;;  %5918 = vmatprep.subr.bf16.mxu0 %v6478_v55 }
 0x197   : > { %2945 = vperm.xlu0 %6418, %v7290_v53   ;;  %vm2444_vm3 = vcmp.eq.s32.totalorder %v2370_v49, 1  ;;  %v2373_v59 = vpop.permute.xlu1 %2372  ;;  %v7904_v28 = vpop.f32.mrb[44].mxu0  ;;  %v6476_v49 = vld [vmem:[#allocation6 + $0x70] sm:$0xff]  }
 0x198   : > { %2948 = vperm.xlu1 %6424, %v7308_v15   ;;  %vm2445_vm4 = vcmp.eq.s32.totalorder %v2373_v59, 1  ;;  %v753_v16 = vadd.f32 %v752_v9, %v7904_v28  ;;  %v793_v26 = vmul.f32 %v7904_v28, %v7904_v28  ;;  %v7911_v53 = vpop.f32.mrb[45].mxu0  ;;  %5806 = vmatprep.subr.bf16.mxu1 %v6476_v49 }
 0x199   : > { %10713 = vst [vmem:[#allocation138_spill] sm:$0xff] %v7911_v53  ;;  %vm7913_vm5 = vmpackc.low %vm2445_vm4, %vm2444_vm3  ;;  %v7917_v25 = vpop.f32.mrb[46].mxu0  ;;  %v6477_v53 = vld [vmem:[#allocation6 + $0x30] sm:$0xff]  }
 0x19a   : > { %v7902_v0 = vpop.permute.xlu0 %1937  ;;  %v10715_v56 = vsel %vm7913_vm5, 4294967295, %v10714_v56  ;;  %v754_v15 = vadd.f32 %v753_v16, %v7917_v25  ;;  %v794_v63 = vmul.f32 %v7917_v25, %v7917_v25  ;;  %v7922_v9 = vpop.f32.mrb[47].mxu0  ;;  %v6479_v16 = vld [vmem:[#allocation6 + $0xb0] sm:$0xff]   ;;  %5807 = vmatpush3.bf16.msra.mxu1 %v6477_v53 }
 0x19b   : > { %10712 = vst [vmem:[#allocation137_spill] sm:$0xff] %v7902_v0  ;;  %2951 = vperm.xlu0 %6418, %v7330_v60   ;;  %10716 = vst [vmem:[#allocation139_spill] sm:$0xff] %v10715_v56  ;;  %v824_v60 = vadd.f32 %v823_v36, %v793_v26  ;;  %v7926_v59 = vpop.permute.xlu1 %1940  ;;  %v6480_v26 = vld [vmem:[#allocation6 + $0x78] sm:$0xff]   ;;  %5919 = vmatpush3.bf16.msra.mxu0 %v6479_v16  ;;  %v6484_v56 = vld [vmem:[#allocation6 + $0x140] sm:$0xff]  }
 0x19c   : > { %10717 = vst [vmem:[#allocation140_spill] sm:$0xff] %v7922_v9  ;;  %10719 = vst [vmem:[#allocation142_spill] sm:$0xff] %v7926_v59  ;;  %2954 = vperm.xlu1 %6424, %v7345_v37   ;;  %v6482_v9 = vld [vmem:[#allocation6 + $0xf8] sm:$0xff]   ;;  %5808 = vmatprep.subr.bf16.mxu1 %v6480_v26 }
 0x19d   : > { %v825_v36 = vadd.f32 %v824_v60, %v794_v63  ;;  %5920 = vmatprep.subr.bf16.mxu0 %v6482_v9  ;;  %v10500_v63 = vmov 0.0|0.0  }
 0x19e   : > { %v7924_v27 = vpop.permute.xlu0 %2167  ;;  %3858 = vmatprep.mubr.bf16.mxu1 %v10500_v63  ;;  %5809 = vmatpush3.bf16.msra.mxu1 %v6481_v5 }
 0x19f   : > { %10718 = vst [vmem:[#allocation141_spill] sm:$0xff] %v7924_v27  ;;  %2629 = vperm.xlu0 %6418, %v7207_v38   ;;  %v7930_v27 = vpop.permute.xlu1 %2170  ;;  %v7932_v38 = vpop.f32.mrb[48].mxu0  ;;  %5921 = vmatpush3.bf16.msra.mxu0 %v6483_v30 }
 0x1a0   : > { %10720 = vst [vmem:[#allocation143_spill] sm:$0xff] %v7930_v27  ;;  %2632 = vperm.xlu1 %6424, %v7223_v12   ;;  %v755_v37 = vadd.f32 %v754_v15, %v7932_v38  ;;  %v795_v53 = vmul.f32 %v7932_v38, %v7932_v38  ;;  %v7939_v60 = vpop.f32.mrb[49].mxu0  ;;  %6018 = vmatprep.subr.bf16.mxu1 %v6484_v56 }
 0x1a1   : > { %10721 = vst [vmem:[#allocation144_spill] sm:$0xff] %v7939_v60  ;;  %v7942_v49 = vpop.f32.mrb[50].mxu0 }
 0x1a2   : > { %v2376_v40 = vpop.permute.xlu0 %2375  ;;  %v826_v55 = vadd.f32 %v825_v36, %v795_v53  ;;  %v796_v12 = vmul.f32 %v7942_v49, %v7942_v49  ;;  %v7947_v15 = vpop.f32.mrb[51].mxu0 }
 0x1a3   : > { %2957 = vperm.xlu0 %6418, %v7367_v31   ;;  %vm2446_vm6 = vcmp.eq.s32.totalorder %v2376_v40, 1  ;;  %v756_v31 = vadd.f32 %v755_v37, %v7942_v49  ;;  %10722 = vst [vmem:[#allocation145_spill] sm:$0xff] %v7947_v15  ;;  %v2379_v9 = vpop.permute.xlu1 %2378  ;;  %v10724_v40 = vmov 0 }
 0x1a4   : > { %2960 = vperm.xlu1 %6424, %v7379_v32   ;;  %v827_v26 = vadd.f32 %v826_v55, %v796_v12  ;;  %vm2447_vm10 = vcmp.eq.s32.totalorder %v2379_v9, 1 }
 0x1a5   : > { %vm7953_vm7 = vmpackc.low %vm2447_vm10, %vm2446_vm6 }
 0x1a6   : > { %v7949_v16 = vpop.permute.xlu0 %1943  ;;  %v10725_v40 = vsel %vm7953_vm7, 4294967295, %v10724_v40 }
 0x1a7   : > { %10723 = vst [vmem:[#allocation146_spill] sm:$0xff] %v7949_v16  ;;  %2963 = vperm.xlu0 %6418, %v7398_v50   ;;  %10726 = vst [vmem:[#allocation147_spill] sm:$0xff] %v10725_v40  ;;  %v7959_v36 = vpop.permute.xlu1 %1946  ;;  %v7961_v37 = vpop.f32.mrb[52].mxu0 }
 0x1a8   : > { %10728 = vst [vmem:[#allocation149_spill] sm:$0xff] %v7959_v36  ;;  %2966 = vperm.xlu1 %6424, %v7412_v51   ;;  %v757_v50 = vadd.f32 %v756_v31, %v7961_v37  ;;  %v797_v32 = vmul.f32 %v7961_v37, %v7961_v37  ;;  %v7968_v56 = vpop.f32.mrb[53].mxu0 }
 0x1a9   : > { %10729 = vst [vmem:[#allocation150_spill] sm:$0xff] %v7968_v56  ;;  %v7970_v30 = vpop.f32.mrb[54].mxu0 }
 0x1aa   : > { %v7957_v5 = vpop.permute.xlu0 %2173  ;;  %v828_v53 = vadd.f32 %v827_v26, %v797_v32  ;;  %v758_v55 = vadd.f32 %v757_v50, %v7970_v30  ;;  %v798_v12 = vmul.f32 %v7970_v30, %v7970_v30  ;;  %v7975_v9 = vpop.f32.mrb[55].mxu0 }
 0x1ab   : > { %10727 = vst [vmem:[#allocation148_spill] sm:$0xff] %v7957_v5  ;;  %2635 = vperm.xlu0 %6418, %v7253_v7   ;;  %10730 = vst [vmem:[#allocation151_spill] sm:$0xff] %v7975_v9  ;;  %v7977_v63 = vpop.permute.xlu1 %2176 }
 0x1ac   : > { %10731 = vst [vmem:[#allocation152_spill] sm:$0xff] %v7977_v63  ;;  %2638 = vperm.xlu1 %6424, %v7263_v14   ;;  %v829_v51 = vadd.f32 %v828_v53, %v798_v12  ;;  %v10734_v14 = vmov 0 }
 0x1ae   : > { %v2382_v7 = vpop.permute.xlu0 %2381 }
 0x1af   : > { %2969 = vperm.xlu0 %6418, %v7432_v34   ;;  %v2385_v56 = vpop.permute.xlu1 %2384  ;;  %vm2448_vm8 = vcmp.eq.s32.totalorder %v2382_v7, 1 }
 0x1b0   : > { %v7983_v15 = vpop.f32.mrb[56].mxu0  ;;  %2972 = vperm.xlu1 %6424, %v7442_v52   ;;  %vm2449_vm9 = vcmp.eq.s32.totalorder %v2385_v56, 1 }
 0x1b1   : > { %v759_v26 = vadd.f32 %v758_v55, %v7983_v15  ;;  %v799_v50 = vmul.f32 %v7983_v15, %v7983_v15  ;;  %v7990_v34 = vpop.f32.mrb[57].mxu0  ;;  %vm7992_vm11 = vmpackc.low %vm2449_vm9, %vm2448_vm8 }
 0x1b2   : > { %v7981_v31 = vpop.permute.xlu0 %1949  ;;  %10733 = vst [vmem:[#allocation154_spill] sm:$0xff] %v7990_v34  ;;  %v10735_v14 = vsel %vm7992_vm11, 4294967295, %v10734_v14  ;;  %v7996_v32 = vpop.f32.mrb[58].mxu0 }
 0x1b3   : > { %10732 = vst [vmem:[#allocation153_spill] sm:$0xff] %v7981_v31  ;;  %2975 = vperm.xlu0 %6418, %v7458_v43   ;;  %10736 = vst [vmem:[#allocation155_spill] sm:$0xff] %v10735_v14  ;;  %v830_v53 = vadd.f32 %v829_v51, %v799_v50  ;;  %v760_v43 = vadd.f32 %v759_v26, %v7996_v32  ;;  %v800_v52 = vmul.f32 %v7996_v32, %v7996_v32  ;;  %v8001_v56 = vpop.f32.mrb[59].mxu0  ;;  %v8003_v12 = vpop.permute.xlu1 %1952 }
 0x1b4   : > { %10737 = vst [vmem:[#allocation156_spill] sm:$0xff] %v8001_v56  ;;  %10738 = vst [vmem:[#allocation157_spill] sm:$0xff] %v8003_v12  ;;  %2978 = vperm.xlu1 %6424, %v7468_v62   ;;  %v10741_v62 = vmov 0 }
 0x1b5   : > { %v831_v7 = vadd.f32 %v830_v53, %v800_v52 }
 0x1b6   : > { %v2388_v55 = vpop.permute.xlu0 %2387 }
 0x1b7   : > { %2641 = vperm.xlu0 %6418, %v7284_v44   ;;  %v2391_v9 = vpop.permute.xlu1 %2390  ;;  %vm2450_vm12 = vcmp.eq.s32.totalorder %v2388_v55, 1 }
 0x1b8   : > { %v8009_v60 = vpop.f32.mrb[60].mxu0  ;;  %2644 = vperm.xlu1 %6424, %v7296_v1   ;;  %vm2451_vm13 = vcmp.eq.s32.totalorder %v2391_v9, 1 }
 0x1b9   : > { %v761_v51 = vadd.f32 %v760_v43, %v8009_v60  ;;  %v801_v26 = vmul.f32 %v8009_v60, %v8009_v60  ;;  %v8016_v44 = vpop.f32.mrb[61].mxu0  ;;  %vm8018_vm14 = vmpackc.low %vm2451_vm13, %vm2450_vm12 }
 0x1ba   : > { %v8007_v34 = vpop.permute.xlu0 %2563  ;;  %10740 = vst [vmem:[#allocation159_spill] sm:$0xff] %v8016_v44  ;;  %v10742_v62 = vsel %vm8018_vm14, 4294967295, %v10741_v62  ;;  %v8022_v50 = vpop.f32.mrb[62].mxu0 }
 0x1bb   : > { %10739 = vst [vmem:[#allocation158_spill] sm:$0xff] %v8007_v34  ;;  %2981 = vperm.xlu0 %6418, %v7484_v35   ;;  %10743 = vst [vmem:[#allocation160_spill] sm:$0xff] %v10742_v62  ;;  %v832_v53 = vadd.f32 %v831_v7, %v801_v26  ;;  %v762_v35 = vadd.f32 %v761_v51, %v8022_v50  ;;  %v802_v1 = vmul.f32 %v8022_v50, %v8022_v50  ;;  %v8027_v9 = vpop.f32.mrb[63].mxu0  ;;  %v8029_v52 = vpop.permute.xlu1 %2566 }
 0x1bc   : > { %10744 = vst [vmem:[#allocation161_spill] sm:$0xff] %v8027_v9  ;;  %10745 = vst [vmem:[#allocation162_spill] sm:$0xff] %v8029_v52  ;;  %2984 = vperm.xlu1 %6424, %v7494_v20   ;;  %v10747_v9 = vmov 0 }
 0x1bd   : > { %v763_v55 = vrot.slane %v762_v35, 4  ;;  %v833_v44 = vadd.f32 %v832_v53, %v802_v1 }
 0x1be   : > { %v2394_v43 = vpop.permute.xlu0 %2393 }
 0x1bf   : > { %2987 = vperm.xlu0 %6418, %v7510_v45   ;;  %v764_v56 = vadd.f32 %v763_v55, %v762_v35  ;;  %v834_v62 = vrot.slane %v833_v44, 4  ;;  %v2397_v7 = vpop.permute.xlu1 %2396  ;;  %vm2452_vm15 = vcmp.eq.s32.totalorder %v2394_v43, 1 }
 0x1c0   : > { %2990 = vperm.xlu1 %6424, %v7520_v39   ;;  %vm2453_vm0 = vcmp.eq.s32.totalorder %v2397_v7, 1  ;;  %v10752_v7 = vmov 0 }
 0x1c1   : > { %v765_v51 = vrot.slane %v764_v56, 2  ;;  %v835_v26 = vadd.f32 %v834_v62, %v833_v44  ;;  %vm8037_vm1 = vmpackc.low %vm2453_vm0, %vm2452_vm15 }
 0x1c2   : > { %v8033_v14 = vpop.permute.xlu0 %2569  ;;  %v10748_v9 = vsel %vm8037_vm1, 4294967295, %v10747_v9 }
 0x1c3   : > { %10746 = vst [vmem:[#allocation163_spill] sm:$0xff] %v8033_v14  ;;  %2647 = vperm.xlu0 %6418, %v7320_v8   ;;  %10749 = vst [vmem:[#allocation164_spill] sm:$0xff] %v10748_v9  ;;  %v766_v45 = vadd.f32 %v765_v51, %v764_v56  ;;  %v836_v20 = vrot.slane %v835_v26, 2  ;;  %v8041_v35 = vpop.permute.xlu1 %2572 }
 0x1c4   : > { %10750 = vst [vmem:[#allocation165_spill] sm:$0xff] %v8041_v35  ;;  %2650 = vperm.xlu1 %6424, %v7333_v17  }
 0x1c5   : > { %v767_v8 = vrot.slane %v766_v45, 1  ;;  %v837_v1 = vadd.f32 %v836_v20, %v835_v26 }
 0x1c6   : > { %v2400_v53 = vpop.permute.xlu0 %2399 }
 0x1c7   : > { %2993 = vperm.xlu0 %6418, %v7536_v3   ;;  %v768_v39 = vadd.f32 %v767_v8, %v766_v45  ;;  %v838_v55 = vrot.slane %v837_v1, 1  ;;  %v2403_v62 = vpop.permute.xlu1 %2402  ;;  %vm2454_vm2 = vcmp.eq.s32.totalorder %v2400_v53, 1  ;;  %v10756_v45 = vmov 0  }
 0x1c8   : > { %2996 = vperm.xlu1 %6424, %v7546_v2   ;;  %vm2455_vm3 = vcmp.eq.s32.totalorder %v2403_v62, 1 }
 0x1c9   : > { %v770_v56 = vmul.f32 0.00390625, %v768_v39  ;;  %v839_v43 = vadd.f32 %v838_v55, %v837_v1  ;;  %vm8049_vm4 = vmpackc.low %vm2455_vm3, %vm2454_vm2  ;;  %v10758_v1 = vmov 0  ;;  %v852_v55 = vlaneseq }
 0x1ca   : > { %v8045_v44 = vpop.permute.xlu0 %2575  ;;  %v10753_v7 = vsel %vm8049_vm4, 4294967295, %v10752_v7 }
 0x1cb   : > { %10751 = vst [vmem:[#allocation166_spill] sm:$0xff] %v8045_v44  ;;  %2999 = vperm.xlu0 %6418, %v7562_v4   ;;  %10754 = vst [vmem:[#allocation167_spill] sm:$0xff] %v10753_v7  ;;  %v840_v17 = vmul.f32 0.00390625, %v839_v43  ;;  %v841_v3 = vmul.f32 %v770_v56, %v770_v56  ;;  %v8053_v26 = vpop.permute.xlu1 %2578  ;;  %v8068_v43 = vshrl.u32 %v852_v55, 7 }
 0x1cc   : > { %10755 = vst [vmem:[#allocation168_spill] sm:$0xff] %v8053_v26  ;;  %3002 = vperm.xlu1 %6424, %v7572_v22  }
 0x1cd   : > { %v842_v4 = vsub.f32 %v840_v17, %v841_v3  ;;  %10763 = vst [vmem:[#allocation173_spill] sm:$0xff] %v8068_v43  ;;  %v10764_v3 = vmov 0 }
 0x1ce   : > { %v2406_v51 = vpop.permute.xlu0 %2405 }
 0x1cf   : > { %6431 = vperm.xlu0 %6418, %v10756_v45   ;;  %v843_v20 = vmax.f32 %v842_v4, 0.0  ;;  %v2409_v8 = vpop.permute.xlu1 %2408  ;;  %vm2456_vm6 = vcmp.eq.s32.totalorder %v2406_v51, 1  ;;  %v844_v51 = vld [vmem:[%s10437_s3] sm:$0x1] }
 0x1d0   : > { %6436 = vperm.xlu1 %6424, %v10756_v45   ;;  %vm2457_vm10 = vcmp.eq.s32.totalorder %v2409_v8, 1  ;;  %v6493_v4 = vld [vmem:[#allocation6 + $0x1c0] sm:$0xff]  }
 0x1d1   : > { %v845_v53 = vadd.f32 1e-05, %v843_v20  ;;  %vm8060_vm8 = vmpackc.low %vm2457_vm10, %vm2456_vm6  ;;  %v8078_v20 = vsub.s32 0, %v8068_v43  ;;  %6130 = vmatprep.subr.bf16.mxu0 %v6493_v4 }
 0x1d2   : > { %v8057_v2 = vpop.permute.xlu0 %2581  ;;  %v10759_v1 = vsel %vm8060_vm8, 4294967295, %v10758_v1 }
 0x1d3   : > { %10757 = vst [vmem:[#allocation169_spill] sm:$0xff] %v8057_v2  ;;  %10760 = vst [vmem:[#allocation170_spill] sm:$0xff] %v10759_v1  ;;  %6532 = vrsqrt.f32 %v845_v53  ;;  %v8064_v62 = vpop.permute.xlu1 %2584 }
 0x1d4   : > { %10761 = vst [vmem:[#allocation171_spill] sm:$0xff] %v8064_v62  ;;  %10767 = vst [vmem:[#allocation175_spill] sm:$0xff] %v8078_v20 }
 0x1d6   : > { %v2412_v39 = vpop.permute.xlu0 %2411 }
 0x1d7   : > { %v2415_v17 = vpop.permute.xlu1 %2414  ;;  %vm2458_vm9 = vcmp.eq.s32.totalorder %v2412_v39, 1  ;;  %v848_v39 = vld [vmem:[%s10438_s4] sm:$0x1] }
 0x1d8   : > { %vm2459_vm12 = vcmp.eq.s32.totalorder %v2415_v17, 1 }
 0x1d9   : > { %vm8070_vm13 = vmpackc.low %vm2459_vm12, %vm2458_vm9  ;;  %vm10512_vm9 = vcmp.lt.s32.totalorder %v8068_v43, 7 }
 0x1da   : > { %v8066_v22 = vpop.permute.xlu0 %2587  ;;  %v10765_v3 = vsel %vm8070_vm13, 4294967295, %v10764_v3 }
 0x1db   : > { %10762 = vst [vmem:[#allocation172_spill] sm:$0xff] %v8066_v22  ;;  %10766 = vst [vmem:[#allocation174_spill] sm:$0xff] %v10765_v3  ;;  %v8080_v8 = vpop.permute.xlu1 %2590 }
 0x1dc   : > { %10768 = vst [vmem:[#allocation176_spill] sm:$0xff] %v8080_v8 }
 0x1dd   : > { %v6533_v53 = vpop.eup %6532 }
 0x1de   : > { %v2418_v45 = vpop.permute.xlu0 %2417  ;;  %v847_v55 = vmul.f32 %v6533_v53, %v844_v51  ;;  %v10770_v51 = vmov 0 }
 0x1df   : > { %v2421_v7 = vpop.permute.xlu1 %2420  ;;  %vm2460_vm15 = vcmp.eq.s32.totalorder %v2418_v45, 1 }
 0x1e0   : > { %v849_v3 = vmul.f32 %v847_v55, %v770_v56  ;;  %v855_v1 = vrot.slane %v847_v55, %v8078_v20  ;;  %vm2461_vm0 = vcmp.eq.s32.totalorder %v2421_v7, 1 }
 0x1e1   : > { %vm8091_vm2 = vmpackc.low %vm2461_vm0, %vm2460_vm15 }
 0x1e2   : > { %v8085_v17 = vpop.permute.xlu0 %2593  ;;  %v850_v9 = vsub.f32 %v848_v39, %v849_v3  ;;  %v857_v40 = vmul.f32 %v855_v1, %v7622_v23  ;;  %v887_v22 = vmul.f32 %v855_v1, %v8009_v60  ;;  %v888_v4 = vmul.f32 %v855_v1, %v8022_v50  ;;  %v10773_v3 = vld [vmem:[#allocation96_spill] sm:$0xff] }
 0x1e3   : > { %10769 = vst [vmem:[#allocation177_spill] sm:$0xff] %v8085_v17  ;;  %v10771_v51 = vsel %vm8091_vm2, 4294967295, %v10770_v51  ;;  %v858_v53 = vmul.f32 %v855_v1, %v7628_v33  ;;  %v859_v56 = vmul.f32 %v855_v1, %v7648_v58  ;;  %v860_v55 = vmul.f32 %v855_v1, %v7657_v41  ;;  %v10775_v33 = vld [vmem:[#allocation102_spill] sm:$0xff]  ;;  %v10776_v58 = vld [vmem:[#allocation103_spill] sm:$0xff]  ;;  %v10777_v41 = vld [vmem:[#allocation108_spill] sm:$0xff] }
 0x1e4   : > { %10772 = vst [vmem:[#allocation178_spill] sm:$0xff] %v10771_v51  ;;  %v861_v45 = vmul.f32 %v855_v1, %v7674_v48  ;;  %v8102_v23 = vrot.slane %v850_v9, %v8078_v20  ;;  %v862_v60 = vmul.f32 %v855_v1, %v7683_v10  ;;  %v863_v50 = vmul.f32 %v855_v1, %v7700_v47  ;;  %v8107_v51 = vpop.permute.xlu1 %2596  ;;  %v10778_v47 = vld [vmem:[#allocation113_spill] sm:$0xff] }
 0x1e5   : > { %v864_v39 = vmul.f32 %v855_v1, %v10773_v3  ;;  %10774 = vst [vmem:[#allocation96_spill] sm:$0xff] %v8107_v51  ;;  %v865_v17 = vmul.f32 %v855_v1, %v10775_v33  ;;  %v866_v8 = vmul.f32 %v855_v1, %v10776_v58  ;;  %v867_v2 = vmul.f32 %v855_v1, %v10777_v41  ;;  %v10779_v41 = vld [vmem:[#allocation121_spill] sm:$0xff] }
 0x1e6   : > { %v8099_v7 = vpop.permute.xlu0 %2423  ;;  %v868_v48 = vmul.f32 %v855_v1, %v7761_v46  ;;  %v8114_v62 = vadd.f32 %v8102_v23, %v857_v40  ;;  %v8117_v9 = vadd.f32 %v8102_v23, %v887_v22  ;;  %v8120_v10 = vadd.f32 %v8102_v23, %v888_v4 }
 0x1e7   : > { %v869_v3 = vmul.f32 %v855_v1, %v10778_v47  ;;  %v870_v20 = vmul.f32 %v855_v1, %v7787_v13  ;;  %v871_v33 = vmul.f32 %v855_v1, %v7804_v18  ;;  %v872_v58 = vmul.f32 %v855_v1, %v7813_v54 }
 0x1e8   : > { %v873_v51 = vmul.f32 %v855_v1, %v10779_v41  ;;  %v8129_v40 = vpop.permute.xlu1 %2426  ;;  %v874_v22 = vmul.f32 %v855_v1, %v7839_v24  ;;  %v875_v44 = vmul.f32 %v855_v1, %v7856_v61  ;;  %v876_v4 = vmul.f32 %v855_v1, %v7865_v11 }
 0x1e9   : > { %v877_v47 = vmul.f32 %v855_v1, %v7882_v29  ;;  %v878_v13 = vmul.f32 %v855_v1, %v7891_v21  ;;  %v879_v18 = vmul.f32 %v855_v1, %v7904_v28  ;;  %v880_v54 = vmul.f32 %v855_v1, %v7917_v25 }
 0x1ea   : > { %v8127_v46 = vpop.permute.xlu0 %2599  ;;  %vm927_vm3 = vcmp.ge.f32.partialorder %v8114_v62, 0.0  ;;  %vm957_vm6 = vcmp.ge.f32.partialorder %v8117_v9, 0.0  ;;  %v881_v24 = vmul.f32 %v855_v1, %v7932_v38  ;;  %v882_v61 = vmul.f32 %v855_v1, %v7942_v49 }
 0x1eb   : > { %10780 = vst [vmem:[#allocation102_spill] sm:$0xff] %v8127_v46  ;;  %v883_v11 = vmul.f32 %v855_v1, %v7961_v37  ;;  %v884_v29 = vmul.f32 %v855_v1, %v7970_v30  ;;  %vm958_vm10 = vcmp.ge.f32.partialorder %v8120_v10, 0.0  ;;  %v959_v21 = vmul.f32 0.2, %v8114_v62 }
 0x1ec   : > { %v8140_v41 = vpop.permute.xlu1 %2602  ;;  %v885_v28 = vmul.f32 %v855_v1, %v7983_v15  ;;  %v886_v25 = vmul.f32 %v855_v1, %v7996_v32  ;;  %v989_v46 = vmul.f32 0.2, %v8117_v9  ;;  %v8155_v38 = vadd.f32 %v8102_v23, %v858_v53 }
 0x1ed   : > { %10781 = vst [vmem:[#allocation103_spill] sm:$0xff] %v8140_v41  ;;  %v990_v41 = vmul.f32 0.2, %v8120_v10  ;;  %v8158_v49 = vadd.f32 %v8102_v23, %v859_v56  ;;  %v8163_v30 = vadd.f32 %v8102_v23, %v860_v55  ;;  %v8166_v14 = vadd.f32 %v8102_v23, %v861_v45 }
 0x1ee   : > { %v8137_v26 = vpop.permute.xlu0 %2429  ;;  %v8169_v15 = vadd.f32 %v8102_v23, %v862_v60  ;;  %v8172_v32 = vadd.f32 %v8102_v23, %v863_v50  ;;  %v8177_v53 = vadd.f32 %v8102_v23, %v864_v39  ;;  %v8180_v56 = vadd.f32 %v8102_v23, %v865_v17 }
 0x1ef   : > { %v8183_v55 = vadd.f32 %v8102_v23, %v866_v8  ;;  %v8186_v45 = vadd.f32 %v8102_v23, %v867_v2  ;;  %v8189_v60 = vadd.f32 %v8102_v23, %v868_v48  ;;  %v8192_v50 = vadd.f32 %v8102_v23, %v869_v3 }
 0x1f0   : > { %v8174_v1 = vpop.permute.xlu1 %2432  ;;  %v8198_v39 = vadd.f32 %v8102_v23, %v871_v33  ;;  %v8201_v17 = vadd.f32 %v8102_v23, %v872_v58  ;;  %v8204_v8 = vadd.f32 %v8102_v23, %v873_v51  ;;  %v8207_v2 = vadd.f32 %v8102_v23, %v874_v22 }
 0x1f1   : > { %v8210_v48 = vadd.f32 %v8102_v23, %v875_v44  ;;  %v8218_v33 = vadd.f32 %v8102_v23, %v877_v47  ;;  %v8221_v58 = vadd.f32 %v8102_v23, %v878_v13  ;;  %v8224_v51 = vadd.f32 %v8102_v23, %v879_v18 }
 0x1f2   : > { %v8160_v37 = vpop.permute.xlu0 %2605  ;;  %v8229_v22 = vadd.f32 %v8102_v23, %v880_v54  ;;  %v8232_v44 = vadd.f32 %v8102_v23, %v881_v24  ;;  %v8238_v47 = vadd.f32 %v8102_v23, %v883_v11  ;;  %v8241_v13 = vadd.f32 %v8102_v23, %v884_v29 }
 0x1f3   : > { %10782 = vst [vmem:[#allocation108_spill] sm:$0xff] %v8160_v37  ;;  %v8195_v37 = vadd.f32 %v8102_v23, %v870_v20  ;;  %v8215_v20 = vadd.f32 %v8102_v23, %v876_v4  ;;  %v8235_v4 = vadd.f32 %v8102_v23, %v882_v61  ;;  %v8244_v18 = vadd.f32 %v8102_v23, %v885_v28 }
 0x1f4   : > { %v8226_v35 = vpop.permute.xlu1 %2608  ;;  %v8254_v24 = vsel %vm927_vm3, %v8114_v62, %v959_v21  ;;  %v8259_v61 = vsel %vm957_vm6, %v8117_v9, %v989_v46  ;;  %v8264_v11 = vsel %vm958_vm10, %v8120_v10, %v990_v41  ;;  %v10792_v9 = vld [vmem:[#allocation23_spill] sm:$0xff]  ;;  %v10793_v10 = vld [vmem:[#allocation44_spill] sm:$0xff]  ;;  %vm934_vm12 = vcmp.ge.f32.partialorder %v8177_v53, 0.0 }
 0x1f5   : > { %10784 = vst [vmem:[#allocation121_spill] sm:$0xff] %v8226_v35  ;;  %v8247_v35 = vadd.f32 %v8102_v23, %v886_v25  ;;  %10786 = vst [vmem:[#allocation180_spill] sm:$0xff] %v8254_v24  ;;  %v10511_v28 = vrot.slane %v8259_v61, 1  ;;  %v1792_v25 = vrot.slane %v8264_v11, 1  ;;  %v1375_v23 = vrot.slane %v8264_v11, 7 }
 0x1f6   : > { %v8212_v3 = vpop.permute.xlu0 %2915  ;;  %10787 = vst [vmem:[#allocation181_spill] sm:$0xff] %v8259_v61  ;;  %10788 = vst [vmem:[#allocation182_spill] sm:$0xff] %v8264_v11  ;;  %vm939_vm3 = vcmp.ge.f32.partialorder %v8192_v50, 0.0  ;;  %vm940_vm6 = vcmp.ge.f32.partialorder %v8195_v37, 0.0  ;;  %v962_v34 = vmul.f32 0.2, %v8163_v30 }
 0x1f7   : > { %10783 = vst [vmem:[#allocation113_spill] sm:$0xff] %v8212_v3  ;;  %v8286_v52 = vsel %vm10512_vm9, %v10511_v28, %v1792_v25  ;;  %v963_v11 = vmul.f32 0.2, %v8166_v14  ;;  %v964_v31 = vmul.f32 0.2, %v8169_v15  ;;  %v10800_v12 = vrot.slane %v8259_v61, 7 }
 0x1f8   : > { %v8266_v29 = vpop.permute.xlu1 %2918  ;;  %10794 = vst [vmem:[#allocation23_spill] sm:$0xff] %v8286_v52  ;;  %v965_v5 = vmul.f32 0.2, %v8172_v32  ;;  %v966_v36 = vmul.f32 0.2, %v8177_v53  ;;  %v10804_v27 = vrot.slane %v8254_v24, 7 }
 0x1f9   : > { %10789 = vst [vmem:[#allocation183_spill] sm:$0xff] %v8266_v29  ;;  %v967_v16 = vmul.f32 0.2, %v8180_v56  ;;  %vm952_vm0 = vcmp.ge.f32.partialorder %v8235_v4, 0.0  ;;  %vm953_vm2 = vcmp.ge.f32.partialorder %v8238_v47, 0.0  ;;  %vm10806_vm10 = vcmp.ge.f32.partialorder %v8155_v38, 0.0 }
 0x1fa   : > { %v8249_v54 = vpop.permute.xlu0 %2611  ;;  %v968_v59 = vmul.f32 0.2, %v8183_v55  ;;  %v969_v0 = vmul.f32 0.2, %v8186_v45  ;;  %v970_v57 = vmul.f32 0.2, %v8189_v60 }
 0x1fb   : > { %10785 = vst [vmem:[#allocation179_spill] sm:$0xff] %v8249_v54  ;;  %v973_v42 = vmul.f32 0.2, %v8198_v39  ;;  %vm10807_vm13 = vcmp.ge.f32.partialorder %v8158_v49, 0.0  ;;  %v977_v29 = vmul.f32 0.2, %v8210_v48 }
 0x1fc   : > { %v8274_v21 = vpop.permute.xlu1 %2614  ;;  %v980_v3 = vmul.f32 0.2, %v8221_v58  ;;  %v984_v52 = vmul.f32 0.2, %v8235_v4  ;;  %vm10817_vm15 = vcmp.ge.f32.partialorder %v8186_v45, 0.0  ;;  %vm2462_vm8 = vcmp.eq.s32.totalorder %v8099_v7, 1 }
 0x1fd   : > { %10791 = vst [vmem:[#allocation185_spill] sm:$0xff] %v8274_v21  ;;  %v10795_v21 = vrot.slane %v8254_v24, 1  ;;  %v987_v24 = vmul.f32 0.2, %v8244_v18  ;;  %vm2463_vm4 = vcmp.eq.s32.totalorder %v8129_v40, 1  ;;  %v10868_v7 = vld [vmem:[#allocation173_spill] sm:$0xff] }
 0x1fe   : > { %v8271_v62 = vpop.permute.xlu0 %2921  ;;  %vm10869_vm14 = vcmp.lt.s32.totalorder %v10868_v7, 1 }
 0x1ff   : > { %10790 = vst [vmem:[#allocation184_spill] sm:$0xff] %v8271_v62  ;;  %v8292_v46 = vsel %vm10512_vm9, %v1792_v25, %v10795_v21  ;;  %v960_v25 = vmul.f32 0.2, %v8155_v38  ;;  %v961_v21 = vmul.f32 0.2, %v8158_v49  ;;  %vm10801_vm9 = vcmp.lt.s32.totalorder %v8068_v43, 1 }
 0x200   : > { %10796 = vst [vmem:[#allocation44_spill] sm:$0xff] %v8292_v46  ;;  %v8301_v28 = vpop.permute.xlu1 %2924  ;;  %v8330_v63 = vsel %vm10801_vm9, %v10800_v12, %v1375_v23  ;;  %v8345_v12 = vsel %vm10801_vm9, %v1375_v23, %v10804_v27  ;;  %vm955_vm9 = vcmp.ge.f32.partialorder %v8244_v18, 0.0  ;;  %v971_v27 = vmul.f32 0.2, %v8192_v50 }
 0x201   : > { %10798 = vst [vmem:[#allocation187_spill] sm:$0xff] %v8301_v28  ;;  %10802 = vst [vmem:[#allocation189_spill] sm:$0xff] %v8330_v63  ;;  %v8357_v19 = vsel %vm10806_vm10, %v8155_v38, %v960_v25  ;;  %v972_v23 = vmul.f32 0.2, %v8195_v37  ;;  %v8367_v6 = vsel %vm10807_vm13, %v8158_v49, %v961_v21  ;;  %v974_v38 = vmul.f32 0.2, %v8201_v17 }
 0x202   : > { %v8295_v54 = vpop.permute.xlu0 %2927  ;;  %10805 = vst [vmem:[#allocation191_spill] sm:$0xff] %v8345_v12  ;;  %v975_v25 = vmul.f32 0.2, %v8204_v8  ;;  %vm10809_vm10 = vcmp.ge.f32.partialorder %v8163_v30, 0.0  ;;  %v978_v49 = vmul.f32 0.2, %v8215_v20 }
 0x203   : > { %10797 = vst [vmem:[#allocation186_spill] sm:$0xff] %v8295_v54  ;;  %v976_v54 = vmul.f32 0.2, %v8207_v2  ;;  %v8377_v28 = vsel %vm10809_vm10, %v8163_v30, %v962_v34  ;;  %v979_v21 = vmul.f32 0.2, %v8218_v33  ;;  %vm10811_vm13 = vcmp.ge.f32.partialorder %v8166_v14, 0.0 }
 0x204   : > { %v981_v46 = vmul.f32 0.2, %v8224_v51  ;;  %v982_v34 = vmul.f32 0.2, %v8229_v22  ;;  %vm10812_vm10 = vcmp.ge.f32.partialorder %v8169_v15, 0.0 }
 0x205   : > { %v8395_v30 = vsel %vm10812_vm10, %v8169_v15, %v964_v31  ;;  %v985_v12 = vmul.f32 0.2, %v8238_v47  ;;  %v986_v63 = vmul.f32 0.2, %v8241_v13  ;;  %v988_v31 = vmul.f32 0.2, %v8247_v35 }
 0x206   : > { %v8317_v41 = vpop.permute.xlu0 %2617  ;;  %v8413_v15 = vsel %vm934_vm12, %v8177_v53, %v966_v36  ;;  %vm10815_vm10 = vcmp.ge.f32.partialorder %v8180_v56, 0.0  ;;  %vm10818_vm12 = vcmp.ge.f32.partialorder %v8189_v60, 0.0 }
 0x207   : > { %10799 = vst [vmem:[#allocation188_spill] sm:$0xff] %v8317_v41  ;;  %v8332_v41 = vpop.permute.xlu1 %2930  ;;  %v8435_v36 = vsel %vm10818_vm12, %v8189_v60, %v970_v57  ;;  %vm10824_vm12 = vcmp.ge.f32.partialorder %v8215_v20, 0.0 }
 0x208   : > { %10803 = vst [vmem:[#allocation190_spill] sm:$0xff] %v8332_v41 }
 0x20a   : > { %v8369_v41 = vpop.permute.xlu0 %2933 }
 0x20b   : > { %10808 = vst [vmem:[#allocation192_spill] sm:$0xff] %v8369_v41  ;;  %v8379_v62 = vpop.permute.xlu1 %2620  ;;  %v8387_v41 = vsel %vm10811_vm13, %v8166_v14, %v963_v11  ;;  %vm10813_vm13 = vcmp.ge.f32.partialorder %v8172_v32, 0.0 }
 0x20c   : > { %10810 = vst [vmem:[#allocation193_spill] sm:$0xff] %v8379_v62  ;;  %v983_v62 = vmul.f32 0.2, %v8232_v44  ;;  %v8403_v14 = vsel %vm10813_vm13, %v8172_v32, %v965_v5  ;;  %v8420_v5 = vsel %vm10815_vm10, %v8180_v56, %v967_v16  ;;  %vm10816_vm13 = vcmp.ge.f32.partialorder %v8183_v55, 0.0 }
 0x20d   : > { %v8425_v32 = vsel %vm10816_vm13, %v8183_v55, %v968_v59  ;;  %v8440_v16 = vsel %vm939_vm3, %v8192_v50, %v971_v27  ;;  %v8445_v59 = vsel %vm940_vm6, %v8195_v37, %v972_v23  ;;  %vm10819_vm10 = vcmp.ge.f32.partialorder %v8198_v39, 0.0 }
 0x20e   : > { %v8405_v11 = vpop.permute.xlu0 %2939  ;;  %vm10821_vm13 = vcmp.ge.f32.partialorder %v8204_v8, 0.0  ;;  %vm10822_vm3 = vcmp.ge.f32.partialorder %v8207_v2, 0.0  ;;  %vm10823_vm6 = vcmp.ge.f32.partialorder %v8210_v48, 0.0  ;;  %v8475_v56 = vsel %vm10824_vm12, %v8215_v20, %v978_v49 }
 0x20f   : > { %10814 = vst [vmem:[#allocation194_spill] sm:$0xff] %v8405_v11  ;;  %v8415_v43 = vpop.permute.xlu1 %2936  ;;  %v8430_v11 = vsel %vm10817_vm15, %v8186_v45, %v969_v0  ;;  %v8450_v0 = vsel %vm10819_vm10, %v8198_v39, %v973_v42  ;;  %vm10820_vm15 = vcmp.ge.f32.partialorder %v8201_v17, 0.0  ;;  %v8460_v53 = vsel %vm10821_vm13, %v8204_v8, %v975_v25  ;;  %v10830_v8 = vld [vmem:[#allocation39_spill] sm:$0xff] }
 0x210   : > { %v8455_v57 = vsel %vm10820_vm15, %v8201_v17, %v974_v38  ;;  %v8465_v37 = vsel %vm10822_vm3, %v8207_v2, %v976_v54  ;;  %v8470_v42 = vsel %vm10823_vm6, %v8210_v48, %v977_v29  ;;  %vm10826_vm10 = vcmp.ge.f32.partialorder %v8218_v33, 0.0  ;;  %v10831_v2 = vld [vmem:[#allocation40_spill] sm:$0xff]  ;;  %v10855_v54 = vld [vmem:[#allocation25_spill] sm:$0xff]  ;;  %v10856_v29 = vld [vmem:[#allocation26_spill] sm:$0xff] }
 0x211   : > { %v8482_v45 = vsel %vm10826_vm10, %v8218_v33, %v979_v21  ;;  %vm10827_vm15 = vcmp.ge.f32.partialorder %v8221_v58, 0.0  ;;  %vm10828_vm13 = vcmp.ge.f32.partialorder %v8224_v51, 0.0  ;;  %vm10829_vm3 = vcmp.ge.f32.partialorder %v8229_v22, 0.0  ;;  %v10870_v21 = vld [vmem:[#allocation180_spill] sm:$0xff]  ;;  %v10912_v25 = vld [vmem:[#allocation187_spill] sm:$0xff] }
 0x212   : > { %v8477_v55 = vpop.permute.xlu0 %2623  ;;  %v8487_v60 = vsel %vm10827_vm15, %v8221_v58, %v980_v3  ;;  %v8492_v50 = vsel %vm10828_vm13, %v8224_v51, %v981_v46  ;;  %v8497_v39 = vsel %vm10829_vm3, %v8229_v22, %v982_v34  ;;  %vm2179_vm6 = vcmp.eq.s32.totalorder %v10830_v8, 1  ;;  %v10854_v46 = vld [vmem:[#allocation46_spill] sm:$0xff]  ;;  %v10863_v8 = vld [vmem:[#allocation52_spill] sm:$0xff] }
 0x213   : > { %10825 = vst [vmem:[#allocation195_spill] sm:$0xff] %v8477_v55  ;;  %v8499_v17 = vpop.permute.xlu1 %2942  ;;  %vm2178_vm12 = vcmp.eq.s32.totalorder %v10831_v2, 1  ;;  %vm10832_vm10 = vcmp.ge.f32.partialorder %v8232_v44, 0.0  ;;  %v8511_v3 = vsel %vm952_vm0, %v8235_v4, %v984_v52  ;;  %v8516_v20 = vsel %vm953_vm2, %v8238_v47, %v985_v12  ;;  %v10862_v2 = vld [vmem:[#allocation49_spill] sm:$0xff]  ;;  %v6495_v4 = vld [vmem:[#allocation6 + $0x180] sm:$0xff]  }
 0x214   : > { %v8506_v48 = vsel %vm10832_vm10, %v8232_v44, %v983_v62  ;;  %10833 = vst [vmem:[#allocation39_spill] sm:$0xff] %v8511_v3  ;;  %10834 = vst [vmem:[#allocation40_spill] sm:$0xff] %v8516_v20  ;;  %vm10835_vm15 = vcmp.ge.f32.partialorder %v8241_v13, 0.0  ;;  %v8526_v58 = vsel %vm955_vm9, %v8244_v18, %v987_v24  ;;  %vm10838_vm13 = vcmp.ge.f32.partialorder %v8247_v35, 0.0 }
 0x215   : > { %v8521_v33 = vsel %vm10835_vm15, %v8241_v13, %v986_v63  ;;  %10837 = vst [vmem:[#allocation197_spill] sm:$0xff] %v8526_v58  ;;  %v8531_v52 = vsel %vm10838_vm13, %v8247_v35, %v988_v31  ;;  %v10522_v51 = vrot.slane %v8357_v19, 7  ;;  %v10840_v44 = vunpack.i.h.bf16 %v10792_v9  ;;  %vm8613_vm13 = vmpackc.low %vm2179_vm6, %vm2178_vm12 }
 0x216   : > { %10836 = vst [vmem:[#allocation196_spill] sm:$0xff] %v8521_v33  ;;  %10839 = vst [vmem:[#allocation198_spill] sm:$0xff] %v8531_v52  ;;  %v10843_v63 = vunpack.i.l.bf16 %v10792_v9  ;;  %v8551_v24 = vpop.permute.xlu0 %2945  ;;  %v10847_v27 = vunpack.i.h.bf16 %v10793_v10  ;;  %v10850_v38 = vunpack.i.l.bf16 %v10793_v10  ;;  %v10519_v34 = vrot.slane %v8531_v52, 7  ;;  %v10936_v33 = vld [vmem:[#allocation186_spill] sm:$0xff] }
 0x217   : > { %vm8537_vm2 = vcmp.eq.s32.totalorder %v10840_v44, 1  ;;  %v8557_v12 = vpop.permute.xlu1 %2626  ;;  %v1762_v31 = vrot.slane %v8357_v19, 1  ;;  %v10860_v44 = vld [vmem:[#allocation47_spill] sm:$0xff]  ;;  %vm8627_vm12 = vmpackc.low %vm2463_vm4, %vm2462_vm8  ;;  %v10864_v49 = vmov 0  ;;  %vm2464_vm10 = vcmp.eq.s32.totalorder %v8137_v26, 1  ;;  %v10873_v26 = vld [vmem:[#allocation189_spill] sm:$0xff] }
 0x218   : > { %vm8543_vm0 = vcmp.eq.s32.totalorder %v10843_v63, 1  ;;  %10846 = vst [vmem:[#allocation199_spill] sm:$0xff] %v8557_v12  ;;  %vm8561_vm9 = vcmp.eq.s32.totalorder %v10847_v27, 1  ;;  %vm8567_vm3 = vcmp.eq.s32.totalorder %v10850_v38, 1  ;;  %v10853_v38 = vld [vmem:[#allocation43_spill] sm:$0xff]  ;;  %v10861_v63 = vld [vmem:[#allocation50_spill] sm:$0xff]  ;;  %vm10872_vm4 = vmmov %vm10869_vm14  ;;  %v8809_v3 = vpack.c.bf16 %v8413_v15, %v8403_v14 }
 0x219   : > { %v10865_v49 = vsel %vm8627_vm12, 4294967295, %v10864_v49  ;;  %vm2465_vm15 = vcmp.eq.s32.totalorder %v8174_v1, 1  ;;  %v10867_v35 = vrot.slane %v8259_v61, 7  ;;  %v10871_v27 = vrot.slane %v10870_v21, 7  ;;  %vm5506_vm8 = vmpackc.low %vm8537_vm2, %vm8543_vm0  ;;  %v10879_v12 = vld [vmem:[#allocation44_spill] sm:$0xff] }
 0x21a   : > { %v8585_v62 = vpop.permute.xlu0 %2951  ;;  %10866 = vst [vmem:[#allocation46_spill] sm:$0xff] %v10865_v49  ;;  %v10875_v49 = vld [vmem:[#allocation191_spill] sm:$0xff]  ;;  %vm10886_vm2 = vmmov %vm10872_vm4  ;;  %v10894_v10 = vmov 0  ;;  %vm10905_vm6 = vcmp.eq.s32.totalorder %v10853_v38, 1  ;;  %v10928_v58 = vrot.slane %v8395_v30, 7  ;;  %v10938_v20 = vmov 0 }
 0x21b   : > { %v8591_v9 = vpop.permute.xlu1 %2948  ;;  %v1378_v40 = vsel %vm10869_vm14, %v10519_v34, %v10867_v35  ;;  %v1407_v13 = vsel %vm10872_vm4, %v10871_v27, %v10522_v51  ;;  %v8657_v35 = vpack.c.bf16 %v8357_v19, %v10870_v21  ;;  %v10878_v34 = vld [vmem:[#allocation23_spill] sm:$0xff]  ;;  %v6486_v27 = vld [vmem:[#allocation6 + $0x148] sm:$0xff]   ;;  %vm8665_vm14 = vmpackc.low %vm2465_vm15, %vm2464_vm10  ;;  %v10881_v51 = vmov 0 }
 0x21c   : > { %v8650_v1 = vpack.c.bf16 %v10873_v26, %v1378_v40  ;;  %v8653_v55 = vpack.c.bf16 %v1407_v13, %v10875_v49  ;;  %v8661_v61 = vpack.c.bf16 %v10879_v12, %v10878_v34  ;;  %v10882_v51 = vsel %vm8665_vm14, 4294967295, %v10881_v51  ;;  %vm10889_vm0 = vmmov %vm10886_vm2 }
 0x21d   : > { %10877 = vst [vmem:[#allocation47_spill] sm:$0xff] %v8657_v35  ;;  %10883 = vst [vmem:[#allocation49_spill] sm:$0xff] %v10882_v51  ;;  %v10884_v13 = vrot.slane %v8377_v28, 7  ;;  %v10885_v49 = vrot.slane %v8367_v6, 7  ;;  %v10888_v12 = vrot.slane %v8357_v19, 7  ;;  %v10891_v19 = vld [vmem:[#allocation113_spill] sm:$0xff] }
 0x21e   : > { %v8607_v22 = vpop.permute.xlu0 %2629  ;;  %10874 = vst [vmem:[#allocation25_spill] sm:$0xff] %v8650_v1  ;;  %10876 = vst [vmem:[#allocation26_spill] sm:$0xff] %v8653_v55  ;;  %5508 = vmatmul.mubr.msk.bf16.vlgmr.msra.gmra.mrb[0].mxu1 %vm5506_vm8, %v8650_v1  ;;  %5556 = vmatprep.mubr.msk.bf16.mxu0 %vm8613_vm13, %v8653_v55  ;;  %vm3010_vm15 = vcmp.eq.s32.totalorder %v10891_v19, 1  ;;  %v6497_v51 = vld [vmem:[#allocation6 + $0x1c8] sm:$0xff]   ;;  %vm10898_vm13 = vcmp.lt.s32.totalorder %v10868_v7, 7  ;;  %v10899_v19 = vrot.slane %v10870_v21, 1 }
 0x21f   : > { %10857 = vst [vmem:[#allocation43_spill] sm:$0xff] %v8607_v22  ;;  %v8623_v18 = vpop.permute.xlu1 %2954  ;;  %v6485_v22 = vld [vmem:[#allocation6 + $0x100] sm:$0xff]   ;;  %10880 = vst [vmem:[#allocation50_spill] sm:$0xff] %v8661_v61  ;;  %v1405_v40 = vsel %vm10886_vm2, %v10885_v49, %v10884_v13  ;;  %v10887_v26 = vmov %v10885_v49  ;;  %3866 = vmatprep.mubr.bf16.mxu1 %v8657_v35  ;;  %v6487_v35 = vld [vmem:[#allocation6 + $0x108] sm:$0xff]   ;;  %v10923_v21 = vrot.slane %v8367_v6, 1 }
 0x220   : > { %v1406_v34 = vsel %vm10889_vm0, %v10888_v12, %v10887_v26  ;;  %vm5557_vm10 = vmpackc.low %vm8561_vm9, %vm8567_vm3  ;;  %v10892_v49 = vld [vmem:[#allocation183_spill] sm:$0xff]  ;;  %v8697_v26 = vpack.c.bf16 %v8377_v28, %v8367_v6  ;;  %6019 = vmatpush3.bf16.msra.mxu1 %v6485_v22  ;;  %v10902_v22 = vrot.slane %v8387_v41, 7  ;;  %vm3013_vm9 = vcmp.eq.s32.totalorder %v10912_v25, 1  ;;  %10941 = vst [vmem:[#allocation113_spill] sm:$0xff] %v8809_v3 }
 0x221   : > { %v8691_v13 = vpack.c.bf16 %v1405_v40, %v1406_v34  ;;  %vm3011_vm4 = vcmp.eq.s32.totalorder %v10892_v49, 1  ;;  %v10897_v40 = vrot.slane %v8367_v6, 1  ;;  %vm10900_vm2 = vmmov %vm10898_vm13  ;;  %v10903_v1 = vld [vmem:[#allocation27_spill] sm:$0xff]  ;;  %5559 = vmatmul.mubr.msk.bf16.vlgmr.msra.gmra.mrb[64].mxu0 %vm5557_vm10, %v8661_v61  ;;  %6020 = vmatprep.subr.bf16.mxu1 %v6486_v27  ;;  %vm10916_vm3 = vcmp.lt.s32.totalorder %v10868_v7, 7  ;;  %v6499_v27 = vld [vmem:[#allocation6 + $0x188] sm:$0xff]  }
 0x222   : > { %v8681_v47 = vpop.permute.xlu0 %2957  ;;  %vm8703_vm8 = vmpackc.low %vm3011_vm4, %vm3010_vm15  ;;  %v1824_v49 = vsel %vm10900_vm2, %v10899_v19, %v1762_v31  ;;  %v6488_v19 = vld [vmem:[#allocation6 + $0x150] sm:$0xff]   ;;  %6131 = vmatpush3.bf16.msra.mxu0 %v6495_v4  ;;  %v10925_v4 = vrot.slane %v8413_v15, 7  ;;  %vm3019_vm15 = vcmp.eq.s32.totalorder %v8499_v17, 1  ;;  %v10969_v17 = vrot.slane %v8413_v15, 1 }
 0x223   : > { %10890 = vst [vmem:[#allocation52_spill] sm:$0xff] %v8691_v13  ;;  %v8699_v12 = vpop.permute.xlu1 %2632  ;;  %v10895_v10 = vsel %vm8703_vm8, 4294967295, %v10894_v10  ;;  %v1823_v34 = vsel %vm10898_vm13, %v1762_v31, %v10897_v40  ;;  %vm10906_vm13 = vcmp.eq.s32.totalorder %v10854_v46, 1  ;;  %v10908_v40 = vrot.slane %v8377_v28, 7  ;;  %vm10909_vm2 = vmmov %vm10889_vm0  ;;  %v10910_v46 = vld [vmem:[#allocation184_spill] sm:$0xff]  ;;  %6132 = vmatprep.subr.bf16.mxu0 %v6497_v51  ;;  %v10937_v51 = vld [vmem:[#allocation190_spill] sm:$0xff] }
 0x224   : > { %10893 = vst [vmem:[#allocation173_spill] sm:$0xff] %v8699_v12  ;;  %10896 = vst [vmem:[#allocation180_spill] sm:$0xff] %v10895_v10  ;;  %v10901_v12 = vrot.slane %v8395_v30, 7  ;;  %v10904_v10 = vld [vmem:[#allocation28_spill] sm:$0xff]  ;;  %v8734_v31 = vpack.c.bf16 %v1823_v34, %v1824_v49  ;;  %v8749_v34 = vpack.c.bf16 %v8395_v30, %v8387_v41  ;;  %v10914_v49 = vrot.slane %v8387_v41, 1  ;;  %6021 = vmatpush3.bf16.msra.mxu1 %v6487_v35 }
 0x225   : > { %vm5560_vm1 = vmpackc.low %vm10906_vm13, %vm10905_vm6  ;;  %vm3012_vm6 = vcmp.eq.s32.totalorder %v10910_v46, 1  ;;  %v10918_v46 = vld [vmem:[#allocation56_spill] sm:$0xff]  ;;  %vm3015_vm10 = vcmp.eq.s32.totalorder %v10937_v51, 1  ;;  %6022 = vmatprep.subr.bf16.mxu1 %v6488_v19  ;;  %v6490_v51 = vld [vmem:[#allocation6 + $0x158] sm:$0xff]  }
 0x226   : > { %v1403_v52 = vsel %vm10889_vm0, %v10902_v22, %v10901_v12  ;;  %v10907_v12 = vmov %v10902_v22  ;;  %5562 = vmatprep.mubr.msk.bf16.mxu0 %vm5560_vm1, %v8691_v13  ;;  %10913 = vst [vmem:[#allocation191_spill] sm:$0xff] %v8749_v34  ;;  %v10915_v22 = vrot.slane %v8377_v28, 1  ;;  %vm8760_vm0 = vmpackc.low %vm3013_vm9, %vm3012_vm6  ;;  %v8782_v28 = vpop.permute.xlu0 %2963  ;;  %vm10930_vm9 = vcmp.eq.s32.totalorder %v10856_v29, 1  ;;  %v6489_v29 = vld [vmem:[#allocation6 + $0x110] sm:$0xff]   ;;  %6133 = vmatpush3.bf16.msra.mxu0 %v6499_v27 }
 0x227   : > { %v1404_v38 = vsel %vm10909_vm2, %v10908_v40, %v10907_v12  ;;  %v10917_v40 = vld [vmem:[#allocation53_spill] sm:$0xff]  ;;  %vm10924_vm13 = vmmov %vm10916_vm3  ;;  %v8784_v6 = vpop.permute.xlu1 %2960  ;;  %vm10949_vm1 = vcmp.eq.s32.totalorder %v10861_v63, 1 }
 0x228   : > { %v8744_v23 = vpack.c.bf16 %v1403_v52, %v1404_v38  ;;  %v1821_v12 = vsel %vm10916_vm3, %v10915_v22, %v10914_v49  ;;  %v10919_v38 = vmov 0  ;;  %v10922_v25 = vmov %v10915_v22  ;;  %vm10929_vm6 = vmmov %vm10909_vm2  ;;  %6023 = vmatpush3.bf16.msra.mxu1 %v6489_v29 }
 0x229   : > { %v10920_v38 = vsel %vm8760_vm0, 4294967295, %v10919_v38  ;;  %v1822_v61 = vsel %vm10924_vm13, %v10923_v21, %v10922_v25  ;;  %v10926_v49 = vrot.slane %v8403_v14, 7  ;;  %v6501_v21 = vld [vmem:[#allocation6 + $0x1d0] sm:$0xff]   ;;  %vm10931_vm3 = vcmp.eq.s32.totalorder %v10855_v54, 1  ;;  %6024 = vmatprep.subr.bf16.mxu1 %v6490_v51 }
 0x22a   : > { %10911 = vst [vmem:[#allocation189_spill] sm:$0xff] %v8744_v23  ;;  %10921 = vst [vmem:[#allocation23_spill] sm:$0xff] %v10920_v38  ;;  %6134 = vmatprep.subr.bf16.mxu0 %v6501_v21  ;;  %v8872_v25 = vpack.c.bf16 %v8425_v32, %v8420_v5  ;;  %v10984_v51 = vld [vmem:[#allocation29_spill] sm:$0xff]  ;;  %v10996_v29 = vrot.slane %v8440_v16, 7 }
 0x22b   : > { %v1401_v22 = vsel %vm10909_vm2, %v10926_v49, %v10925_v4  ;;  %v10927_v52 = vmov %v10926_v49  ;;  %vm8790_vm13 = vmpackc.low %vm10931_vm3, %vm10930_vm9  ;;  %v10934_v4 = vld [vmem:[#allocation55_spill] sm:$0xff]  ;;  %v10935_v49 = vld [vmem:[#allocation58_spill] sm:$0xff]  ;;  %vm10944_vm3 = vcmp.lt.s32.totalorder %v10868_v7, 7  ;;  %v8862_v27 = vpop.permute.xlu1 %2966 }
 0x22c   : > { %v1402_v38 = vsel %vm10929_vm6, %v10928_v58, %v10927_v52  ;;  %vm3014_vm6 = vcmp.eq.s32.totalorder %v10936_v33, 1  ;;  %v8797_v58 = vpack.c.bf16 %v1821_v12, %v1822_v61  ;;  %v10942_v33 = vrot.slane %v8403_v14, 1  ;;  %5511 = vmatmul.mubr.msk.bf16.gmra.mrb[4].mxu1 %vm8790_vm13, %v8653_v55  ;;  %v6513_v55 = vld [vmem:[#allocation6 + $0x1b0] sm:$0xff]  }
 0x22d   : > { %v8799_v52 = vpack.c.bf16 %v1401_v22, %v1402_v38  ;;  %vm8803_vm9 = vmpackc.low %vm3015_vm10, %vm3014_vm6  ;;  %v10943_v61 = vrot.slane %v8395_v30, 1  ;;  %v10946_v38 = vrot.slane %v8387_v41, 1  ;;  %vm10948_vm6 = vcmp.eq.s32.totalorder %v10860_v44, 1  ;;  %3874 = vmatprep.mubr.bf16.mxu1 %v8697_v26 }
 0x22e   : > { %v10939_v20 = vsel %vm8803_vm9, 4294967295, %v10938_v20  ;;  %vm10947_vm10 = vmmov %vm10944_vm3  ;;  %v10953_v30 = vrot.slane %v8425_v32, 7  ;;  %v10954_v41 = vrot.slane %v8420_v5, 7  ;;  %v10957_v44 = vrot.slane %v8413_v15, 7 }
 0x22f   : > { %10940 = vst [vmem:[#allocation44_spill] sm:$0xff] %v10939_v20  ;;  %v1819_v35 = vsel %vm10944_vm3, %v10943_v61, %v10942_v33  ;;  %v10945_v12 = vmov %v10943_v61  ;;  %vm8827_vm2 = vmpackc.low %vm10949_vm1, %vm10948_vm6  ;;  %vm10955_vm3 = vcmp.lt.s32.totalorder %v10868_v7, 1  ;;  %vm10960_vm6 = vcmp.eq.s32.totalorder %v10863_v8, 1  ;;  %v10964_v8 = vld [vmem:[#allocation194_spill] sm:$0xff] }
 0x230   : > { %v1820_v22 = vsel %vm10947_vm10, %v10946_v38, %v10945_v12  ;;  %v1399_v19 = vsel %vm10955_vm3, %v10954_v41, %v10953_v30  ;;  %v10956_v61 = vmov %v10954_v41  ;;  %vm10958_vm1 = vmmov %vm10955_vm3  ;;  %v6503_v12 = vld [vmem:[#allocation6 + $0x190] sm:$0xff]   ;;  %vm10959_vm10 = vcmp.eq.s32.totalorder %v10862_v2, 1  ;;  %v10963_v38 = vld [vmem:[#allocation192_spill] sm:$0xff]  ;;  %5565 = vmatmul.mubr.msk.bf16.gmra.mrb[68].mxu0 %vm8827_vm2, %v8734_v31 }
 0x231   : > { %v8832_v33 = vpack.c.bf16 %v1819_v35, %v1820_v22  ;;  %v1400_v63 = vsel %vm10958_vm1, %v10957_v44, %v10956_v61  ;;  %vm8850_vm4 = vmpackc.low %vm10960_vm6, %vm10959_vm10  ;;  %vm3016_vm3 = vcmp.eq.s32.totalorder %v10963_v38, 1  ;;  %vm3017_vm1 = vcmp.eq.s32.totalorder %v8415_v43, 1  ;;  %v6504_v2 = vld [vmem:[#allocation6 + $0x1d8] sm:$0xff]   ;;  %6135 = vmatpush3.bf16.msra.mxu0 %v6503_v12 }
 0x232   : > { %v8858_v22 = vpack.c.bf16 %v1399_v19, %v1400_v63  ;;  %vm3018_vm10 = vcmp.eq.s32.totalorder %v10964_v8, 1  ;;  %vm8866_vm6 = vmpackc.low %vm3017_vm1, %vm3016_vm3  ;;  %v10965_v30 = vmov 0  ;;  %v10968_v43 = vrot.slane %v8420_v5, 1  ;;  %v6491_v44 = vld [vmem:[#allocation6 + $0x118] sm:$0xff]   ;;  %5568 = vmatprep.mubr.msk.bf16.mxu0 %vm8850_vm4, %v8744_v23  ;;  %6136 = vmatprep.subr.bf16.mxu0 %v6504_v2  ;;  %v11006_v2 = vld [vmem:[#allocation59_spill] sm:$0xff] }
 0x233   : > { %10952 = vst [vmem:[#allocation183_spill] sm:$0xff] %v8832_v33  ;;  %v10966_v30 = vsel %vm8866_vm6, 4294967295, %v10965_v30  ;;  %vm10970_vm13 = vcmp.lt.s32.totalorder %v10868_v7, 7  ;;  %v10971_v41 = vmov %v10969_v17  ;;  %v10972_v19 = vrot.slane %v8403_v14, 1  ;;  %vm8890_vm1 = vmpackc.low %vm3019_vm15, %vm3018_vm10  ;;  %6025 = vmatpush3.bf16.msra.mxu1 %v6491_v44 }
 0x234   : > { %10967 = vst [vmem:[#allocation27_spill] sm:$0xff] %v10966_v30  ;;  %v1817_v21 = vsel %vm10970_vm13, %v10969_v17, %v10968_v43  ;;  %vm10973_vm3 = vmmov %vm10970_vm13  ;;  %v10974_v63 = vmov 0  ;;  %v10977_v15 = vrot.slane %v8435_v36, 7  ;;  %v10978_v14 = vrot.slane %v8430_v11, 7 }
 0x235   : > { %v1818_v61 = vsel %vm10973_vm3, %v10972_v19, %v10971_v41  ;;  %v10975_v63 = vsel %vm8890_vm1, 4294967295, %v10974_v63  ;;  %vm10979_vm13 = vcmp.lt.s32.totalorder %v10868_v7, 1  ;;  %v10981_v17 = vrot.slane %v8425_v32, 7  ;;  %v8908_v41 = vpop.permute.xlu0 %2635  ;;  %v6492_v19 = vld [vmem:[#allocation6 + $0x160] sm:$0xff]  }
 0x236   : > { %10976 = vst [vmem:[#allocation28_spill] sm:$0xff] %v10975_v63  ;;  %v8894_v38 = vpack.c.bf16 %v1817_v21, %v1818_v61  ;;  %v1397_v8 = vsel %vm10979_vm13, %v10978_v14, %v10977_v15  ;;  %v10980_v43 = vmov %v10978_v14  ;;  %vm10982_vm3 = vmmov %vm10979_vm13  ;;  %vm3020_vm15 = vcmp.eq.s32.totalorder %v8551_v24, 1  ;;  %v6505_v15 = vld [vmem:[#allocation6 + $0x198] sm:$0xff]   ;;  %6026 = vmatprep.subr.bf16.mxu1 %v6492_v19 }
 0x237   : > { %v1398_v54 = vsel %vm10982_vm3, %v10981_v17, %v10980_v43  ;;  %10983 = vst [vmem:[#allocation184_spill] sm:$0xff] %v8908_v41  ;;  %vm3021_vm2 = vcmp.eq.s32.totalorder %v8591_v9, 1  ;;  %v8919_v61 = vpack.c.bf16 %v8435_v36, %v8430_v11  ;;  %v10985_v14 = vld [vmem:[#allocation30_spill] sm:$0xff]  ;;  %v10986_v43 = vmov 0  ;;  %6137 = vmatpush3.bf16.msra.mxu0 %v6505_v15 }
 0x238   : > { %v8913_v21 = vpack.c.bf16 %v1397_v8, %v1398_v54  ;;  %vm8923_vm3 = vmpackc.low %vm3021_vm2, %vm3020_vm15  ;;  %v10989_v35 = vrot.slane %v8430_v11, 1  ;;  %v10990_v24 = vrot.slane %v8425_v32, 1  ;;  %vm10991_vm4 = vcmp.lt.s32.totalorder %v10868_v7, 7  ;;  %v8951_v32 = vpop.permute.xlu1 %2638 }
 0x239   : > { %v10987_v43 = vsel %vm8923_vm3, 4294967295, %v10986_v43  ;;  %v10993_v12 = vrot.slane %v8420_v5, 1  ;;  %vm10994_vm1 = vmmov %vm10991_vm4  ;;  %v10995_v54 = vrot.slane %v8445_v59, 7  ;;  %v10999_v63 = vrot.slane %v8435_v36, 7  ;;  %11001 = vst [vmem:[#allocation53_spill] sm:$0xff] %v8951_v32  ;;  %v6508_v5 = vld [vmem:[#allocation6 + $0x1e0] sm:$0xff]   ;;  %v2970_v15 = vpop.permute.xlu0 %2969 }
 0x23a   : > { %10988 = vst [vmem:[#allocation187_spill] sm:$0xff] %v10987_v43  ;;  %v1815_v9 = vsel %vm10991_vm4, %v10990_v24, %v10989_v35  ;;  %v10992_v8 = vmov %v10990_v24  ;;  %vm10997_vm15 = vmmov %vm10979_vm13  ;;  %v10998_v43 = vmov %v10996_v29  ;;  %vm11003_vm4 = vcmp.eq.s32.totalorder %v10904_v10, 1  ;;  %6138 = vmatprep.subr.bf16.mxu0 %v6508_v5 }
 0x23b   : > { %v1816_v17 = vsel %vm10994_vm1, %v10993_v12, %v10992_v8  ;;  %v1395_v20 = vsel %vm10997_vm15, %v10996_v29, %v10995_v54  ;;  %vm11000_vm2 = vmmov %vm10979_vm13  ;;  %vm11002_vm1 = vcmp.eq.s32.totalorder %v10903_v1, 1  ;;  %vm3022_vm15 = vcmp.eq.s32.totalorder %v8585_v62, 1  ;;  %v11018_v54 = vld [vmem:[#allocation61_spill] sm:$0xff] }
 0x23c   : > { %v1396_v35 = vsel %vm11000_vm2, %v10999_v63, %v10998_v43  ;;  %vm8957_vm13 = vmpackc.low %vm11003_vm4, %vm11002_vm1  ;;  %v8962_v29 = vpack.c.bf16 %v1815_v9, %v1816_v17  ;;  %vm3023_vm2 = vcmp.eq.s32.totalorder %v8623_v18, 1  ;;  %v6494_v63 = vld [vmem:[#allocation6 + $0x120] sm:$0xff]   ;;  %v11007_v43 = vld [vmem:[#allocation62_spill] sm:$0xff]  ;;  %v11008_v12 = vmov 0 }
 0x23d   : > { %v8964_v8 = vpack.c.bf16 %v1395_v20, %v1396_v35  ;;  %vm8971_vm1 = vmpackc.low %vm3023_vm2, %vm3022_vm15  ;;  %v8977_v20 = vpack.c.bf16 %v8445_v59, %v8440_v16  ;;  %v11011_v18 = vrot.slane %v8440_v16, 1  ;;  %v11012_v62 = vrot.slane %v8435_v36, 1  ;;  %v6496_v9 = vld [vmem:[#allocation6 + $0x168] sm:$0xff]   ;;  %v6509_v36 = vld [vmem:[#allocation6 + $0x1a0] sm:$0xff]   ;;  %5514 = vmatmul.mubr.msk.bf16.gmra.mrb[8].mxu1 %vm8957_vm13, %v8691_v13 }
 0x23e   : > { %v11009_v12 = vsel %vm8971_vm1, 4294967295, %v11008_v12  ;;  %vm11013_vm4 = vcmp.lt.s32.totalorder %v10868_v7, 7  ;;  %vm11014_vm3 = vcmp.eq.s32.totalorder %v10917_v40, 1  ;;  %vm11015_vm15 = vcmp.eq.s32.totalorder %v10918_v46, 1  ;;  %v11019_v35 = vld [vmem:[#allocation64_spill] sm:$0xff]  ;;  %3882 = vmatprep.mubr.bf16.mxu1 %v8749_v34  ;;  %6027 = vmatpush3.bf16.msra.mxu1 %v6494_v63 }
 0x23f   : > { %11010 = vst [vmem:[#allocation56_spill] sm:$0xff] %v11009_v12  ;;  %v1813_v44 = vsel %vm11013_vm4, %v11012_v62, %v11011_v18  ;;  %vm8989_vm2 = vmpackc.low %vm11015_vm15, %vm11014_vm3  ;;  %vm3024_vm6 = vcmp.eq.s32.totalorder %v8681_v47, 1  ;;  %v11020_v10 = vmov %v11012_v62  ;;  %v11021_v18 = vrot.slane %v8430_v11, 1  ;;  %6028 = vmatprep.subr.bf16.mxu1 %v6496_v9  ;;  %6139 = vmatpush3.bf16.msra.mxu0 %v6509_v36 }
 0x240   : > { %v11022_v40 = vrot.slane %v8455_v57, 7  ;;  %v11023_v46 = vrot.slane %v8450_v0, 7  ;;  %vm11024_vm3 = vcmp.lt.s32.totalorder %v10868_v7, 1  ;;  %v11026_v12 = vrot.slane %v8445_v59, 7  ;;  %5571 = vmatmul.mubr.msk.bf16.gmra.mrb[72].mxu0 %vm8989_vm2, %v8797_v58 }
 0x241   : > { %v1814_v19 = vsel %vm11013_vm4, %v11021_v18, %v11020_v10  ;;  %vm11027_vm15 = vmmov %vm11024_vm3  ;;  %vm11028_vm1 = vcmp.eq.s32.totalorder %v10934_v4, 1  ;;  %vm11029_vm4 = vcmp.eq.s32.totalorder %v10935_v49, 1  ;;  %v2973_v4 = vpop.permute.xlu1 %2972  ;;  %v6510_v49 = vld [vmem:[#allocation6 + $0x1e8] sm:$0xff]   ;;  %vm3027_vm13 = vcmp.eq.s32.totalorder %v8862_v27, 1 }
 0x242   : > { %v1393_v62 = vsel %vm11024_vm3, %v11023_v46, %v11022_v40  ;;  %v11025_v1 = vmov %v11023_v46  ;;  %vm9018_vm10 = vmpackc.low %vm11029_vm4, %vm11028_vm1  ;;  %v9025_v10 = vpack.c.bf16 %v1813_v44, %v1814_v19  ;;  %vm3026_vm3 = vcmp.eq.s32.totalorder %v8782_v28, 1  ;;  %v6498_v27 = vld [vmem:[#allocation6 + $0x128] sm:$0xff]   ;;  %6140 = vmatprep.subr.bf16.mxu0 %v6510_v49  ;;  %v11060_v19 = vld [vmem:[#allocation39_spill] sm:$0xff] }
 0x243   : > { %v1394_v30 = vsel %vm11027_vm15, %v11026_v12, %v11025_v1  ;;  %vm3025_vm15 = vcmp.eq.s32.totalorder %v8784_v6, 1  ;;  %v11032_v1 = vmov 0  ;;  %v11035_v6 = vrot.slane %v8450_v0, 1  ;;  %5574 = vmatprep.mubr.msk.bf16.mxu0 %vm9018_vm10, %v8799_v52  ;;  %6029 = vmatpush3.bf16.msra.mxu1 %v6498_v27  ;;  %v6502_v49 = vld [vmem:[#allocation6 + $0x130] sm:$0xff]  }
 0x244   : > { %v9027_v18 = vpack.c.bf16 %v1393_v62, %v1394_v30  ;;  %vm9034_vm1 = vmpackc.low %vm3025_vm15, %vm3024_vm6  ;;  %v9041_v30 = vpack.c.bf16 %v8455_v57, %v8450_v0  ;;  %v11036_v24 = vrot.slane %v8445_v59, 1  ;;  %vm11037_vm4 = vcmp.lt.s32.totalorder %v10868_v7, 7 }
 0x245   : > { %v11033_v1 = vsel %vm9034_vm1, 4294967295, %v11032_v1  ;;  %v11039_v47 = vrot.slane %v8440_v16, 1  ;;  %vm11040_vm6 = vmmov %vm11037_vm4  ;;  %v11041_v40 = vmov 0  ;;  %v11044_v16 = vrot.slane %v8465_v37, 7 }
 0x246   : > { %11034 = vst [vmem:[#allocation55_spill] sm:$0xff] %v11033_v1  ;;  %v1811_v5 = vsel %vm11037_vm4, %v11036_v24, %v11035_v6  ;;  %v11038_v12 = vmov %v11036_v24  ;;  %vm9061_vm15 = vmpackc.low %vm3027_vm13, %vm3026_vm3  ;;  %v11045_v46 = vrot.slane %v8460_v53, 7  ;;  %vm11046_vm4 = vcmp.lt.s32.totalorder %v10868_v7, 1  ;;  %v6500_v6 = vld [vmem:[#allocation6 + $0x170] sm:$0xff]   ;;  %v6506_v1 = vld [vmem:[#allocation6 + $0x178] sm:$0xff]  }
 0x247   : > { %v1812_v44 = vsel %vm11040_vm6, %v11039_v47, %v11038_v12  ;;  %v11042_v40 = vsel %vm9061_vm15, 4294967295, %v11041_v40  ;;  %v11048_v17 = vrot.slane %v8455_v57, 7  ;;  %vm11049_vm2 = vmmov %vm11046_vm4  ;;  %vm3028_vm3 = vcmp.eq.s32.totalorder %v2970_v15, 1  ;;  %v6511_v12 = vld [vmem:[#allocation6 + $0x1a8] sm:$0xff]   ;;  %v11050_v47 = vld [vmem:[#allocation31_spill] sm:$0xff]  ;;  %6030 = vmatprep.subr.bf16.mxu1 %v6500_v6 }
 0x248   : > { %11043 = vst [vmem:[#allocation58_spill] sm:$0xff] %v11042_v40  ;;  %v9065_v59 = vpack.c.bf16 %v1811_v5, %v1812_v44  ;;  %v1391_v63 = vsel %vm11046_vm4, %v11045_v46, %v11044_v16  ;;  %v11047_v62 = vmov %v11045_v46  ;;  %vm3029_vm13 = vcmp.eq.s32.totalorder %v2973_v4, 1  ;;  %v11051_v44 = vld [vmem:[#allocation32_spill] sm:$0xff]  ;;  %vm11054_vm10 = vmmov %vm11040_vm6  ;;  %6141 = vmatpush3.bf16.msra.mxu0 %v6511_v12  ;;  %6031 = vmatpush3.bf16.msra.mxu1 %v6502_v49 }
 0x249   : > { %v1392_v28 = vsel %vm11049_vm2, %v11048_v17, %v11047_v62  ;;  %v9089_v9 = vpack.c.bf16 %v8465_v37, %v8460_v53  ;;  %v11052_v16 = vrot.slane %v8460_v53, 1  ;;  %v11053_v46 = vrot.slane %v8455_v57, 1  ;;  %vm11057_vm2 = vmmov %vm11040_vm6  ;;  %6032 = vmatprep.subr.bf16.mxu1 %v6506_v1 }
 0x24a   : > { %v9083_v5 = vpack.c.bf16 %v1391_v63, %v1392_v28  ;;  %v11056_v36 = vrot.slane %v8450_v0, 1  ;;  %v11058_v63 = vrot.slane %v8475_v56, 7  ;;  %v11059_v62 = vrot.slane %v8470_v42, 7  ;;  %v6512_v28 = vld [vmem:[#allocation6 + $0x1f0] sm:$0xff]  }
 0x24b   : > { %v1809_v11 = vsel %vm11054_vm10, %v11053_v46, %v11052_v16  ;;  %v11055_v15 = vmov %v11053_v46  ;;  %vm9111_vm10 = vmpackc.low %vm3029_vm13, %vm3028_vm3  ;;  %v11061_v57 = vmov 0  ;;  %v9129_v24 = vpack.c.bf16 %v8475_v56, %v8470_v42  ;;  %6142 = vmatprep.subr.bf16.mxu0 %v6512_v28 }
 0x24c   : > { %v1810_v4 = vsel %vm11057_vm2, %v11056_v36, %v11055_v15  ;;  %v1389_v17 = vsel %vm11046_vm4, %v11059_v62, %v11058_v63  ;;  %v11062_v57 = vsel %vm9111_vm10, 4294967295, %v11061_v57  ;;  %v11064_v46 = vmov %v11059_v62  ;;  %vm11066_vm2 = vmmov %vm11046_vm4  ;;  %v11067_v63 = vld [vmem:[#allocation65_spill] sm:$0xff]  ;;  %v11068_v62 = vld [vmem:[#allocation68_spill] sm:$0xff]  ;;  %6143 = vmatpush3.bf16.msra.mxu0 %v6513_v55 }
 0x24d   : > { %11063 = vst [vmem:[#allocation186_spill] sm:$0xff] %v11062_v57  ;;  %v9115_v0 = vpack.c.bf16 %v1809_v11, %v1810_v4  ;;  %v11065_v15 = vrot.slane %v8465_v37, 7  ;;  %v11069_v11 = vrot.slane %v8470_v42, 1  ;;  %v11070_v4 = vrot.slane %v8465_v37, 1  ;;  %vm11071_vm3 = vmmov %vm11040_vm6 }
 0x24e   : > { %vm11074_vm13 = vmmov %vm11071_vm3  ;;  %vm11076_vm6 = vcmp.eq.s32.totalorder %v10985_v14, 1  ;;  %v11080_v37 = vrot.slane %v8482_v45, 7  ;;  %v11110_v41 = vrot.slane %v8506_v48, 7  ;;  %v11116_v32 = vrot.slane %v8506_v48, 1 }
 0x24f   : > { %v1390_v36 = vsel %vm11066_vm2, %v11065_v15, %v11064_v46  ;;  %v1807_v57 = vsel %vm11071_vm3, %v11070_v4, %v11069_v11  ;;  %v11072_v27 = vmov %v11070_v4  ;;  %v11073_v46 = vrot.slane %v8460_v53, 1 }
 0x250   : > { %v9125_v16 = vpack.c.bf16 %v1389_v17, %v1390_v36  ;;  %vm11075_vm2 = vcmp.eq.s32.totalorder %v10984_v51, 1  ;;  %v11077_v17 = vld [vmem:[#allocation67_spill] sm:$0xff]  ;;  %v11078_v36 = vld [vmem:[#allocation70_spill] sm:$0xff]  ;;  %v11079_v11 = vrot.slane %v8487_v60, 7  ;;  %vm11081_vm3 = vcmp.lt.s32.totalorder %v10868_v7, 1 }
 0x251   : > { %v1808_v15 = vsel %vm11074_vm13, %v11073_v46, %v11072_v27  ;;  %vm5515_vm4 = vmpackc.low %vm11076_vm6, %vm11075_vm2  ;;  %vm2188_vm10 = vcmp.eq.s32.totalorder %v11077_v17, 1  ;;  %v11082_v6 = vmov %v11080_v37  ;;  %v11083_v51 = vrot.slane %v8475_v56, 7  ;;  %v11153_v17 = vld [vmem:[#allocation76_spill] sm:$0xff] }
 0x252   : > { %v9149_v40 = vpack.c.bf16 %v1807_v57, %v1808_v15  ;;  %v1387_v53 = vsel %vm11081_vm3, %v11080_v37, %v11079_v11  ;;  %vm11084_vm13 = vmmov %vm11081_vm3  ;;  %v9165_v4 = vpack.c.bf16 %v8487_v60, %v8482_v45  ;;  %v11085_v57 = vld [vmem:[#allocation40_spill] sm:$0xff]  ;;  %5517 = vmatmul.mubr.msk.bf16.gmra.mrb[12].mxu1 %vm5515_vm4, %v8744_v23  ;;  %v11086_v15 = vrot.slane %v8482_v45, 1 }
 0x253   : > { %v1388_v14 = vsel %vm11084_vm13, %v11083_v51, %v11082_v6  ;;  %v1787_v27 = vrot.slane %v11085_v57, 1  ;;  %v11087_v11 = vrot.slane %v8475_v56, 1  ;;  %vm11088_vm6 = vcmp.lt.s32.totalorder %v10868_v7, 7  ;;  %3890 = vmatprep.mubr.bf16.mxu1 %v8809_v3 }
 0x254   : > { %v9169_v46 = vpack.c.bf16 %v1387_v53, %v1388_v14  ;;  %v11090_v51 = vrot.slane %v8470_v42, 1  ;;  %vm11091_vm2 = vmmov %vm11088_vm6  ;;  %vm11092_vm4 = vcmp.eq.s32.totalorder %v11006_v2, 1  ;;  %vm11093_vm3 = vcmp.eq.s32.totalorder %v11007_v43, 1  ;;  %v11094_v53 = vld [vmem:[#allocation196_spill] sm:$0xff] }
 0x255   : > { %v1805_v37 = vsel %vm11088_vm6, %v11087_v11, %v11086_v15  ;;  %v11089_v6 = vmov %v11087_v11  ;;  %vm5575_vm13 = vmpackc.low %vm11093_vm3, %vm11092_vm4  ;;  %v1788_v14 = vrot.slane %v11094_v53, 1  ;;  %v11095_v56 = vrot.slane %v8497_v39, 7 }
 0x256   : > { %v1806_v12 = vsel %vm11091_vm2, %v11090_v51, %v11089_v6  ;;  %v11096_v42 = vrot.slane %v8492_v50, 7  ;;  %vm11097_vm6 = vcmp.lt.s32.totalorder %v10868_v7, 1  ;;  %v11099_v2 = vrot.slane %v8487_v60, 7  ;;  %v6507_v6 = vld [vmem:[#allocation6 + $0x138] sm:$0xff]   ;;  %5577 = vmatmul.mubr.msk.bf16.gmra.mrb[76].mxu0 %vm5575_vm13, %v8832_v33 }
 0x257   : > { %v9189_v15 = vpack.c.bf16 %v1805_v37, %v1806_v12  ;;  %vm11100_vm2 = vmmov %vm11097_vm6  ;;  %v6514_v51 = vld [vmem:[#allocation6 + $0x1f8] sm:$0xff]   ;;  %vm11101_vm4 = vcmp.eq.s32.totalorder %v11018_v54, 1  ;;  %vm11102_vm3 = vcmp.eq.s32.totalorder %v11019_v35, 1  ;;  %v9212_v12 = vpack.c.bf16 %v8497_v39, %v8492_v50  ;;  %6033 = vmatpush3.bf16.msra.mxu1 %v6507_v6 }
 0x258   : > { %v1385_v11 = vsel %vm11097_vm6, %v11096_v42, %v11095_v56  ;;  %v11098_v28 = vmov %v11096_v42  ;;  %vm5578_vm15 = vmpackc.low %vm11102_vm3, %vm11101_vm4  ;;  %v11103_v56 = vrot.slane %v8492_v50, 1  ;;  %v11104_v42 = vrot.slane %v8487_v60, 1  ;;  %v11122_v33 = vld [vmem:[#allocation198_spill] sm:$0xff]  ;;  %6144 = vmatprep.subr.bf16.mxu0 %v6514_v51 }
 0x259   : > { %v1386_v43 = vsel %vm11100_vm2, %v11099_v2, %v11098_v28  ;;  %vm11105_vm6 = vcmp.lt.s32.totalorder %v10868_v7, 7  ;;  %v11107_v35 = vrot.slane %v8482_v45, 1  ;;  %5580 = vmatprep.mubr.msk.bf16.mxu0 %vm5578_vm15, %v8858_v22  ;;  %vm11111_vm13 = vcmp.lt.s32.totalorder %v10868_v7, 1  ;;  %v11152_v7 = vld [vmem:[#allocation73_spill] sm:$0xff] }
 0x25a   : > { %v9208_v37 = vpack.c.bf16 %v1385_v11, %v1386_v43  ;;  %v1803_v49 = vsel %vm11105_vm6, %v11104_v42, %v11103_v56  ;;  %v11106_v54 = vmov %v11104_v42  ;;  %vm11108_vm2 = vmmov %vm11105_vm6  ;;  %v9226_v11 = vld [vmem:[#allocation6 + $0x200] sm:$0xff]   ;;  %v11109_v43 = vrot.slane %v11060_v19, 7 }
 0x25b   : > { %v1804_v28 = vsel %vm11108_vm2, %v11107_v35, %v11106_v54  ;;  %v11112_v60 = vmov %v11110_v41  ;;  %v11113_v45 = vrot.slane %v8497_v39, 7  ;;  %vm11114_vm4 = vmmov %vm11111_vm13  ;;  %v9245_v54 = vpack.c.bf16 %v11060_v19, %v8506_v48  ;;  %6277 = vmatprep.subr.bf16.mxu1 %v9226_v11 }
 0x25c   : > { %v9229_v2 = vpack.c.bf16 %v1803_v49, %v1804_v28  ;;  %v1383_v56 = vsel %vm11111_vm13, %v11110_v41, %v11109_v43  ;;  %v11115_v49 = vld [vmem:[#allocation197_spill] sm:$0xff]  ;;  %v11117_v3 = vrot.slane %v8497_v39, 1  ;;  %vm11118_vm15 = vmmov %vm11108_vm2  ;;  %v11120_v23 = vrot.slane %v8492_v50, 1 }
 0x25d   : > { %v1384_v42 = vsel %vm11114_vm4, %v11113_v45, %v11112_v60  ;;  %v1789_v35 = vrot.slane %v11115_v49, 1  ;;  %vm11121_vm3 = vmmov %vm11108_vm2  ;;  %v6515_v45 = vld [vmem:[#allocation6 + $0x1b8] sm:$0xff]   ;;  %v11123_v34 = vrot.slane %v11094_v53, 7  ;;  %v11124_v13 = vrot.slane %v11085_v57, 7 }
 0x25e   : > { %v9248_v28 = vpack.c.bf16 %v1383_v56, %v1384_v42  ;;  %v1801_v41 = vsel %vm11118_vm15, %v11117_v3, %v11116_v32  ;;  %v11119_v43 = vmov %v11117_v3  ;;  %v1790_v56 = vrot.slane %v11122_v33, 1  ;;  %vm11125_vm6 = vmmov %vm11114_vm4  ;;  %6145 = vmatpush3.bf16.msra.mxu0 %v6515_v45  ;;  %v11151_v45 = vld [vmem:[#allocation74_spill] sm:$0xff] }
 0x25f   : > { %v1802_v60 = vsel %vm11121_vm3, %v11120_v23, %v11119_v43  ;;  %v1381_v3 = vsel %vm11125_vm6, %v11124_v13, %v11123_v34  ;;  %v11126_v39 = vmov %v11124_v13  ;;  %v11127_v50 = vrot.slane %v11060_v19, 7  ;;  %vm11128_vm2 = vmmov %vm11114_vm4 }
 0x260   : > { %v9263_v42 = vpack.c.bf16 %v1801_v41, %v1802_v60  ;;  %v9281_v32 = vpack.c.bf16 %v11094_v53, %v11085_v57  ;;  %v11129_v1 = vrot.slane %v11060_v19, 1  ;;  %vm11130_vm13 = vmmov %vm11121_vm3  ;;  %v11132_v41 = vrot.slane %v8506_v48, 1 }
 0x261   : > { %v1382_v23 = vsel %vm11128_vm2, %v11127_v50, %v11126_v39  ;;  %vm11133_vm4 = vmmov %vm11121_vm3  ;;  %vm11134_vm15 = vcmp.eq.s32.totalorder %v11050_v47, 1  ;;  %vm11135_vm3 = vcmp.eq.s32.totalorder %v11051_v44, 1  ;;  %v11136_v6 = vrot.slane %v11122_v33, 7 }
 0x262   : > { %v9277_v55 = vpack.c.bf16 %v1381_v3, %v1382_v23  ;;  %v1799_v13 = vsel %vm11130_vm13, %v11129_v1, %v1787_v27  ;;  %v11131_v34 = vmov %v11129_v1  ;;  %vm5518_vm6 = vmpackc.low %vm11135_vm3, %vm11134_vm15  ;;  %v11137_v51 = vrot.slane %v11115_v49, 7 }
 0x263   : > { %v1800_v43 = vsel %vm11133_vm4, %v11132_v41, %v11131_v34  ;;  %v11139_v60 = vrot.slane %v11094_v53, 7  ;;  %vm11140_vm13 = vmmov %vm11128_vm2  ;;  %v9314_v47 = vpack.c.bf16 %v11122_v33, %v11115_v49  ;;  %5520 = vmatmul.mubr.msk.bf16.gmra.mrb[16].mxu1 %vm5518_vm6, %v8799_v52  ;;  %v1797_v39 = vsel %vm11133_vm4, %v1788_v14, %v1789_v35  ;;  %v11144_v53 = vld [vmem:[#allocation181_spill] sm:$0xff]  ;;  %v11159_v41 = vld [vmem:[#allocation86_spill] sm:$0xff] }
 0x264   : > { %v9298_v57 = vpack.c.bf16 %v1799_v13, %v1800_v43  ;;  %v1379_v19 = vsel %vm11128_vm2, %v11137_v51, %v11136_v6  ;;  %v11138_v48 = vmov %v11137_v51  ;;  %vm11141_vm15 = vmmov %vm11133_vm4  ;;  %vm11142_vm3 = vcmp.eq.s32.totalorder %v11067_v63, 1  ;;  %3898 = vmatprep.mubr.bf16.mxu1 %v8872_v25  ;;  %v11157_v13 = vld [vmem:[#allocation82_spill] sm:$0xff]  ;;  %v11158_v34 = vld [vmem:[#allocation81_spill] sm:$0xff] }
 0x265   : > { %v1380_v3 = vsel %vm11140_vm13, %v11139_v60, %v11138_v48  ;;  %v1798_v50 = vsel %vm11141_vm15, %v1787_v27, %v1788_v14  ;;  %vm11143_vm2 = vcmp.eq.s32.totalorder %v11068_v62, 1  ;;  %v11145_v49 = vrot.slane %v11144_v53, 1  ;;  %vm11146_vm6 = vmmov %vm11133_vm4  ;;  %v11148_v62 = vld [vmem:[#allocation33_spill] sm:$0xff]  ;;  %v11149_v27 = vld [vmem:[#allocation34_spill] sm:$0xff] }
 0x266   : > { %v9317_v44 = vpack.c.bf16 %v1379_v19, %v1380_v3  ;;  %vm5581_vm13 = vmpackc.low %vm11143_vm2, %vm11142_vm3  ;;  %v9328_v33 = vpack.c.bf16 %v1797_v39, %v1798_v50  ;;  %v1796_v1 = vsel %vm11133_vm4, %v1789_v35, %v1790_v56  ;;  %vm11147_vm15 = vcmp.eq.s32.totalorder %v11078_v36, 1  ;;  %v11150_v14 = vld [vmem:[#allocation71_spill] sm:$0xff]  ;;  %v11155_v35 = vld [vmem:[#allocation36_spill] sm:$0xff] }
 0x267   : > { %v1795_v23 = vsel %vm11146_vm6, %v1790_v56, %v11145_v49  ;;  %vm5584_vm1 = vmpackc.low %vm11147_vm15, %vm2188_vm10  ;;  %5583 = vmatmul.mubr.msk.bf16.gmra.mrb[80].mxu0 %vm5581_vm13, %v8894_v38  ;;  %vm1547_vm3 = vcmp.eq.s32.totalorder %v11148_v62, 1  ;;  %vm1548_vm2 = vcmp.eq.s32.totalorder %v11149_v27, 1  ;;  %vm1964_vm6 = vcmp.eq.s32.totalorder %v11150_v14, 1  ;;  %v11154_v36 = vld [vmem:[#allocation35_spill] sm:$0xff]  ;;  %v11160_v43 = vld [vmem:[#allocation37_spill] sm:$0xff] }
 0x268   : > { %v9341_v63 = vpack.c.bf16 %v1795_v23, %v1796_v1  ;;  %5586 = vmatprep.mubr.msk.bf16.mxu0 %vm5584_vm1, %v8913_v21  ;;  %vm1965_vm9 = vcmp.eq.s32.totalorder %v11151_v45, 1  ;;  %vm5521_vm4 = vmpackc.low %vm1548_vm2, %vm1547_vm3  ;;  %vm2190_vm0 = vcmp.eq.s32.totalorder %v11152_v7, 1  ;;  %vm2191_vm8 = vcmp.eq.s32.totalorder %v11153_v17, 1  ;;  %v11156_v56 = vld [vmem:[#allocation79_spill] sm:$0xff]  ;;  %v11161_v6 = vld [vmem:[#allocation38_spill] sm:$0xff] }
 0x269   : > { %vm5587_vm10 = vmpackc.low %vm1965_vm9, %vm1964_vm6  ;;  %vm1549_vm1 = vcmp.eq.s32.totalorder %v11154_v36, 1  ;;  %vm1550_vm15 = vcmp.eq.s32.totalorder %v11155_v35, 1  ;;  %vm1966_vm3 = vcmp.eq.s32.totalorder %v11156_v56, 1  ;;  %vm1967_vm2 = vcmp.eq.s32.totalorder %v11157_v13, 1  ;;  %v11162_v51 = vld [vmem:[#allocation87_spill] sm:$0xff]  ;;  %v11163_v19 = vld [vmem:[#allocation92_spill] sm:$0xff] }
 0x26a   : > { %vm5590_vm13 = vmpackc.low %vm2191_vm8, %vm2190_vm0  ;;  %vm2192_vm12 = vcmp.eq.s32.totalorder %v11158_v34, 1  ;;  %vm2193_vm9 = vcmp.eq.s32.totalorder %v11159_v41, 1  ;;  %vm1551_vm6 = vcmp.eq.s32.totalorder %v11160_v43, 1  ;;  %v11164_v48 = vld [vmem:[#allocation91_spill] sm:$0xff]  ;;  %v11165_v60 = vld [vmem:[#allocation94_spill] sm:$0xff] }
 0x26b   : > { %5523 = vmatmul.mubr.msk.bf16.gmra.mrb[20].mxu1 %vm5521_vm4, %v8858_v22  ;;  %vm5524_vm14 = vmpackc.low %vm1550_vm15, %vm1549_vm1  ;;  %vm1552_vm4 = vcmp.eq.s32.totalorder %v11161_v6, 1  ;;  %vm2194_vm15 = vcmp.eq.s32.totalorder %v11164_v48, 1  ;;  %v11166_v3 = vld [vmem:[#allocation41_spill] sm:$0xff]  ;;  %v11167_v39 = vld [vmem:[#allocation42_spill] sm:$0xff] }
 0x26c   : > { %3906 = vmatprep.mubr.bf16.mxu1 %v8919_v61  ;;  %vm5593_vm8 = vmpackc.low %vm1967_vm2, %vm1966_vm3  ;;  %vm1554_vm2 = vcmp.eq.s32.totalorder %v11166_v3, 1  ;;  %v11168_v50 = vld [vmem:[#allocation98_spill] sm:$0xff]  ;;  %v11169_v49 = vld [vmem:[#allocation101_spill] sm:$0xff] }
 0x26d   : > { %vm5596_vm0 = vmpackc.low %vm2193_vm9, %vm2192_vm12  ;;  %vm1553_vm9 = vcmp.eq.s32.totalorder %v11167_v39, 1  ;;  %v11170_v23 = vld [vmem:[#allocation100_spill] sm:$0xff]  ;;  %v11171_v1 = vld [vmem:[#allocation106_spill] sm:$0xff] }
 0x26e   : > { %vm5527_vm1 = vmpackc.low %vm1552_vm4, %vm1551_vm6  ;;  %vm2196_vm4 = vcmp.eq.s32.totalorder %v11170_v23, 1  ;;  %v11172_v62 = vld [vmem:[#allocation45_spill] sm:$0xff]  ;;  %v11173_v27 = vld [vmem:[#allocation48_spill] sm:$0xff] }
 0x26f   : > { %5589 = vmatmul.mubr.msk.bf16.gmra.mrb[84].mxu0 %vm5587_vm10, %v8962_v29  ;;  %vm1968_vm10 = vcmp.eq.s32.totalorder %v11162_v51, 1  ;;  %vm5530_vm6 = vmpackc.low %vm1554_vm2, %vm1553_vm9  ;;  %v11174_v14 = vld [vmem:[#allocation16_spill] sm:$0xff]  ;;  %v11175_v45 = vld [vmem:[#allocation111_spill] sm:$0xff] }
 0x270   : > { %5592 = vmatprep.mubr.msk.bf16.mxu0 %vm5590_vm13, %v8964_v8  ;;  %vm1969_vm13 = vcmp.eq.s32.totalorder %v11163_v19, 1  ;;  %v11176_v7 = vld [vmem:[#allocation110_spill] sm:$0xff]  ;;  %v11177_v17 = vld [vmem:[#allocation112_spill] sm:$0xff]  ;;  %v11178_v36 = vld [vmem:[#allocation51_spill] sm:$0xff] }
 0x271   : > { %vm5599_vm12 = vmpackc.low %vm1969_vm13, %vm1968_vm10  ;;  %vm2197_vm10 = vcmp.eq.s32.totalorder %v11171_v1, 1  ;;  %vm2198_vm9 = vcmp.eq.s32.totalorder %v11176_v7, 1  ;;  %v11179_v35 = vld [vmem:[#allocation54_spill] sm:$0xff]  ;;  %v11180_v56 = vld [vmem:[#allocation115_spill] sm:$0xff] }
 0x272   : > { %v11181_v13 = vld [vmem:[#allocation20_spill] sm:$0xff]  ;;  %v11183_v41 = vld [vmem:[#allocation119_spill] sm:$0xff]  ;;  %v11184_v43 = vld [vmem:[#allocation57_spill] sm:$0xff] }
 0x273   : > { %5526 = vmatmul.mubr.msk.bf16.gmra.mrb[24].mxu1 %vm5524_vm14, %v8913_v21  ;;  %vm2195_vm14 = vcmp.eq.s32.totalorder %v11165_v60, 1  ;;  %v11182_v34 = vld [vmem:[#allocation24_spill] sm:$0xff]  ;;  %v11186_v51 = vld [vmem:[#allocation21_spill] sm:$0xff]  ;;  %v11189_v60 = vld [vmem:[#allocation127_spill] sm:$0xff] }
 0x274   : > { %3914 = vmatprep.mubr.bf16.mxu1 %v8977_v20  ;;  %vm5602_vm3 = vmpackc.low %vm2195_vm14, %vm2194_vm15  ;;  %vm1555_vm15 = vcmp.eq.s32.totalorder %v11172_v62, 1  ;;  %vm1556_vm14 = vcmp.eq.s32.totalorder %v11173_v27, 1  ;;  %v11185_v6 = vld [vmem:[#allocation60_spill] sm:$0xff]  ;;  %v11187_v19 = vld [vmem:[#allocation125_spill] sm:$0xff] }
 0x275   : > { %vm5533_vm2 = vmpackc.low %vm1556_vm14, %vm1555_vm15  ;;  %vm2200_vm14 = vcmp.eq.s32.totalorder %v11182_v34, 1  ;;  %v11188_v48 = vld [vmem:[#allocation124_spill] sm:$0xff]  ;;  %v11190_v3 = vld [vmem:[#allocation63_spill] sm:$0xff] }
 0x276   : > { %v11191_v39 = vld [vmem:[#allocation66_spill] sm:$0xff]  ;;  %v11194_v23 = vld [vmem:[#allocation132_spill] sm:$0xff]  ;;  %v11196_v62 = vld [vmem:[#allocation69_spill] sm:$0xff] }
 0x277   : > { %5595 = vmatmul.mubr.msk.bf16.gmra.mrb[88].mxu0 %vm5593_vm8, %v9025_v10  ;;  %vm1970_vm8 = vcmp.eq.s32.totalorder %v11168_v50, 1  ;;  %v11192_v50 = vld [vmem:[#allocation130_spill] sm:$0xff]  ;;  %v11195_v1 = vld [vmem:[#allocation136_spill] sm:$0xff]  ;;  %v11200_v7 = vld [vmem:[#allocation141_spill] sm:$0xff] }
 0x278   : > { %5598 = vmatprep.mubr.msk.bf16.mxu0 %vm5596_vm0, %v9027_v18  ;;  %vm1971_vm0 = vcmp.eq.s32.totalorder %v11169_v49, 1  ;;  %v11193_v49 = vld [vmem:[#allocation133_spill] sm:$0xff]  ;;  %v11197_v27 = vld [vmem:[#allocation72_spill] sm:$0xff] }
 0x279   : > { %vm5605_vm13 = vmpackc.low %vm1971_vm0, %vm1970_vm8  ;;  %vm2199_vm8 = vcmp.eq.s32.totalorder %v11177_v17, 1  ;;  %v11201_v17 = vld [vmem:[#allocation143_spill] sm:$0xff]  ;;  %v11206_v34 = vld [vmem:[#allocation148_spill] sm:$0xff] }
 0x27b   : > { %5529 = vmatmul.mubr.msk.bf16.gmra.mrb[28].mxu1 %vm5527_vm1, %v8964_v8  ;;  %vm5608_vm1 = vmpackc.low %vm2197_vm10, %vm2196_vm4  ;;  %vm1557_vm4 = vcmp.eq.s32.totalorder %v11178_v36, 1  ;;  %vm1558_vm10 = vcmp.eq.s32.totalorder %v11179_v35, 1  ;;  %v11202_v36 = vld [vmem:[#allocation75_spill] sm:$0xff]  ;;  %v11203_v35 = vld [vmem:[#allocation80_spill] sm:$0xff] }
 0x27c   : > { %3922 = vmatprep.mubr.bf16.mxu1 %v9041_v30  ;;  %vm5536_vm15 = vmpackc.low %vm1558_vm10, %vm1557_vm4  ;;  %vm2202_vm10 = vcmp.eq.s32.totalorder %v11188_v48, 1  ;;  %v11212_v48 = vld [vmem:[#allocation99_spill] sm:$0xff] }
 0x27f   : > { %5601 = vmatmul.mubr.msk.bf16.gmra.mrb[92].mxu0 %vm5599_vm12, %v9065_v59  ;;  %vm1972_vm12 = vcmp.eq.s32.totalorder %v11174_v14, 1  ;;  %v11198_v14 = vld [vmem:[#allocation137_spill] sm:$0xff] }
 0x280   : > { %5604 = vmatprep.mubr.msk.bf16.mxu0 %vm5602_vm3, %v9083_v5  ;;  %vm1973_vm3 = vcmp.eq.s32.totalorder %v11175_v45, 1  ;;  %v11199_v45 = vld [vmem:[#allocation142_spill] sm:$0xff] }
 0x281   : > { %vm5611_vm0 = vmpackc.low %vm1973_vm3, %vm1972_vm12  ;;  %vm2201_vm12 = vcmp.eq.s32.totalorder %v11183_v41, 1  ;;  %v11207_v41 = vld [vmem:[#allocation152_spill] sm:$0xff] }
 0x283   : > { %5532 = vmatmul.mubr.msk.bf16.gmra.mrb[32].mxu1 %vm5530_vm6, %v9027_v18  ;;  %vm5614_vm6 = vmpackc.low %vm2199_vm8, %vm2198_vm9  ;;  %vm1559_vm9 = vcmp.eq.s32.totalorder %v11184_v43, 1  ;;  %vm1560_vm8 = vcmp.eq.s32.totalorder %v11185_v6, 1  ;;  %v11208_v43 = vld [vmem:[#allocation25_spill] sm:$0xff] }
 0x284   : > { %3930 = vmatprep.mubr.bf16.mxu1 %v9089_v9  ;;  %vm5539_vm4 = vmpackc.low %vm1560_vm8, %vm1559_vm9  ;;  %vm2204_vm8 = vcmp.eq.s32.totalorder %v11194_v23, 1  ;;  %v11209_v6 = vld [vmem:[#allocation85_spill] sm:$0xff]  ;;  %v6517_v23 = vld [vmem:[#allocation6 + $0x208] sm:$0xff]  }
 0x287   : > { %5607 = vmatmul.mubr.msk.bf16.gmra.mrb[96].mxu0 %vm5605_vm13, %v9115_v0  ;;  %vm1974_vm13 = vcmp.eq.s32.totalorder %v11180_v56, 1  ;;  %v11204_v56 = vld [vmem:[#allocation146_spill] sm:$0xff] }
 0x288   : > { %5610 = vmatprep.mubr.msk.bf16.mxu0 %vm5608_vm1, %v9125_v16  ;;  %vm1975_vm1 = vcmp.eq.s32.totalorder %v11181_v13, 1  ;;  %v11205_v13 = vld [vmem:[#allocation149_spill] sm:$0xff] }
 0x289   : > { %vm5617_vm3 = vmpackc.low %vm1975_vm1, %vm1974_vm13  ;;  %vm2203_vm13 = vcmp.eq.s32.totalorder %v11189_v60, 1  ;;  %v11213_v60 = vld [vmem:[#allocation157_spill] sm:$0xff] }
 0x28b   : > { %5535 = vmatmul.mubr.msk.bf16.gmra.mrb[36].mxu1 %vm5533_vm2, %v9083_v5  ;;  %vm5620_vm2 = vmpackc.low %vm2201_vm12, %vm2200_vm14  ;;  %vm1561_vm14 = vcmp.eq.s32.totalorder %v11190_v3, 1  ;;  %vm1562_vm12 = vcmp.eq.s32.totalorder %v11191_v39, 1  ;;  %v11214_v3 = vld [vmem:[#allocation153_spill] sm:$0xff] }
 0x28c   : > { %3938 = vmatprep.mubr.bf16.mxu1 %v9129_v24  ;;  %vm5542_vm9 = vmpackc.low %vm1562_vm12, %vm1561_vm14  ;;  %vm2206_vm12 = vcmp.eq.s32.totalorder %v11200_v7, 1  ;;  %v11215_v39 = vld [vmem:[#allocation105_spill] sm:$0xff]  ;;  %v11222_v7 = vld [vmem:[#allocation18_spill] sm:$0xff] }
 0x28f   : > { %5613 = vmatmul.mubr.msk.bf16.gmra.mrb[100].mxu0 %vm5611_vm0, %v9149_v40  ;;  %vm1976_vm0 = vcmp.eq.s32.totalorder %v11186_v51, 1  ;;  %v11210_v51 = vld [vmem:[#allocation88_spill] sm:$0xff] }
 0x290   : > { %5616 = vmatprep.mubr.msk.bf16.mxu0 %vm5614_vm6, %v9169_v46  ;;  %vm1977_vm6 = vcmp.eq.s32.totalorder %v11187_v19, 1  ;;  %v11211_v19 = vld [vmem:[#allocation93_spill] sm:$0xff] }
 0x291   : > { %vm5623_vm1 = vmpackc.low %vm1977_vm6, %vm1976_vm0  ;;  %vm2205_vm0 = vcmp.eq.s32.totalorder %v11195_v1, 1  ;;  %v11218_v1 = vld [vmem:[#allocation158_spill] sm:$0xff] }
 0x293   : > { %5538 = vmatmul.mubr.msk.bf16.gmra.mrb[40].mxu1 %vm5536_vm15, %v9125_v16  ;;  %vm5626_vm15 = vmpackc.low %vm2203_vm13, %vm2202_vm10  ;;  %vm1563_vm10 = vcmp.eq.s32.totalorder %v11196_v62, 1  ;;  %vm1564_vm13 = vcmp.eq.s32.totalorder %v11197_v27, 1  ;;  %v11219_v62 = vld [vmem:[#allocation47_spill] sm:$0xff]  ;;  %v11220_v27 = vld [vmem:[#allocation52_spill] sm:$0xff] }
 0x294   : > { %3946 = vmatprep.mubr.bf16.mxu1 %v9165_v4  ;;  %vm5545_vm14 = vmpackc.low %vm1564_vm13, %vm1563_vm10  ;;  %vm2208_vm13 = vcmp.eq.s32.totalorder %v11206_v34, 1  ;;  %v6520_v34 = vld [vmem:[#allocation6 + $0x220] sm:$0xff]  }
 0x297   : > { %5619 = vmatmul.mubr.msk.bf16.gmra.mrb[104].mxu0 %vm5617_vm3, %v9189_v15  ;;  %vm1978_vm3 = vcmp.eq.s32.totalorder %v11192_v50, 1  ;;  %v11216_v50 = vld [vmem:[#allocation107_spill] sm:$0xff] }
 0x298   : > { %5622 = vmatprep.mubr.msk.bf16.mxu0 %vm5620_vm2, %v9208_v37  ;;  %vm1979_vm2 = vcmp.eq.s32.totalorder %v11193_v49, 1  ;;  %v11217_v49 = vld [vmem:[#allocation162_spill] sm:$0xff] }
 0x299   : > { %vm5629_vm6 = vmpackc.low %vm1979_vm2, %vm1978_vm3  ;;  %vm2207_vm3 = vcmp.eq.s32.totalorder %v11201_v17, 1  ;;  %v11223_v17 = vld [vmem:[#allocation116_spill] sm:$0xff] }
 0x29b   : > { %5541 = vmatmul.mubr.msk.bf16.gmra.mrb[44].mxu1 %vm5539_vm4, %v9169_v46  ;;  %vm5632_vm4 = vmpackc.low %vm2205_vm0, %vm2204_vm8  ;;  %vm1565_vm8 = vcmp.eq.s32.totalorder %v11202_v36, 1  ;;  %vm1566_vm0 = vcmp.eq.s32.totalorder %v11203_v35, 1  ;;  %v11224_v36 = vld [vmem:[#allocation165_spill] sm:$0xff]  ;;  %v6519_v35 = vld [vmem:[#allocation6 + $0x218] sm:$0xff]  }
 0x29c   : > { %3954 = vmatprep.mubr.bf16.mxu1 %v9212_v12  ;;  %vm5548_vm10 = vmpackc.low %vm1566_vm0, %vm1565_vm8  ;;  %vm1985_vm8 = vcmp.eq.s32.totalorder %v11213_v60, 1  ;;  %v6522_v60 = vld [vmem:[#allocation6 + $0x230] sm:$0xff]  }
 0x29f   : > { %5625 = vmatmul.mubr.msk.bf16.gmra.mrb[108].mxu0 %vm5623_vm1, %v9229_v2  ;;  %vm1980_vm1 = vcmp.eq.s32.totalorder %v11198_v14, 1  ;;  %v6518_v14 = vld [vmem:[#allocation6 + $0x210] sm:$0xff]  }
 0x2a0   : > { %5628 = vmatprep.mubr.msk.bf16.mxu0 %vm5626_vm15, %v9248_v28  ;;  %vm1981_vm15 = vcmp.eq.s32.totalorder %v11199_v45, 1  ;;  %v11221_v45 = vld [vmem:[#allocation191_spill] sm:$0xff] }
 0x2a1   : > { %vm5635_vm2 = vmpackc.low %vm1981_vm15, %vm1980_vm1  ;;  %vm2209_vm1 = vcmp.eq.s32.totalorder %v11207_v41, 1  ;;  %v11228_v41 = vld [vmem:[#allocation113_spill] sm:$0xff] }
 0x2a3   : > { %5544 = vmatmul.mubr.msk.bf16.gmra.mrb[48].mxu1 %vm5542_vm9, %v9208_v37  ;;  %vm5638_vm9 = vmpackc.low %vm2207_vm3, %vm2206_vm12  ;;  %vm1567_vm12 = vcmp.eq.s32.totalorder %v11209_v6, 1  ;;  %vm1568_vm3 = vcmp.eq.s32.totalorder %v11210_v51, 1  ;;  %v11229_v6 = vld [vmem:[#allocation118_spill] sm:$0xff]  ;;  %v11230_v51 = vld [vmem:[#allocation120_spill] sm:$0xff] }
 0x2a4   : > { %3962 = vmatprep.mubr.bf16.mxu1 %v9245_v54  ;;  %vm5551_vm0 = vmpackc.low %vm1568_vm3, %vm1567_vm12  ;;  %vm2658_vm12 = vcmp.eq.s32.totalorder %v11218_v1, 1  ;;  %v11238_v1 = vld [vmem:[#allocation172_spill] sm:$0xff] }
 0x2a7   : > { %5631 = vmatmul.mubr.msk.bf16.gmra.mrb[112].mxu0 %vm5629_vm6, %v9263_v42  ;;  %vm1982_vm6 = vcmp.eq.s32.totalorder %v11204_v56, 1  ;;  %v11225_v56 = vld [vmem:[#allocation163_spill] sm:$0xff] }
 0x2a8   : > { %5634 = vmatprep.mubr.msk.bf16.mxu0 %vm5632_vm4, %v9277_v55  ;;  %vm1983_vm4 = vcmp.eq.s32.totalorder %v11205_v13, 1  ;;  %v11227_v13 = vld [vmem:[#allocation189_spill] sm:$0xff] }
 0x2a9   : > { %vm5641_vm15 = vmpackc.low %vm1983_vm4, %vm1982_vm6  ;;  %vm1984_vm6 = vcmp.eq.s32.totalorder %v11214_v3, 1  ;;  %v11233_v3 = vld [vmem:[#allocation126_spill] sm:$0xff] }
 0x2aa   : > { %vm5647_vm4 = vmpackc.low %vm1985_vm8, %vm1984_vm6  ;;  %vm2661_vm8 = vcmp.eq.s32.totalorder %v11224_v36, 1  ;;  %v11255_v36 = vld [vmem:[#allocation188_spill] sm:$0xff] }
 0x2ab   : > { %5547 = vmatmul.mubr.msk.bf16.gmra.mrb[52].mxu1 %vm5545_vm14, %v9248_v28  ;;  %vm5644_vm14 = vmpackc.low %vm2209_vm1, %vm2208_vm13  ;;  %vm2436_vm13 = vcmp.eq.s32.totalorder %v11215_v39, 1  ;;  %vm2437_vm1 = vcmp.eq.s32.totalorder %v11216_v50, 1  ;;  %v11234_v39 = vld [vmem:[#allocation131_spill] sm:$0xff] }
 0x2ac   : > { %3970 = vmatprep.mubr.bf16.mxu1 %v9281_v32  ;;  %v11235_v50 = vld [vmem:[#allocation171_spill] sm:$0xff] }
 0x2af   : > { %5637 = vmatmul.mubr.msk.bf16.gmra.mrb[116].mxu0 %vm5635_vm2, %v9298_v57  ;;  %vm2434_vm2 = vcmp.eq.s32.totalorder %v11211_v19, 1  ;;  %v11231_v19 = vld [vmem:[#allocation168_spill] sm:$0xff] }
 0x2b0   : > { %5640 = vmatprep.mubr.msk.bf16.mxu0 %vm5638_vm9, %v9317_v44  ;;  %vm2435_vm9 = vcmp.eq.s32.totalorder %v11212_v48, 1  ;;  %v6521_v48 = vld [vmem:[#allocation6 + $0x228] sm:$0xff]  }
 0x2b3   : > { %5550 = vmatmul.mubr.msk.bf16.gmra.mrb[56].mxu1 %vm5548_vm10, %v9277_v55  ;;  %vm5650_vm10 = vmpackc.low %vm2435_vm9, %vm2434_vm2  ;;  %vm2438_vm2 = vcmp.eq.s32.totalorder %v11222_v7, 1  ;;  %vm2439_vm9 = vcmp.eq.s32.totalorder %v11223_v17, 1  ;;  %v11248_v7 = vld [vmem:[#allocation160_spill] sm:$0xff] }
 0x2b4   : > { %3978 = vmatprep.mubr.bf16.mxu1 %v9314_v47  ;;  %v11252_v17 = vld [vmem:[#allocation164_spill] sm:$0xff] }
 0x2b7   : > { %5643 = vmatmul.mubr.msk.bf16.gmra.mrb[120].mxu0 %vm5641_vm15, %v9328_v33  ;;  %vm2659_vm15 = vcmp.eq.s32.totalorder %v11217_v49, 1  ;;  %v6523_v49 = vld [vmem:[#allocation6 + $0x238] sm:$0xff]  }
 0x2b8   : > { %5646 = vmatprep.mubr.msk.bf16.mxu0 %vm5644_vm14, %v11208_v43  ;;  %vm5653_vm14 = vmpackc.low %vm2437_vm1, %vm2436_vm13  ;;  %vm2441_vm13 = vcmp.eq.s32.totalorder %v11230_v51, 1  ;;  %vm2663_vm1 = vcmp.eq.s32.totalorder %v11231_v19, 1 }
 0x2b9   : > { %vm5698_vm3 = vmpackc.low %vm2659_vm15, %vm2658_vm12 }
 0x2bb   : > { %5553 = vmatmul.mubr.msk.bf16.gmra.mrb[60].mxu1 %vm5551_vm0, %v9317_v44  ;;  %vm5656_vm0 = vmpackc.low %vm2439_vm9, %vm2438_vm2  ;;  %vm2443_vm2 = vcmp.eq.s32.totalorder %v11234_v39, 1  ;;  %vm2665_vm9 = vcmp.eq.s32.totalorder %v11235_v50, 1 }
 0x2bc   : > { %5652 = vmatprep.mubr.msk.bf16.mxu1 %vm5650_vm10, %v8734_v31  ;;  %vm2660_vm10 = vcmp.eq.s32.totalorder %v11225_v56, 1  ;;  %v11258_v56 = vld [vmem:[#allocation199_spill] sm:$0xff] }
 0x2bd   : > { %vm5701_vm6 = vmpackc.low %vm2661_vm8, %vm2660_vm10 }
 0x2bf   : > { %5649 = vmatmul.mubr.msk.bf16.gmra.mrb[124].mxu0 %vm5647_vm4, %v9341_v63  ;;  %vm2440_vm4 = vcmp.eq.s32.totalorder %v11229_v6, 1 }
 0x2c0   : > { %4341 = vmatprep.mubr.bf16.mxu0 %v8697_v26  ;;  %vm5659_vm15 = vmpackc.low %vm2441_vm13, %vm2440_vm4  ;;  %vm2666_vm4 = vcmp.eq.s32.totalorder %v11238_v1, 1 }
 0x2c3   : > { %4181 = vmatmul.mubr.bf16.vlgmr.msra.gmra.mrb[64].mxu1 %v11219_v62  ;;  %v11264_v62 = vld [vmem:[#allocation174_spill] sm:$0xff] }
 0x2c4   : > { %6278 = vmatpush3.bf16.msra.mxu1 %v9226_v11  ;;  %5655 = vmatprep.mubr.msk.bf16.mxu1 %vm5653_vm14, %v8797_v58  ;;  %v11226_v11 = vld [vmem:[#allocation183_spill] sm:$0xff] }
 0x2c5   : > { %6279 = vmatprep.subr.bf16.mxu1 %v6517_v23 }
 0x2c7   : > { %5700 = vmatmul.mubr.msk.bf16.vlgmr.msra.gmra.mrb[128].mxu0 %vm5698_vm3, %v11220_v27  ;;  %vm2442_vm3 = vcmp.eq.s32.totalorder %v11233_v3, 1  ;;  %v11241_v27 = vld [vmem:[#allocation177_spill] sm:$0xff] }
 0x2c8   : > { %4349 = vmatprep.mubr.bf16.mxu0 %v11221_v45  ;;  %6280 = vmatpush3.bf16.msra.mxu1 %v6517_v23  ;;  %vm5662_vm8 = vmpackc.low %vm2443_vm2, %vm2442_vm3  ;;  %v11236_v23 = vld [vmem:[#allocation169_spill] sm:$0xff] }
 0x2c9   : > { %6281 = vmatprep.subr.bf16.mxu1 %v6518_v14 }
 0x2cb   : > { %4189 = vmatmul.mubr.bf16.gmra.mrb[68].mxu1 %v8697_v26  ;;  %v11232_v26 = vld [vmem:[#allocation166_spill] sm:$0xff] }
 0x2cc   : > { %5658 = vmatprep.mubr.msk.bf16.mxu1 %vm5656_vm0, %v11226_v11  ;;  %6282 = vmatpush3.bf16.msra.mxu1 %v6518_v14  ;;  %vm2662_vm14 = vcmp.eq.s32.totalorder %v11232_v26, 1  ;;  %vm2664_vm0 = vcmp.eq.s32.totalorder %v11236_v23, 1  ;;  %v11263_v23 = vld [vmem:[#allocation43_spill] sm:$0xff] }
 0x2cd   : > { %6283 = vmatprep.subr.bf16.mxu1 %v6519_v35  ;;  %vm5704_vm12 = vmpackc.low %vm2663_vm1, %vm2662_vm14 }
 0x2ce   : > { %vm5707_vm10 = vmpackc.low %vm2665_vm9, %vm2664_vm0 }
 0x2cf   : > { %5703 = vmatmul.mubr.msk.bf16.gmra.mrb[132].mxu0 %vm5701_vm6, %v11227_v13 }
 0x2d0   : > { %4357 = vmatprep.mubr.bf16.mxu0 %v11228_v41  ;;  %6284 = vmatpush3.bf16.msra.mxu1 %v6519_v35 }
 0x2d1   : > { %6285 = vmatprep.subr.bf16.mxu1 %v6520_v34 }
 0x2d3   : > { %4197 = vmatmul.mubr.bf16.gmra.mrb[72].mxu1 %v11221_v45 }
 0x2d4   : > { %5661 = vmatprep.mubr.msk.bf16.mxu1 %vm5659_vm15, %v8894_v38  ;;  %6286 = vmatpush3.bf16.msra.mxu1 %v6520_v34  ;;  %vm2668_vm15 = vcmp.eq.s32.totalorder %v11241_v27, 1  ;;  %v11259_v34 = vld [vmem:[#allocation195_spill] sm:$0xff] }
 0x2d5   : > { %6287 = vmatprep.subr.bf16.mxu1 %v6521_v48 }
 0x2d7   : > { %5706 = vmatmul.mubr.msk.bf16.gmra.mrb[136].mxu0 %vm5704_vm12, %v8799_v52  ;;  %v11237_v52 = vld [vmem:[#allocation176_spill] sm:$0xff] }
 0x2d8   : > { %4365 = vmatprep.mubr.bf16.mxu0 %v8872_v25  ;;  %6288 = vmatpush3.bf16.msra.mxu1 %v6521_v48  ;;  %vm2667_vm6 = vcmp.eq.s32.totalorder %v11237_v52, 1 }
 0x2d9   : > { %6289 = vmatprep.subr.bf16.mxu1 %v6522_v60  ;;  %vm5710_vm13 = vmpackc.low %vm2667_vm6, %vm2666_vm4  ;;  %vm11253_vm6 = vnez %v11252_v17 }
 0x2db   : > { %4205 = vmatmul.mubr.bf16.gmra.mrb[76].mxu1 %v11228_v41 }
 0x2dc   : > { %5664 = vmatprep.mubr.msk.bf16.mxu1 %vm5662_vm8, %v8962_v29  ;;  %6290 = vmatpush3.bf16.msra.mxu1 %v6522_v60  ;;  %vm11249_vm8 = vnez %v11248_v7  ;;  %v11262_v60 = vld [vmem:[#allocation173_spill] sm:$0xff] }
 0x2dd   : > { %6291 = vmatprep.subr.bf16.mxu1 %v6523_v49 }
 0x2df   : > { %5709 = vmatmul.mubr.msk.bf16.gmra.mrb[140].mxu0 %vm5707_vm10, %v8858_v22  ;;  %v11240_v22 = vld [vmem:[#allocation96_spill] sm:$0xff] }
 0x2e0   : > { %4373 = vmatprep.mubr.bf16.mxu0 %v8919_v61  ;;  %6292 = vmatpush3.bf16.msra.mxu1 %v6523_v49  ;;  %vm2669_vm1 = vcmp.eq.s32.totalorder %v11240_v22, 1 }
 0x2e1   : > { %vm5713_vm14 = vmpackc.low %vm2669_vm1, %vm2668_vm15 }
 0x2e3   : > { %4213 = vmatmul.mubr.bf16.gmra.mrb[80].mxu1 %v8872_v25  ;;  %v11243_v25 = vld [vmem:[#allocation103_spill] sm:$0xff] }
 0x2e4   : > { %5667 = vmatprep.mubr.msk.bf16.mxu1 %vm7913_vm5, %v9025_v10  ;;  %vm2671_vm5 = vcmp.eq.s32.totalorder %v11243_v25, 1 }
 0x2e7   : > { %5712 = vmatmul.mubr.msk.bf16.gmra.mrb[144].mxu0 %vm5710_vm13, %v8913_v21  ;;  %v11244_v21 = vld [vmem:[#allocation102_spill] sm:$0xff]  ;;  %vm2676_vm13 = vcmp.eq.s32.totalorder %v11255_v36, 1 }
 0x2e8   : > { %4381 = vmatprep.mubr.bf16.mxu0 %v8977_v20  ;;  %vm2670_vm12 = vcmp.eq.s32.totalorder %v11244_v21, 1 }
 0x2e9   : > { %vm5716_vm3 = vmpackc.low %vm2671_vm5, %vm2670_vm12  ;;  %vm2678_vm5 = vcmp.eq.s32.totalorder %v11259_v34, 1  ;;  %v11268_v34 = vld [vmem:[#allocation178_spill] sm:$0xff] }
 0x2eb   : > { %4221 = vmatmul.mubr.bf16.gmra.mrb[84].mxu1 %v8919_v61  ;;  %v11246_v61 = vld [vmem:[#allocation121_spill] sm:$0xff] }
 0x2ec   : > { %5670 = vmatprep.mubr.msk.bf16.mxu1 %vm7953_vm7, %v9065_v59  ;;  %vm2673_vm7 = vcmp.eq.s32.totalorder %v11246_v61, 1 }
 0x2ef   : > { %5715 = vmatmul.mubr.msk.bf16.gmra.mrb[148].mxu0 %vm5713_vm14, %v8964_v8  ;;  %v11247_v8 = vld [vmem:[#allocation108_spill] sm:$0xff]  ;;  %vm2679_vm14 = vcmp.eq.s32.totalorder %v11258_v56, 1 }
 0x2f0   : > { %4389 = vmatprep.mubr.bf16.mxu0 %v9041_v30  ;;  %vm2672_vm2 = vcmp.eq.s32.totalorder %v11247_v8, 1  ;;  %vm5728_vm12 = vmpackc.low %vm2679_vm14, %vm2678_vm5  ;;  %v11266_v8 = vld [vmem:[#allocation53_spill] sm:$0xff] }
 0x2f1   : > { %vm5719_vm9 = vmpackc.low %vm2673_vm7, %vm2672_vm2  ;;  %v5810_v41 = vpop.f32.mrb[0].mxu1  ;;  %vm2681_vm7 = vcmp.eq.s32.totalorder %v11262_v60, 1  ;;  %vm2680_vm2 = vcmp.eq.s32.totalorder %v11263_v23, 1 }
 0x2f2   : > { %v5811_v51 = vpop.f32.mrb[1].mxu1 }
 0x2f3   : > { %4229 = vmatmul.mubr.bf16.gmra.mrb[88].mxu1 %v8977_v20  ;;  %v11250_v20 = vld [vmem:[#allocation185_spill] sm:$0xff]  ;;  %v5812_v19 = vadd.f32 %v5811_v51, %v5810_v41  ;;  %v5813_v26 = vpop.f32.mrb[2].mxu1 }
 0x2f4   : > { %5673 = vmatprep.mubr.msk.bf16.mxu1 %vm7992_vm11, %v9115_v0  ;;  %vm2675_vm11 = vcmp.eq.s32.totalorder %v11250_v20, 1  ;;  %v5922_v48 = vpop.f32.mrb[64].mxu0  ;;  %v5814_v3 = vpop.f32.mrb[3].mxu1 }
 0x2f5   : > { %v5815_v50 = vadd.f32 %v5814_v3, %v5813_v26 }
 0x2f7   : > { %5718 = vmatmul.mubr.msk.bf16.gmra.mrb[152].mxu0 %vm5716_vm3, %v9027_v18  ;;  %v11251_v18 = vld [vmem:[#allocation179_spill] sm:$0xff] }
 0x2f8   : > { %4397 = vmatprep.mubr.bf16.mxu0 %v9089_v9  ;;  %vm2674_vm0 = vcmp.eq.s32.totalorder %v11251_v18, 1 }
 0x2f9   : > { %vm5722_vm10 = vmpackc.low %vm2675_vm11, %vm2674_vm0  ;;  %vm2683_vm11 = vcmp.eq.s32.totalorder %v11266_v8, 1 }
 0x2fb   : > { %4237 = vmatmul.mubr.bf16.gmra.mrb[92].mxu1 %v9041_v30  ;;  %v9525_v30 = vpop.permute.xlu0 %2975 }
 0x2fc   : > { %5676 = vmatprep.mubr.msk.bf16.mxu1 %vm11249_vm8, %v9149_v40  ;;  %vm11265_vm8 = vnez %v11264_v62  ;;  %v11270_v62 = vld [vmem:[#allocation46_spill] sm:$0xff] }
 0x2ff   : > { %5721 = vmatmul.mubr.msk.bf16.gmra.mrb[156].mxu0 %vm5719_vm9, %v9083_v5  ;;  %v11254_v5 = vld [vmem:[#allocation193_spill] sm:$0xff]  ;;  %v9531_v35 = vpop.permute.xlu0 %2641  ;;  %vm5731_vm9 = vmpackc.low %vm2681_vm7, %vm2680_vm2  ;;  %v5816_v14 = vpop.f32.mrb[4].mxu1 }
 0x300   : > { %4405 = vmatprep.mubr.bf16.mxu0 %v9129_v24  ;;  %vm2677_vm4 = vcmp.eq.s32.totalorder %v11254_v5, 1  ;;  %v5817_v21 = vpop.f32.mrb[5].mxu1 }
 0x301   : > { %vm5725_vm1 = vmpackc.low %vm2677_vm4, %vm2676_vm13  ;;  %v5819_v61 = vpop.f32.mrb[6].mxu1  ;;  %vm2684_vm13 = vcmp.eq.s32.totalorder %v9531_v35, 1 }
 0x302   : > { %v5820_v20 = vpop.f32.mrb[7].mxu1 }
 0x303   : > { %4245 = vmatmul.mubr.bf16.gmra.mrb[96].mxu1 %v9089_v9  ;;  %v11256_v9 = vld [vmem:[#allocation167_spill] sm:$0xff]  ;;  %v9542_v13 = vpop.permute.xlu0 %2981  ;;  %v5821_v17 = vadd.f32 %v5820_v20, %v5819_v61 }
 0x304   : > { %5679 = vmatprep.mubr.msk.bf16.mxu1 %vm11253_vm6, %v9189_v15  ;;  %vm11257_vm15 = vnez %v11256_v9  ;;  %vm11269_vm6 = vnez %v11268_v34  ;;  %v11274_v34 = vld [vmem:[#allocation49_spill] sm:$0xff] }
 0x307   : > { %5724 = vmatmul.mubr.msk.bf16.gmra.mrb[160].mxu0 %vm5722_vm10, %v9125_v16  ;;  %v9539_v16 = vpop.permute.xlu1 %2978  ;;  %v9553_v6 = vpop.permute.xlu0 %2987 }
 0x308   : > { %4413 = vmatprep.mubr.bf16.mxu0 %v9165_v4 }
 0x30b   : > { %4253 = vmatmul.mubr.bf16.gmra.mrb[100].mxu1 %v9129_v24  ;;  %v11260_v24 = vld [vmem:[#allocation170_spill] sm:$0xff]  ;;  %v2648_v25 = vpop.permute.xlu0 %2647 }
 0x30c   : > { %5682 = vmatprep.mubr.msk.bf16.mxu1 %vm11257_vm15, %v9229_v2  ;;  %vm11261_vm3 = vnez %v11260_v24  ;;  %vm11271_vm15 = vnez %v11270_v62  ;;  %vm2686_vm5 = vcmp.eq.s32.totalorder %v2648_v25, 1 }
 0x30f   : > { %5727 = vmatmul.mubr.msk.bf16.gmra.mrb[164].mxu0 %vm5725_vm1, %v9169_v46  ;;  %v9550_v46 = vpop.permute.xlu1 %2644  ;;  %v9578_v24 = vpop.permute.xlu0 %2993 }
 0x310   : > { %4421 = vmatprep.mubr.bf16.mxu0 %v9212_v12  ;;  %v5822_v51 = vpop.f32.mrb[8].mxu1  ;;  %vm2685_vm4 = vcmp.eq.s32.totalorder %v9550_v46, 1  ;;  %v11272_v46 = vld [vmem:[#allocation182_spill] sm:$0xff] }
 0x311   : > { %vm5737_vm1 = vmpackc.low %vm2685_vm4, %vm2684_vm13 }
 0x313   : > { %4261 = vmatmul.mubr.bf16.gmra.mrb[104].mxu1 %v9165_v4  ;;  %v5923_v4 = vpop.f32.mrb[65].mxu0  ;;  %v9564_v22 = vpop.permute.xlu1 %2984 }
 0x314   : > { %5685 = vmatprep.mubr.msk.bf16.mxu1 %vm11261_vm3, %v9263_v42  ;;  %v5924_v39 = vadd.f32 %v5923_v4, %v5922_v48  ;;  %v5925_v49 = vpop.f32.mrb[66].mxu0  ;;  %v9588_v23 = vpop.permute.xlu0 %2999  ;;  %vm11275_vm3 = vnez %v11274_v34 }
 0x316   : > { %v9558_v52 = vadd.f32 %v5924_v39, %v5812_v19 }
 0x317   : > { %5730 = vmatmul.mubr.msk.bf16.gmra.mrb[168].mxu0 %vm5728_vm12, %v9208_v37  ;;  %v5926_v37 = vpop.f32.mrb[67].mxu0  ;;  %v9583_v19 = vpop.permute.xlu1 %2990 }
 0x318   : > { %4429 = vmatprep.mubr.bf16.mxu0 %v9245_v54  ;;  %v5927_v1 = vadd.f32 %v5926_v37, %v5925_v49  ;;  %v5928_v45 = vpop.f32.mrb[68].mxu0 }
 0x319   : > { %v5929_v7 = vpop.f32.mrb[69].mxu0 }
 0x31a   : > { %v9566_v27 = vadd.f32 %v5927_v1, %v5815_v50  ;;  %v5930_v18 = vadd.f32 %v5929_v7, %v5928_v45  ;;  %v5931_v5 = vpop.f32.mrb[70].mxu0 }
 0x31b   : > { %4269 = vmatmul.mubr.bf16.gmra.mrb[108].mxu1 %v9212_v12  ;;  %v5818_v12 = vadd.f32 %v5817_v21, %v5816_v14  ;;  %v5932_v36 = vpop.f32.mrb[71].mxu0  ;;  %v2289_v14 = vpack.c.bf16 %v11272_v46, %v11144_v53  ;;  %v2651_v21 = vpop.permute.xlu1 %2650 }
 0x31c   : > { %5688 = vmatprep.mubr.msk.bf16.mxu1 %vm11265_vm8, %v9298_v57  ;;  %v5933_v56 = vadd.f32 %v5932_v36, %v5931_v5  ;;  %v5934_v26 = vpop.f32.mrb[72].mxu0  ;;  %vm2687_vm14 = vcmp.eq.s32.totalorder %v2651_v21, 1  ;;  %v11277_v21 = vld [vmem:[#allocation180_spill] sm:$0xff] }
 0x31d   : > { %v9572_v9 = vadd.f32 %v5930_v18, %v5818_v12  ;;  %v5935_v4 = vpop.f32.mrb[73].mxu0  ;;  %v6432_v18 = vpop.permute.xlu0 %6431  ;;  %vm5740_vm12 = vmpackc.low %vm2687_vm14, %vm2686_vm5  ;;  %vm11278_vm8 = vnez %v11277_v21  ;;  %vm3031_vm14 = vcmp.eq.s32.totalorder %v9539_v16, 1  ;;  %vm3030_vm5 = vcmp.eq.s32.totalorder %v9525_v30, 1 }
 0x31e   : > { %v9580_v41 = vadd.f32 %v5933_v56, %v5821_v17  ;;  %v5936_v39 = vadd.f32 %v5935_v4, %v5934_v26  ;;  %v11273_v56 = vld [vmem:[#allocation50_spill] sm:$0xff] }
 0x31f   : > { %5733 = vmatmul.mubr.msk.bf16.gmra.mrb[172].mxu0 %vm5731_vm9, %v9248_v28  ;;  %v11267_v28 = vld [vmem:[#allocation184_spill] sm:$0xff] }
 0x320   : > { %4437 = vmatprep.mubr.bf16.mxu0 %v9281_v32  ;;  %vm2682_vm0 = vcmp.eq.s32.totalorder %v11267_v28, 1 }
 0x321   : > { %vm5734_vm10 = vmpackc.low %vm2683_vm11, %vm2682_vm0 }
 0x323   : > { %4277 = vmatmul.mubr.bf16.gmra.mrb[112].mxu1 %v9245_v54  ;;  %v5823_v54 = vpop.f32.mrb[9].mxu1 }
 0x324   : > { %5691 = vmatprep.mubr.msk.bf16.mxu1 %vm11269_vm6, %v9328_v33  ;;  %v5824_v48 = vadd.f32 %v5823_v54, %v5822_v51  ;;  %v5825_v60 = vpop.f32.mrb[10].mxu1  ;;  %v6434_v51 = vunpack.i.h.bf16 %v6432_v18  ;;  %v6433_v54 = vunpack.i.l.bf16 %v6432_v18 }
 0x325   : > { %v5826_v3 = vpop.f32.mrb[11].mxu1 }
 0x326   : > { %v5827_v50 = vadd.f32 %v5826_v3, %v5825_v60  ;;  %v9590_v37 = vadd.f32 %v5936_v39, %v5824_v48  ;;  %v11276_v60 = vmov 0.0|0.0   ;;  %vm2689_vm7 = vcmp.eq.s32.totalorder %v6434_v51, 1  ;;  %v11282_v51 = vld [vmem:[#allocation44_spill] sm:$0xff] }
 0x327   : > { %5736 = vmatmul.mubr.msk.bf16.gmra.mrb[176].mxu0 %vm5734_vm10, %v9277_v55  ;;  %v5937_v55 = vpop.f32.mrb[74].mxu0  ;;  %vm2688_vm2 = vcmp.eq.s32.totalorder %v6433_v54, 1  ;;  %vm11283_vm0 = vnez %v11282_v51 }
 0x328   : > { %4445 = vmatprep.mubr.bf16.mxu0 %v9314_v47  ;;  %v5938_v49 = vpop.f32.mrb[75].mxu0  ;;  %vm5743_vm9 = vmpackc.low %vm2689_vm7, %vm2688_vm2  ;;  %vm3033_vm7 = vcmp.eq.s32.totalorder %v9564_v22, 1  ;;  %vm3035_vm2 = vcmp.eq.s32.totalorder %v9583_v19, 1 }
 0x329   : > { %v5939_v1 = vadd.f32 %v5938_v49, %v5937_v55  ;;  %v5940_v61 = vpop.f32.mrb[76].mxu0 }
 0x32a   : > { %v5941_v7 = vpop.f32.mrb[77].mxu0 }
 0x32b   : > { %4285 = vmatmul.mubr.bf16.gmra.mrb[116].mxu1 %v9281_v32  ;;  %v9598_v35 = vadd.f32 %v5939_v1, %v5827_v50  ;;  %v5828_v32 = vpop.f32.mrb[12].mxu1  ;;  %v5942_v17 = vadd.f32 %v5941_v7, %v5940_v61  ;;  %v5943_v28 = vpop.f32.mrb[78].mxu0 }
 0x32c   : > { %5694 = vmatprep.mubr.msk.bf16.mxu1 %vm11271_vm15, %v9341_v63  ;;  %v5829_v12 = vpop.f32.mrb[13].mxu1  ;;  %v5944_v53 = vpop.f32.mrb[79].mxu0 }
 0x32d   : > { %v5830_v45 = vadd.f32 %v5829_v12, %v5828_v32  ;;  %v5831_v8 = vpop.f32.mrb[14].mxu1  ;;  %v5945_v36 = vadd.f32 %v5944_v53, %v5943_v28  ;;  %v11279_v32 = vld [vmem:[#allocation26_spill] sm:$0xff] }
 0x32e   : > { %v5832_v20 = vpop.f32.mrb[15].mxu1 }
 0x32f   : > { %5739 = vmatmul.mubr.msk.bf16.gmra.mrb[180].mxu0 %vm5737_vm1, %v9317_v44  ;;  %v5833_v5 = vadd.f32 %v5832_v20, %v5831_v8  ;;  %v9601_v44 = vadd.f32 %v5942_v17, %v5830_v45 }
 0x330   : > { %4453 = vmatprep.mubr.bf16.mxu0 %v2289_v14 }
 0x331   : > { %v9607_v48 = vadd.f32 %v5945_v36, %v5833_v5  ;;  %v11280_v36 = vld [vmem:[#allocation23_spill] sm:$0xff] }
 0x332   : > { %vm11281_vm11 = vnez %v11280_v36  ;;  %v11290_v36 = vld [vmem:[#allocation56_spill] sm:$0xff] }
 0x333   : > { %4293 = vmatmul.mubr.bf16.gmra.mrb[120].mxu1 %v9314_v47  ;;  %vm11291_vm13 = vnez %v11290_v36 }
 0x334   : > { %5697 = vmatprep.mubr.msk.bf16.mxu1 %vm11275_vm3, %v11273_v56 }
 0x336   : > { %v5834_v26 = vpop.f32.mrb[16].mxu1 }
 0x337   : > { %5742 = vmatmul.mubr.msk.bf16.gmra.mrb[184].mxu0 %vm5740_vm12, %v11208_v43  ;;  %v5835_v25 = vpop.f32.mrb[17].mxu1  ;;  %vm5776_vm12 = vmpackc.low %vm3031_vm14, %vm3030_vm5 }
 0x338   : > { %4461 = vmatprep.mubr.bf16.mxu0 %v11276_v60  ;;  %v5836_v4 = vadd.f32 %v5835_v25, %v5834_v26  ;;  %v5837_v3 = vpop.f32.mrb[18].mxu1 }
 0x339   : > { %v5838_v50 = vpop.f32.mrb[19].mxu1 }
 0x33a   : > { %v5946_v47 = vpop.f32.mrb[80].mxu0  ;;  %v5839_v49 = vadd.f32 %v5838_v50, %v5837_v3 }
 0x33b   : > { %v5947_v39 = vpop.f32.mrb[81].mxu0  ;;  %4301 = vmatmul.mubr.bf16.gmra.mrb[124].mxu1 %v2289_v14 }
 0x33c   : > { %v5948_v55 = vadd.f32 %v5947_v39, %v5946_v47  ;;  %v5949_v1 = vpop.f32.mrb[82].mxu0  ;;  %6293 = vmatprep.mubr.msk.bf16.mxu1 %vm11278_vm8, %v8797_v58  ;;  %vm3034_vm8 = vcmp.eq.s32.totalorder %v9553_v6, 1 }
 0x33d   : > { %v5950_v62 = vpop.f32.mrb[83].mxu0 }
 0x33e   : > { %v9610_v43 = vadd.f32 %v5948_v55, %v5836_v4  ;;  %v5951_v46 = vadd.f32 %v5950_v62, %v5949_v1  ;;  %v5840_v45 = vpop.f32.mrb[20].mxu1  ;;  %v11284_v1 = vld [vmem:[#allocation27_spill] sm:$0xff] }
 0x33f   : > { %5745 = vmatmul.mubr.msk.bf16.gmra.mrb[188].mxu0 %vm5743_vm9, %v11279_v32  ;;  %v5841_v61 = vpop.f32.mrb[21].mxu1  ;;  %vm11285_vm10 = vnez %v11284_v1  ;;  %v11294_v1 = vld [vmem:[#allocation58_spill] sm:$0xff]  ;;  %vm3032_vm9 = vcmp.eq.s32.totalorder %v9542_v13, 1 }
 0x340   : > { %v9616_v12 = vadd.f32 %v5951_v46, %v5839_v49  ;;  %v5842_v8 = vadd.f32 %v5841_v61, %v5840_v45  ;;  %v5843_v20 = vpop.f32.mrb[22].mxu1  ;;  %v11286_v46 = vld [vmem:[#allocation28_spill] sm:$0xff]  ;;  %vm11295_vm15 = vnez %v11294_v1 }
 0x341   : > { %v5844_v17 = vpop.f32.mrb[23].mxu1  ;;  %vm11287_vm6 = vnez %v11286_v46 }
 0x342   : > { %v5952_v7 = vpop.f32.mrb[84].mxu0  ;;  %v5845_v5 = vadd.f32 %v5844_v17, %v5843_v20 }
 0x343   : > { %v5953_v18 = vpop.f32.mrb[85].mxu0  ;;  %6294 = vmatmul.mubr.msk.bf16.vlgmr.msra.gmra.mrb[128].mxu1 %vm11281_vm11, %v11226_v11  ;;  %vm5779_vm11 = vmpackc.low %vm3033_vm7, %vm3032_vm9 }
 0x344   : > { %v5954_v14 = vadd.f32 %v5953_v18, %v5952_v7  ;;  %v5955_v28 = vpop.f32.mrb[86].mxu0  ;;  %6297 = vmatprep.mubr.msk.bf16.mxu1 %vm11283_vm0, %v8894_v38  ;;  %vm5782_vm0 = vmpackc.low %vm3035_vm2, %vm3034_vm8 }
 0x345   : > { %v5956_v53 = vpop.f32.mrb[87].mxu0 }
 0x346   : > { %v9621_v58 = vadd.f32 %v5954_v14, %v5842_v8  ;;  %v5957_v34 = vadd.f32 %v5956_v53, %v5955_v28  ;;  %v5846_v26 = vpop.f32.mrb[24].mxu1  ;;  %v11288_v28 = vld [vmem:[#allocation187_spill] sm:$0xff] }
 0x347   : > { %v5847_v60 = vpop.f32.mrb[25].mxu1  ;;  %vm11289_vm4 = vnez %v11288_v28 }
 0x348   : > { %v9626_v54 = vadd.f32 %v5957_v34, %v5845_v5  ;;  %v5848_v25 = vadd.f32 %v5847_v60, %v5846_v26  ;;  %v5849_v47 = vpop.f32.mrb[26].mxu1 }
 0x349   : > { %v5850_v39 = vpop.f32.mrb[27].mxu1 }
 0x34a   : > { %v5958_v4 = vpop.f32.mrb[88].mxu0  ;;  %v5851_v55 = vadd.f32 %v5850_v39, %v5849_v47 }
 0x34b   : > { %v5959_v3 = vpop.f32.mrb[89].mxu0  ;;  %6298 = vmatmul.mubr.msk.bf16.gmra.mrb[132].mxu1 %vm11285_vm10, %v8962_v29 }
 0x34c   : > { %v5960_v50 = vadd.f32 %v5959_v3, %v5958_v4  ;;  %v5961_v49 = vpop.f32.mrb[90].mxu0  ;;  %6301 = vmatprep.mubr.msk.bf16.mxu1 %vm11287_vm6, %v9025_v10 }
 0x34d   : > { %v5962_v11 = vpop.f32.mrb[91].mxu0 }
 0x34e   : > { %v9631_v62 = vadd.f32 %v5960_v50, %v5848_v25  ;;  %v5963_v38 = vadd.f32 %v5962_v11, %v5961_v49  ;;  %v5852_v32 = vpop.f32.mrb[28].mxu1  ;;  %v11292_v49 = vld [vmem:[#allocation55_spill] sm:$0xff] }
 0x34f   : > { %v5853_v45 = vpop.f32.mrb[29].mxu1  ;;  %vm11293_vm1 = vnez %v11292_v49 }
 0x350   : > { %v9636_v21 = vadd.f32 %v5963_v38, %v5851_v55  ;;  %v5854_v61 = vadd.f32 %v5853_v45, %v5852_v32  ;;  %v5855_v7 = vpop.f32.mrb[30].mxu1  ;;  %v2997_v32 = vpop.permute.xlu1 %2996 }
 0x351   : > { %v5856_v18 = vpop.f32.mrb[31].mxu1  ;;  %vm3037_vm10 = vcmp.eq.s32.totalorder %v2997_v32, 1 }
 0x352   : > { %v5964_v8 = vpop.f32.mrb[92].mxu0  ;;  %v5857_v14 = vadd.f32 %v5856_v18, %v5855_v7 }
 0x353   : > { %v5965_v20 = vpop.f32.mrb[93].mxu0  ;;  %6302 = vmatmul.mubr.msk.bf16.gmra.mrb[136].mxu1 %vm11289_vm4, %v9065_v59  ;;  %vm3036_vm4 = vcmp.eq.s32.totalorder %v9578_v24, 1 }
 0x354   : > { %v5966_v17 = vadd.f32 %v5965_v20, %v5964_v8  ;;  %v5967_v5 = vpop.f32.mrb[94].mxu0  ;;  %6305 = vmatprep.mubr.msk.bf16.mxu1 %vm11291_vm13, %v9115_v0  ;;  %v3003_v30 = vpop.permute.xlu1 %3002  ;;  %vm3038_vm13 = vcmp.eq.s32.totalorder %v9588_v23, 1 }
 0x355   : > { %v5968_v29 = vpop.f32.mrb[95].mxu0  ;;  %vm3039_vm6 = vcmp.eq.s32.totalorder %v3003_v30, 1 }
 0x356   : > { %v9641_v53 = vadd.f32 %v5966_v17, %v5854_v61  ;;  %v5969_v10 = vadd.f32 %v5968_v29, %v5967_v5  ;;  %v5858_v51 = vpop.f32.mrb[32].mxu1 }
 0x357   : > { %v5859_v26 = vpop.f32.mrb[33].mxu1 }
 0x358   : > { %v9646_v34 = vadd.f32 %v5969_v10, %v5857_v14  ;;  %v5860_v60 = vadd.f32 %v5859_v26, %v5858_v51  ;;  %v5861_v4 = vpop.f32.mrb[34].mxu1 }
 0x359   : > { %v5862_v3 = vpop.f32.mrb[35].mxu1 }
 0x35a   : > { %v5970_v25 = vpop.f32.mrb[96].mxu0  ;;  %v5863_v50 = vadd.f32 %v5862_v3, %v5861_v4 }
 0x35b   : > { %v5971_v47 = vpop.f32.mrb[97].mxu0  ;;  %6306 = vmatmul.mubr.msk.bf16.gmra.mrb[140].mxu1 %vm11293_vm1, %v9149_v40  ;;  %vm5785_vm1 = vmpackc.low %vm3037_vm10, %vm3036_vm4 }
 0x35c   : > { %v5972_v39 = vadd.f32 %v5971_v47, %v5970_v25  ;;  %v5973_v55 = vpop.f32.mrb[98].mxu0  ;;  %6309 = vmatprep.mubr.msk.bf16.mxu1 %vm11295_vm15, %v9189_v15  ;;  %v11296_v15 = vld [vmem:[#allocation186_spill] sm:$0xff]  ;;  %vm5788_vm15 = vmpackc.low %vm3039_vm6, %vm3038_vm13 }
 0x35d   : > { %v5974_v59 = vpop.f32.mrb[99].mxu0  ;;  %vm11297_vm3 = vnez %v11296_v15 }
 0x35e   : > { %v9651_v11 = vadd.f32 %v5972_v39, %v5860_v60  ;;  %v5975_v0 = vadd.f32 %v5974_v59, %v5973_v55  ;;  %v5864_v46 = vpop.f32.mrb[36].mxu1 }
 0x35f   : > { %v5865_v45 = vpop.f32.mrb[37].mxu1 }
 0x360   : > { %v9656_v38 = vadd.f32 %v5975_v0, %v5863_v50  ;;  %v5866_v61 = vadd.f32 %v5865_v45, %v5864_v46  ;;  %v5867_v7 = vpop.f32.mrb[38].mxu1  ;;  %v6437_v50 = vpop.permute.xlu1 %6436 }
 0x361   : > { %v5868_v18 = vpop.f32.mrb[39].mxu1  ;;  %v6439_v45 = vunpack.i.h.bf16 %v6437_v50 }
 0x362   : > { %v5976_v8 = vpop.f32.mrb[100].mxu0  ;;  %v5869_v17 = vadd.f32 %v5868_v18, %v5867_v7 }
 0x363   : > { %v5977_v20 = vpop.f32.mrb[101].mxu0  ;;  %6310 = vmatmul.mubr.msk.bf16.gmra.mrb[144].mxu1 %vm11297_vm3, %v9229_v2  ;;  %vm3041_vm14 = vcmp.eq.s32.totalorder %v6439_v45, 1  ;;  %vm6679_vm3 = vmmov 0  }
 0x364   : > { %v5978_v40 = vadd.f32 %v5977_v20, %v5976_v8  ;;  %v5979_v14 = vpop.f32.mrb[102].mxu0  ;;  %6313 = vmatprep.mubr.msk.bf16.mxu1 %vm5776_vm12, %v9263_v42 }
 0x365   : > { %v5980_v5 = vpop.f32.mrb[103].mxu0 }
 0x366   : > { %v9663_v29 = vadd.f32 %v5978_v40, %v5866_v61  ;;  %v5981_v28 = vadd.f32 %v5980_v5, %v5979_v14  ;;  %v5870_v10 = vpop.f32.mrb[40].mxu1  ;;  %v6438_v61 = vunpack.i.l.bf16 %v6437_v50 }
 0x367   : > { %v5871_v36 = vpop.f32.mrb[41].mxu1 }
 0x368   : > { %v9666_v16 = vadd.f32 %v5981_v28, %v5869_v17  ;;  %v5872_v51 = vadd.f32 %v5871_v36, %v5870_v10  ;;  %v5873_v60 = vpop.f32.mrb[42].mxu1  ;;  %vm3040_vm5 = vcmp.eq.s32.totalorder %v6438_v61, 1 }
 0x369   : > { %v5874_v25 = vpop.f32.mrb[43].mxu1  ;;  %vm5791_vm12 = vmpackc.low %vm3041_vm14, %vm3040_vm5 }
 0x36a   : > { %v5982_v26 = vpop.f32.mrb[104].mxu0  ;;  %v5875_v4 = vadd.f32 %v5874_v25, %v5873_v60 }
 0x36b   : > { %v5983_v2 = vpop.f32.mrb[105].mxu0  ;;  %6314 = vmatmul.mubr.msk.bf16.gmra.mrb[148].mxu1 %vm5779_vm11, %v9298_v57 }
 0x36c   : > { %v5984_v42 = vadd.f32 %v5983_v2, %v5982_v26  ;;  %v5985_v47 = vpop.f32.mrb[106].mxu0  ;;  %6317 = vmatprep.mubr.msk.bf16.mxu1 %vm5782_vm0, %v9328_v33 }
 0x36d   : > { %v5986_v3 = vpop.f32.mrb[107].mxu0 }
 0x36e   : > { %v9673_v22 = vadd.f32 %v5984_v42, %v5872_v51  ;;  %v5987_v19 = vadd.f32 %v5986_v3, %v5985_v47  ;;  %v5876_v13 = vpop.f32.mrb[44].mxu1 }
 0x36f   : > { %v5877_v55 = vpop.f32.mrb[45].mxu1 }
 0x370   : > { %v9676_v39 = vadd.f32 %v5987_v19, %v5875_v4  ;;  %v5878_v6 = vadd.f32 %v5877_v55, %v5876_v13  ;;  %v5879_v49 = vpop.f32.mrb[46].mxu1 }
 0x371   : > { %v5880_v1 = vpop.f32.mrb[47].mxu1 }
 0x372   : > { %v5988_v59 = vpop.f32.mrb[108].mxu0  ;;  %v5881_v46 = vadd.f32 %v5880_v1, %v5879_v49 }
 0x373   : > { %v5989_v0 = vpop.f32.mrb[109].mxu0  ;;  %6318 = vmatmul.mubr.msk.bf16.gmra.mrb[152].mxu1 %vm5785_vm1, %v9341_v63 }
 0x374   : > { %v5990_v57 = vadd.f32 %v5989_v0, %v5988_v59  ;;  %v5991_v33 = vpop.f32.mrb[110].mxu0  ;;  %6321 = vmatprep.mubr.msk.bf16.mxu1 %vm5788_vm15, %v11273_v56 }
 0x375   : > { %v5992_v32 = vpop.f32.mrb[111].mxu0 }
 0x376   : > { %v9681_v8 = vadd.f32 %v5990_v57, %v5878_v6  ;;  %v5993_v7 = vadd.f32 %v5992_v32, %v5991_v33  ;;  %v5882_v20 = vpop.f32.mrb[48].mxu1 }
 0x377   : > { %v5883_v23 = vpop.f32.mrb[49].mxu1 }
 0x378   : > { %v9684_v24 = vadd.f32 %v5993_v7, %v5881_v46  ;;  %v5884_v18 = vadd.f32 %v5883_v23, %v5882_v20  ;;  %v5885_v17 = vpop.f32.mrb[50].mxu1 }
 0x379   : > { %v5886_v5 = vpop.f32.mrb[51].mxu1 }
 0x37a   : > { %v5994_v40 = vpop.f32.mrb[112].mxu0  ;;  %v5887_v28 = vadd.f32 %v5886_v5, %v5885_v17 }
 0x37b   : > { %v5995_v14 = vpop.f32.mrb[113].mxu0  ;;  %6322 = vmatmul.mubr.msk.bf16.gmra.mrb[156].mxu1 %vm5791_vm12, %v8734_v31 }
 0x37c   : > { %v5996_v15 = vadd.f32 %v5995_v14, %v5994_v40  ;;  %v5997_v63 = vpop.f32.mrb[114].mxu0 }
 0x37d   : > { %v5998_v10 = vpop.f32.mrb[115].mxu0 }
 0x37e   : > { %v9687_v30 = vadd.f32 %v5996_v15, %v5884_v18  ;;  %v5999_v56 = vadd.f32 %v5998_v10, %v5997_v63  ;;  %v5888_v51 = vpop.f32.mrb[52].mxu1 }
 0x37f   : > { %v5889_v26 = vpop.f32.mrb[53].mxu1 }
 0x380   : > { %v9689_v36 = vadd.f32 %v5999_v56, %v5887_v28  ;;  %v5890_v60 = vadd.f32 %v5889_v26, %v5888_v51  ;;  %v5891_v25 = vpop.f32.mrb[54].mxu1 }
 0x381   : > { %v5892_v4 = vpop.f32.mrb[55].mxu1 }
 0x382   : > { %v6000_v2 = vpop.f32.mrb[116].mxu0  ;;  %v5893_v3 = vadd.f32 %v5892_v4, %v5891_v25 }
 0x383   : > { %v6001_v42 = vpop.f32.mrb[117].mxu0 }
 0x384   : > { %v6002_v47 = vadd.f32 %v6001_v42, %v6000_v2  ;;  %v6003_v19 = vpop.f32.mrb[118].mxu0 }
 0x385   : > { %v6004_v13 = vpop.f32.mrb[119].mxu0 }
 0x386   : > { %v9691_v50 = vadd.f32 %v6002_v47, %v5890_v60  ;;  %v6005_v55 = vadd.f32 %v6004_v13, %v6003_v19  ;;  %v5894_v6 = vpop.f32.mrb[56].mxu1 }
 0x387   : > { %v5895_v59 = vpop.f32.mrb[57].mxu1 }
 0x388   : > { %v9693_v31 = vadd.f32 %v6005_v55, %v5893_v3  ;;  %v5896_v49 = vadd.f32 %v5895_v59, %v5894_v6  ;;  %v5897_v1 = vpop.f32.mrb[58].mxu1 }
 0x389   : > { %v5898_v46 = vpop.f32.mrb[59].mxu1 }
 0x38a   : > { %v6006_v0 = vpop.f32.mrb[120].mxu0  ;;  %v5899_v45 = vadd.f32 %v5898_v46, %v5897_v1 }
 0x38b   : > { %v6007_v57 = vpop.f32.mrb[121].mxu0 }
 0x38c   : > { %v6008_v33 = vadd.f32 %v6007_v57, %v6006_v0  ;;  %v6009_v61 = vpop.f32.mrb[122].mxu0 }
 0x38d   : > { %v6010_v32 = vpop.f32.mrb[123].mxu0 }
 0x38e   : > { %v9695_v7 = vadd.f32 %v6008_v33, %v5896_v49  ;;  %v6011_v20 = vadd.f32 %v6010_v32, %v6009_v61  ;;  %v5900_v18 = vpop.f32.mrb[60].mxu1 }
 0x38f   : > { %v5901_v40 = vpop.f32.mrb[61].mxu1 }
 0x390   : > { %v9697_v23 = vadd.f32 %v6011_v20, %v5899_v45  ;;  %v5902_v17 = vadd.f32 %v5901_v40, %v5900_v18  ;;  %v5903_v5 = vpop.f32.mrb[62].mxu1 }
 0x391   : > { %v5904_v28 = vpop.f32.mrb[63].mxu1 }
 0x392   : > { %v6012_v14 = vpop.f32.mrb[124].mxu0  ;;  %v5905_v10 = vadd.f32 %v5904_v28, %v5903_v5 }
 0x393   : > { %v6013_v15 = vpop.f32.mrb[125].mxu0 }
 0x394   : > { %v6014_v63 = vadd.f32 %v6013_v15, %v6012_v14  ;;  %v6015_v56 = vpop.f32.mrb[126].mxu0 }
 0x395   : > { %v6016_v51 = vpop.f32.mrb[127].mxu0 }
 0x396   : > { %v9699_v26 = vadd.f32 %v6014_v63, %v5902_v17  ;;  %v6017_v60 = vadd.f32 %v6016_v51, %v6015_v56  ;;  %v6034_v25 = vpop.f32.mrb[64].mxu1 }
 0x397   : > { %v6035_v42 = vpop.f32.mrb[65].mxu1 }
 0x398   : > { %v9701_v2 = vadd.f32 %v6017_v60, %v5905_v10  ;;  %v6036_v4 = vadd.f32 %v6035_v42, %v6034_v25  ;;  %v6037_v3 = vpop.f32.mrb[66].mxu1 }
 0x399   : > { %v6038_v13 = vpop.f32.mrb[67].mxu1 }
 0x39a   : > { %v6146_v47 = vpop.f32.mrb[128].mxu0  ;;  %v4183_v55 = vadd.f32 %v6036_v4, %v9558_v52  ;;  %v6039_v59 = vadd.f32 %v6038_v13, %v6037_v3 }
 0x39b   : > { %v6147_v19 = vpop.f32.mrb[129].mxu0 }
 0x39c   : > { %v6148_v6 = vadd.f32 %v6147_v19, %v6146_v47  ;;  %v6149_v49 = vpop.f32.mrb[130].mxu0  ;;  %v4186_v1 = vadd.f32 %v6039_v59, %v9566_v27 }
 0x39d   : > { %v6150_v0 = vpop.f32.mrb[131].mxu0 }
 0x39e   : > { %v6151_v57 = vadd.f32 %v6150_v0, %v6149_v49  ;;  %v9705_v46 = vadd.f32 %v6148_v6, %v4183_v55  ;;  %v6040_v33 = vpop.f32.mrb[68].mxu1 }
 0x39f   : > { %v6041_v61 = vpop.f32.mrb[69].mxu1 }
 0x3a0   : > { %v9707_v45 = vadd.f32 %v6151_v57, %v4186_v1  ;;  %v6042_v32 = vadd.f32 %v6041_v61, %v6040_v33  ;;  %v6043_v18 = vpop.f32.mrb[70].mxu1 }
 0x3a1   : > { %v6044_v17 = vpop.f32.mrb[71].mxu1 }
 0x3a2   : > { %v6152_v20 = vpop.f32.mrb[132].mxu0  ;;  %v4191_v52 = vadd.f32 %v6042_v32, %v9572_v9  ;;  %v6045_v5 = vadd.f32 %v6044_v17, %v6043_v18 }
 0x3a3   : > { %v6153_v40 = vpop.f32.mrb[133].mxu0 }
 0x3a4   : > { %v6154_v14 = vadd.f32 %v6153_v40, %v6152_v20  ;;  %v6155_v15 = vpop.f32.mrb[134].mxu0  ;;  %v4194_v27 = vadd.f32 %v6045_v5, %v9580_v41 }
 0x3a5   : > { %v6156_v28 = vpop.f32.mrb[135].mxu0 }
 0x3a6   : > { %v6157_v63 = vadd.f32 %v6156_v28, %v6155_v15  ;;  %v9711_v10 = vadd.f32 %v6154_v14, %v4191_v52  ;;  %v6046_v56 = vpop.f32.mrb[72].mxu1 }
 0x3a7   : > { %v6047_v60 = vpop.f32.mrb[73].mxu1 }
 0x3a8   : > { %v9713_v51 = vadd.f32 %v6157_v63, %v4194_v27  ;;  %v6048_v25 = vadd.f32 %v6047_v60, %v6046_v56  ;;  %v6049_v4 = vpop.f32.mrb[74].mxu1 }
 0x3a9   : > { %v6050_v3 = vpop.f32.mrb[75].mxu1 }
 0x3aa   : > { %v6158_v42 = vpop.f32.mrb[136].mxu0  ;;  %v4199_v9 = vadd.f32 %v6048_v25, %v9590_v37  ;;  %v6051_v13 = vadd.f32 %v6050_v3, %v6049_v4 }
 0x3ab   : > { %v6159_v47 = vpop.f32.mrb[137].mxu0 }
 0x3ac   : > { %v6160_v19 = vadd.f32 %v6159_v47, %v6158_v42  ;;  %v6161_v55 = vpop.f32.mrb[138].mxu0  ;;  %v4202_v41 = vadd.f32 %v6051_v13, %v9598_v35 }
 0x3ad   : > { %v6162_v6 = vpop.f32.mrb[139].mxu0 }
 0x3ae   : > { %v6163_v59 = vadd.f32 %v6162_v6, %v6161_v55  ;;  %v9717_v49 = vadd.f32 %v6160_v19, %v4199_v9  ;;  %v6052_v0 = vpop.f32.mrb[76].mxu1 }
 0x3af   : > { %v6053_v57 = vpop.f32.mrb[77].mxu1 }
 0x3b0   : > { %v9719_v1 = vadd.f32 %v6163_v59, %v4202_v41  ;;  %v6054_v33 = vadd.f32 %v6053_v57, %v6052_v0  ;;  %v6055_v32 = vpop.f32.mrb[78].mxu1 }
 0x3b1   : > { %v6056_v18 = vpop.f32.mrb[79].mxu1 }
 0x3b2   : > { %v6164_v61 = vpop.f32.mrb[140].mxu0  ;;  %v4207_v37 = vadd.f32 %v6054_v33, %v9601_v44  ;;  %v6057_v17 = vadd.f32 %v6056_v18, %v6055_v32 }
 0x3b3   : > { %v6165_v20 = vpop.f32.mrb[141].mxu0 }
 0x3b4   : > { %v6166_v40 = vadd.f32 %v6165_v20, %v6164_v61  ;;  %v6167_v52 = vpop.f32.mrb[142].mxu0  ;;  %v4210_v35 = vadd.f32 %v6057_v17, %v9607_v48 }
 0x3b5   : > { %v6168_v14 = vpop.f32.mrb[143].mxu0 }
 0x3b6   : > { %v6169_v5 = vadd.f32 %v6168_v14, %v6167_v52  ;;  %v9723_v15 = vadd.f32 %v6166_v40, %v4207_v37  ;;  %v6058_v28 = vpop.f32.mrb[80].mxu1 }
 0x3b7   : > { %v6059_v63 = vpop.f32.mrb[81].mxu1 }
 0x3b8   : > { %v9725_v27 = vadd.f32 %v6169_v5, %v4210_v35  ;;  %v6060_v56 = vadd.f32 %v6059_v63, %v6058_v28  ;;  %v6061_v25 = vpop.f32.mrb[82].mxu1 }
 0x3b9   : > { %v6062_v4 = vpop.f32.mrb[83].mxu1 }
 0x3ba   : > { %v6170_v60 = vpop.f32.mrb[144].mxu0  ;;  %v4215_v44 = vadd.f32 %v6060_v56, %v9610_v43  ;;  %v6063_v3 = vadd.f32 %v6062_v4, %v6061_v25 }
 0x3bb   : > { %v6171_v42 = vpop.f32.mrb[145].mxu0 }
 0x3bc   : > { %v6172_v47 = vadd.f32 %v6171_v42, %v6170_v60  ;;  %v6173_v9 = vpop.f32.mrb[146].mxu0  ;;  %v4218_v48 = vadd.f32 %v6063_v3, %v9616_v12 }
 0x3bd   : > { %v6174_v19 = vpop.f32.mrb[147].mxu0 }
 0x3be   : > { %v6175_v13 = vadd.f32 %v6174_v19, %v6173_v9  ;;  %v9729_v55 = vadd.f32 %v6172_v47, %v4215_v44  ;;  %v6064_v6 = vpop.f32.mrb[84].mxu1 }
 0x3bf   : > { %v6065_v59 = vpop.f32.mrb[85].mxu1 }
 0x3c0   : > { %v9731_v41 = vadd.f32 %v6175_v13, %v4218_v48  ;;  %v6066_v0 = vadd.f32 %v6065_v59, %v6064_v6  ;;  %v6067_v33 = vpop.f32.mrb[86].mxu1 }
 0x3c1   : > { %v6068_v32 = vpop.f32.mrb[87].mxu1 }
 0x3c2   : > { %v6176_v57 = vpop.f32.mrb[148].mxu0  ;;  %v4223_v43 = vadd.f32 %v6066_v0, %v9621_v58  ;;  %v6069_v18 = vadd.f32 %v6068_v32, %v6067_v33 }
 0x3c3   : > { %v6177_v61 = vpop.f32.mrb[149].mxu0 }
 0x3c4   : > { %v6178_v20 = vadd.f32 %v6177_v61, %v6176_v57  ;;  %v6179_v37 = vpop.f32.mrb[150].mxu0  ;;  %v4226_v12 = vadd.f32 %v6069_v18, %v9626_v54 }
 0x3c5   : > { %v6180_v40 = vpop.f32.mrb[151].mxu0 }
 0x3c6   : > { %v6181_v17 = vadd.f32 %v6180_v40, %v6179_v37  ;;  %v9735_v52 = vadd.f32 %v6178_v20, %v4223_v43  ;;  %v6070_v14 = vpop.f32.mrb[88].mxu1 }
 0x3c7   : > { %v6071_v5 = vpop.f32.mrb[89].mxu1 }
 0x3c8   : > { %v9737_v35 = vadd.f32 %v6181_v17, %v4226_v12  ;;  %v6072_v28 = vadd.f32 %v6071_v5, %v6070_v14  ;;  %v6073_v56 = vpop.f32.mrb[90].mxu1 }
 0x3c9   : > { %v6074_v25 = vpop.f32.mrb[91].mxu1 }
 0x3ca   : > { %v6182_v63 = vpop.f32.mrb[152].mxu0  ;;  %v4231_v58 = vadd.f32 %v6072_v28, %v9631_v62  ;;  %v6075_v4 = vadd.f32 %v6074_v25, %v6073_v56 }
 0x3cb   : > { %v6183_v60 = vpop.f32.mrb[153].mxu0 }
 0x3cc   : > { %v6184_v42 = vadd.f32 %v6183_v60, %v6182_v63  ;;  %v6185_v44 = vpop.f32.mrb[154].mxu0  ;;  %v4234_v54 = vadd.f32 %v6075_v4, %v9636_v21 }
 0x3cd   : > { %v6186_v47 = vpop.f32.mrb[155].mxu0 }
 0x3ce   : > { %v6187_v3 = vadd.f32 %v6186_v47, %v6185_v44  ;;  %v9741_v9 = vadd.f32 %v6184_v42, %v4231_v58  ;;  %v6076_v19 = vpop.f32.mrb[92].mxu1 }
 0x3cf   : > { %v6077_v13 = vpop.f32.mrb[93].mxu1 }
 0x3d0   : > { %v9743_v48 = vadd.f32 %v6187_v3, %v4234_v54  ;;  %v6078_v6 = vadd.f32 %v6077_v13, %v6076_v19  ;;  %v6079_v0 = vpop.f32.mrb[94].mxu1 }
 0x3d1   : > { %v6080_v33 = vpop.f32.mrb[95].mxu1 }
 0x3d2   : > { %v6188_v59 = vpop.f32.mrb[156].mxu0  ;;  %v4239_v62 = vadd.f32 %v6078_v6, %v9641_v53  ;;  %v6081_v32 = vadd.f32 %v6080_v33, %v6079_v0 }
 0x3d3   : > { %v6189_v57 = vpop.f32.mrb[157].mxu0 }
 0x3d4   : > { %v6190_v61 = vadd.f32 %v6189_v57, %v6188_v59  ;;  %v6191_v43 = vpop.f32.mrb[158].mxu0  ;;  %v4242_v21 = vadd.f32 %v6081_v32, %v9646_v34 }
 0x3d5   : > { %v6192_v20 = vpop.f32.mrb[159].mxu0 }
 0x3d6   : > { %v6193_v18 = vadd.f32 %v6192_v20, %v6191_v43  ;;  %v9747_v37 = vadd.f32 %v6190_v61, %v4239_v62  ;;  %v6082_v40 = vpop.f32.mrb[96].mxu1 }
 0x3d7   : > { %v6083_v17 = vpop.f32.mrb[97].mxu1 }
 0x3d8   : > { %v9749_v12 = vadd.f32 %v6193_v18, %v4242_v21  ;;  %v6084_v14 = vadd.f32 %v6083_v17, %v6082_v40  ;;  %v6085_v28 = vpop.f32.mrb[98].mxu1 }
 0x3d9   : > { %v6086_v56 = vpop.f32.mrb[99].mxu1 }
 0x3da   : > { %v6194_v5 = vpop.f32.mrb[160].mxu0  ;;  %v4247_v53 = vadd.f32 %v6084_v14, %v9651_v11  ;;  %v6087_v25 = vadd.f32 %v6086_v56, %v6085_v28 }
 0x3db   : > { %v6195_v63 = vpop.f32.mrb[161].mxu0 }
 0x3dc   : > { %v6196_v60 = vadd.f32 %v6195_v63, %v6194_v5  ;;  %v6197_v58 = vpop.f32.mrb[162].mxu0  ;;  %v4250_v34 = vadd.f32 %v6087_v25, %v9656_v38 }
 0x3dd   : > { %v6198_v42 = vpop.f32.mrb[163].mxu0 }
 0x3de   : > { %v6199_v4 = vadd.f32 %v6198_v42, %v6197_v58  ;;  %v9753_v44 = vadd.f32 %v6196_v60, %v4247_v53  ;;  %v6088_v47 = vpop.f32.mrb[100].mxu1 }
 0x3df   : > { %v6089_v3 = vpop.f32.mrb[101].mxu1 }
 0x3e0   : > { %v9755_v54 = vadd.f32 %v6199_v4, %v4250_v34  ;;  %v6090_v19 = vadd.f32 %v6089_v3, %v6088_v47  ;;  %v6091_v6 = vpop.f32.mrb[102].mxu1 }
 0x3e1   : > { %v6092_v0 = vpop.f32.mrb[103].mxu1 }
 0x3e2   : > { %v6200_v13 = vpop.f32.mrb[164].mxu0  ;;  %v4255_v11 = vadd.f32 %v6090_v19, %v9663_v29  ;;  %v6093_v33 = vadd.f32 %v6092_v0, %v6091_v6 }
 0x3e3   : > { %v6201_v59 = vpop.f32.mrb[165].mxu0 }
 0x3e4   : > { %v6202_v57 = vadd.f32 %v6201_v59, %v6200_v13  ;;  %v6203_v62 = vpop.f32.mrb[166].mxu0  ;;  %v4258_v38 = vadd.f32 %v6093_v33, %v9666_v16 }
 0x3e5   : > { %v6204_v61 = vpop.f32.mrb[167].mxu0 }
 0x3e6   : > { %v6205_v32 = vadd.f32 %v6204_v61, %v6203_v62  ;;  %v9759_v43 = vadd.f32 %v6202_v57, %v4255_v11  ;;  %v6094_v20 = vpop.f32.mrb[104].mxu1 }
 0x3e7   : > { %v6095_v18 = vpop.f32.mrb[105].mxu1 }
 0x3e8   : > { %v9761_v21 = vadd.f32 %v6205_v32, %v4258_v38  ;;  %v6096_v40 = vadd.f32 %v6095_v18, %v6094_v20  ;;  %v6097_v14 = vpop.f32.mrb[106].mxu1 }
 0x3e9   : > { %v6098_v28 = vpop.f32.mrb[107].mxu1 }
 0x3ea   : > { %v6206_v17 = vpop.f32.mrb[168].mxu0  ;;  %v4263_v29 = vadd.f32 %v6096_v40, %v9673_v22  ;;  %v6099_v56 = vadd.f32 %v6098_v28, %v6097_v14 }
 0x3eb   : > { %v6207_v5 = vpop.f32.mrb[169].mxu0 }
 0x3ec   : > { %v6208_v63 = vadd.f32 %v6207_v5, %v6206_v17  ;;  %v6209_v53 = vpop.f32.mrb[170].mxu0  ;;  %v4266_v16 = vadd.f32 %v6099_v56, %v9676_v39 }
 0x3ed   : > { %v6210_v60 = vpop.f32.mrb[171].mxu0 }
 0x3ee   : > { %v6211_v25 = vadd.f32 %v6210_v60, %v6209_v53  ;;  %v9765_v58 = vadd.f32 %v6208_v63, %v4263_v29  ;;  %v6100_v42 = vpop.f32.mrb[108].mxu1 }
 0x3ef   : > { %v6101_v4 = vpop.f32.mrb[109].mxu1 }
 0x3f0   : > { %v9767_v34 = vadd.f32 %v6211_v25, %v4266_v16  ;;  %v6102_v47 = vadd.f32 %v6101_v4, %v6100_v42  ;;  %v6103_v19 = vpop.f32.mrb[110].mxu1 }
 0x3f1   : > { %v6104_v6 = vpop.f32.mrb[111].mxu1 }
 0x3f2   : > { %v6212_v3 = vpop.f32.mrb[172].mxu0  ;;  %v4271_v22 = vadd.f32 %v6102_v47, %v9681_v8  ;;  %v6105_v0 = vadd.f32 %v6104_v6, %v6103_v19 }
 0x3f3   : > { %v6213_v13 = vpop.f32.mrb[173].mxu0 }
 0x3f4   : > { %v6214_v59 = vadd.f32 %v6213_v13, %v6212_v3  ;;  %v6215_v11 = vpop.f32.mrb[174].mxu0  ;;  %v4274_v39 = vadd.f32 %v6105_v0, %v9684_v24 }
 0x3f5   : > { %v6216_v57 = vpop.f32.mrb[175].mxu0 }
 0x3f6   : > { %v6217_v33 = vadd.f32 %v6216_v57, %v6215_v11  ;;  %v9771_v62 = vadd.f32 %v6214_v59, %v4271_v22  ;;  %v6106_v61 = vpop.f32.mrb[112].mxu1 }
 0x3f7   : > { %v6107_v32 = vpop.f32.mrb[113].mxu1 }
 0x3f8   : > { %v9773_v38 = vadd.f32 %v6217_v33, %v4274_v39  ;;  %v6108_v20 = vadd.f32 %v6107_v32, %v6106_v61  ;;  %v6109_v40 = vpop.f32.mrb[114].mxu1 }
 0x3f9   : > { %v6110_v14 = vpop.f32.mrb[115].mxu1 }
 0x3fa   : > { %v6218_v18 = vpop.f32.mrb[176].mxu0  ;;  %v4279_v8 = vadd.f32 %v6108_v20, %v9687_v30  ;;  %v6111_v28 = vadd.f32 %v6110_v14, %v6109_v40 }
 0x3fb   : > { %v6219_v17 = vpop.f32.mrb[177].mxu0 }
 0x3fc   : > { %v6220_v5 = vadd.f32 %v6219_v17, %v6218_v18  ;;  %v6221_v29 = vpop.f32.mrb[178].mxu0  ;;  %v4282_v24 = vadd.f32 %v6111_v28, %v9689_v36 }
 0x3fd   : > { %v6222_v63 = vpop.f32.mrb[179].mxu0 }
 0x3fe   : > { %v6223_v56 = vadd.f32 %v6222_v63, %v6221_v29  ;;  %v9777_v53 = vadd.f32 %v6220_v5, %v4279_v8  ;;  %v6112_v60 = vpop.f32.mrb[116].mxu1 }
 0x3ff   : > { %v6113_v25 = vpop.f32.mrb[117].mxu1 }
 0x400   : > { %v9779_v16 = vadd.f32 %v6223_v56, %v4282_v24  ;;  %v6114_v42 = vadd.f32 %v6113_v25, %v6112_v60  ;;  %v6115_v47 = vpop.f32.mrb[118].mxu1 }
 0x401   : > { %v6116_v19 = vpop.f32.mrb[119].mxu1 }
 0x402   : > { %v6224_v4 = vpop.f32.mrb[180].mxu0  ;;  %v4287_v30 = vadd.f32 %v6114_v42, %v9691_v50  ;;  %v6117_v6 = vadd.f32 %v6116_v19, %v6115_v47 }
 0x403   : > { %v6225_v3 = vpop.f32.mrb[181].mxu0 }
 0x404   : > { %v6226_v13 = vadd.f32 %v6225_v3, %v6224_v4  ;;  %v6227_v22 = vpop.f32.mrb[182].mxu0  ;;  %v4290_v36 = vadd.f32 %v6117_v6, %v9693_v31 }
 0x405   : > { %v6228_v59 = vpop.f32.mrb[183].mxu0 }
 0x406   : > { %v6229_v0 = vadd.f32 %v6228_v59, %v6227_v22  ;;  %v9783_v11 = vadd.f32 %v6226_v13, %v4287_v30  ;;  %v6118_v57 = vpop.f32.mrb[120].mxu1 }
 0x407   : > { %v6119_v33 = vpop.f32.mrb[121].mxu1 }
 0x408   : > { %v9785_v39 = vadd.f32 %v6229_v0, %v4290_v36  ;;  %v6120_v61 = vadd.f32 %v6119_v33, %v6118_v57  ;;  %v6121_v20 = vpop.f32.mrb[122].mxu1 }
 0x409   : > { %v6122_v40 = vpop.f32.mrb[123].mxu1 }
 0x40a   : > { %v6230_v32 = vpop.f32.mrb[184].mxu0  ;;  %v4295_v50 = vadd.f32 %v6120_v61, %v9695_v7  ;;  %v6123_v14 = vadd.f32 %v6122_v40, %v6121_v20 }
 0x40b   : > { %v6231_v18 = vpop.f32.mrb[185].mxu0 }
 0x40c   : > { %v6232_v17 = vadd.f32 %v6231_v18, %v6230_v32  ;;  %v6233_v8 = vpop.f32.mrb[186].mxu0  ;;  %v4298_v31 = vadd.f32 %v6123_v14, %v9697_v23 }
 0x40d   : > { %v6234_v5 = vpop.f32.mrb[187].mxu0 }
 0x40e   : > { %v6235_v28 = vadd.f32 %v6234_v5, %v6233_v8  ;;  %v9789_v29 = vadd.f32 %v6232_v17, %v4295_v50  ;;  %v6124_v63 = vpop.f32.mrb[124].mxu1 }
 0x40f   : > { %v6125_v56 = vpop.f32.mrb[125].mxu1 }
 0x410   : > { %v9791_v24 = vadd.f32 %v6235_v28, %v4298_v31  ;;  %v6126_v60 = vadd.f32 %v6125_v56, %v6124_v63  ;;  %v6127_v42 = vpop.f32.mrb[126].mxu1 }
 0x411   : > { %v6128_v47 = vpop.f32.mrb[127].mxu1 }
 0x412   : > { %v6236_v25 = vpop.f32.mrb[188].mxu0  ;;  %v4303_v7 = vadd.f32 %v6126_v60, %v9699_v26  ;;  %v6129_v19 = vadd.f32 %v6128_v47, %v6127_v42 }
 0x413   : > { %v6237_v4 = vpop.f32.mrb[189].mxu0 }
 0x414   : > { %v6238_v3 = vadd.f32 %v6237_v4, %v6236_v25  ;;  %v6239_v30 = vpop.f32.mrb[190].mxu0  ;;  %v4306_v23 = vadd.f32 %v6129_v19, %v9701_v2 }
 0x415   : > { %v6240_v13 = vpop.f32.mrb[191].mxu0 }
 0x416   : > { %v6241_v6 = vadd.f32 %v6240_v13, %v6239_v30  ;;  %v9795_v22 = vadd.f32 %v6238_v3, %v4303_v7  ;;  %v6295_v59 = vpop.f32.mrb[128].mxu1 }
 0x417   : > { %v9800_v0 = vadd.f32 %v6295_v59, %v9711_v10  ;;  %v4504_v57 = vpop.f32.mrb[129].mxu1 }
 0x418   : > { %v9797_v36 = vadd.f32 %v6241_v6, %v4306_v23  ;;  %v9803_v33 = vadd.f32 %v4504_v57, %v9705_v46  ;;  %v6296_v26 = vpop.f32.mrb[130].mxu1 }
 0x419   : > { %v9806_v61 = vadd.f32 %v6296_v26, %v9713_v51  ;;  %v4507_v32 = vpop.f32.mrb[131].mxu1  ;;  %v4671_v46 = vmul.f32 %v9800_v0, %v9800_v0 }
 0x41a   : > { %v9809_v2 = vadd.f32 %v4507_v32, %v9707_v45  ;;  %v4669_v20 = vmul.f32 %v9803_v33, %v9803_v33 }
 0x41b   : > { %v4672_v14 = vmul.f32 %v9806_v61, %v9806_v61 }
 0x41c   : > { %v4631_v18 = vadd.f32 %v9809_v2, %v9803_v33  ;;  %v4670_v10 = vmul.f32 %v9809_v2, %v9809_v2 }
 0x41e   : > { %v4632_v40 = vadd.f32 %v4631_v18, %v9800_v0  ;;  %v4701_v51 = vadd.f32 %v4670_v10, %v4669_v20  ;;  %v6299_v50 = vpop.f32.mrb[132].mxu1 }
 0x41f   : > { %v9821_v17 = vadd.f32 %v6299_v50, %v9723_v15  ;;  %v4520_v45 = vpop.f32.mrb[133].mxu1 }
 0x420   : > { %v4702_v8 = vadd.f32 %v4701_v51, %v4671_v46  ;;  %v9826_v5 = vadd.f32 %v4520_v45, %v9717_v49  ;;  %v4633_v31 = vadd.f32 %v4632_v40, %v9806_v61  ;;  %v6300_v28 = vpop.f32.mrb[134].mxu1 }
 0x421   : > { %v9830_v63 = vadd.f32 %v6300_v28, %v9725_v27  ;;  %v4523_v56 = vpop.f32.mrb[135].mxu1  ;;  %v4675_v27 = vmul.f32 %v9821_v17, %v9821_v17 }
 0x422   : > { %v4634_v60 = vadd.f32 %v4633_v31, %v9826_v5  ;;  %v4673_v15 = vmul.f32 %v9826_v5, %v9826_v5  ;;  %v4703_v25 = vadd.f32 %v4702_v8, %v4672_v14  ;;  %v9836_v42 = vadd.f32 %v4523_v56, %v9719_v1 }
 0x423   : > { %v4676_v1 = vmul.f32 %v9830_v63, %v9830_v63 }
 0x424   : > { %v4704_v4 = vadd.f32 %v4703_v25, %v4673_v15  ;;  %v4635_v49 = vadd.f32 %v4634_v60, %v9836_v42  ;;  %v4674_v47 = vmul.f32 %v9836_v42, %v9836_v42 }
 0x426   : > { %v4636_v7 = vadd.f32 %v4635_v49, %v9821_v17  ;;  %v4705_v3 = vadd.f32 %v4704_v4, %v4674_v47  ;;  %v6303_v19 = vpop.f32.mrb[136].mxu1 }
 0x427   : > { %v9845_v30 = vadd.f32 %v6303_v19, %v9735_v52  ;;  %v4536_v13 = vpop.f32.mrb[137].mxu1 }
 0x428   : > { %v4706_v23 = vadd.f32 %v4705_v3, %v4675_v27  ;;  %v9850_v6 = vadd.f32 %v4536_v13, %v9729_v55  ;;  %v4637_v59 = vadd.f32 %v4636_v7, %v9830_v63  ;;  %v6304_v57 = vpop.f32.mrb[138].mxu1 }
 0x429   : > { %v9854_v26 = vadd.f32 %v6304_v57, %v9737_v35  ;;  %v4539_v32 = vpop.f32.mrb[139].mxu1  ;;  %v4679_v35 = vmul.f32 %v9845_v30, %v9845_v30 }
 0x42a   : > { %v4638_v20 = vadd.f32 %v4637_v59, %v9850_v6  ;;  %v4677_v52 = vmul.f32 %v9850_v6, %v9850_v6  ;;  %v4707_v18 = vadd.f32 %v4706_v23, %v4676_v1  ;;  %v9860_v10 = vadd.f32 %v4539_v32, %v9731_v41 }
 0x42b   : > { %v4680_v41 = vmul.f32 %v9854_v26, %v9854_v26 }
 0x42c   : > { %v4708_v46 = vadd.f32 %v4707_v18, %v4677_v52  ;;  %v4639_v55 = vadd.f32 %v4638_v20, %v9860_v10  ;;  %v4678_v40 = vmul.f32 %v9860_v10, %v9860_v10 }
 0x42e   : > { %v4640_v51 = vadd.f32 %v4639_v55, %v9845_v30  ;;  %v4709_v50 = vadd.f32 %v4708_v46, %v4678_v40  ;;  %v6307_v45 = vpop.f32.mrb[140].mxu1 }
 0x42f   : > { %v9869_v14 = vadd.f32 %v6307_v45, %v9747_v37  ;;  %v4552_v8 = vpop.f32.mrb[141].mxu1 }
 0x430   : > { %v4710_v31 = vadd.f32 %v4709_v50, %v4679_v35  ;;  %v9874_v28 = vadd.f32 %v4552_v8, %v9741_v9  ;;  %v4641_v56 = vadd.f32 %v4640_v51, %v9854_v26  ;;  %v6308_v60 = vpop.f32.mrb[142].mxu1 }
 0x431   : > { %v9878_v15 = vadd.f32 %v6308_v60, %v9749_v12  ;;  %v4555_v25 = vpop.f32.mrb[143].mxu1  ;;  %v4683_v12 = vmul.f32 %v9869_v14, %v9869_v14 }
 0x432   : > { %v4642_v4 = vadd.f32 %v4641_v56, %v9874_v28  ;;  %v4681_v37 = vmul.f32 %v9874_v28, %v9874_v28  ;;  %v4711_v49 = vadd.f32 %v4710_v31, %v4680_v41  ;;  %v9884_v47 = vadd.f32 %v4555_v25, %v9743_v48 }
 0x433   : > { %v4684_v48 = vmul.f32 %v9878_v15, %v9878_v15 }
 0x434   : > { %v4712_v27 = vadd.f32 %v4711_v49, %v4681_v37  ;;  %v4643_v9 = vadd.f32 %v4642_v4, %v9884_v47  ;;  %v4682_v7 = vmul.f32 %v9884_v47, %v9884_v47 }
 0x436   : > { %v4644_v3 = vadd.f32 %v4643_v9, %v9869_v14  ;;  %v4713_v19 = vadd.f32 %v4712_v27, %v4682_v7  ;;  %v6311_v13 = vpop.f32.mrb[144].mxu1 }
 0x437   : > { %v9893_v1 = vadd.f32 %v6311_v13, %v9759_v43  ;;  %v4568_v23 = vpop.f32.mrb[145].mxu1 }
 0x438   : > { %v4714_v59 = vadd.f32 %v4713_v19, %v4683_v12  ;;  %v9898_v57 = vadd.f32 %v4568_v23, %v9753_v44  ;;  %v4645_v32 = vadd.f32 %v4644_v3, %v9878_v15  ;;  %v6312_v20 = vpop.f32.mrb[146].mxu1 }
 0x439   : > { %v9902_v52 = vadd.f32 %v6312_v20, %v9761_v21  ;;  %v4571_v18 = vpop.f32.mrb[147].mxu1  ;;  %v4687_v21 = vmul.f32 %v9893_v1, %v9893_v1 }
 0x43a   : > { %v4646_v46 = vadd.f32 %v4645_v32, %v9898_v57  ;;  %v4685_v43 = vmul.f32 %v9898_v57, %v9898_v57  ;;  %v4715_v55 = vadd.f32 %v4714_v59, %v4684_v48  ;;  %v9908_v40 = vadd.f32 %v4571_v18, %v9755_v54 }
 0x43b   : > { %v4688_v54 = vmul.f32 %v9902_v52, %v9902_v52 }
 0x43c   : > { %v4716_v35 = vadd.f32 %v4715_v55, %v4685_v43  ;;  %v4647_v44 = vadd.f32 %v4646_v46, %v9908_v40  ;;  %v4686_v51 = vmul.f32 %v9908_v40, %v9908_v40 }
 0x43e   : > { %v4648_v50 = vadd.f32 %v4647_v44, %v9893_v1  ;;  %v4717_v45 = vadd.f32 %v4716_v35, %v4686_v51  ;;  %v6315_v8 = vpop.f32.mrb[148].mxu1 }
 0x43f   : > { %v9917_v41 = vadd.f32 %v6315_v8, %v9771_v62  ;;  %v4584_v31 = vpop.f32.mrb[149].mxu1 }
 0x440   : > { %v4718_v56 = vadd.f32 %v4717_v45, %v4687_v21  ;;  %v9922_v60 = vadd.f32 %v4584_v31, %v9765_v58  ;;  %v4649_v25 = vadd.f32 %v4648_v50, %v9902_v52  ;;  %v6316_v4 = vpop.f32.mrb[150].mxu1 }
 0x441   : > { %v9926_v37 = vadd.f32 %v6316_v4, %v9773_v38  ;;  %v4587_v49 = vpop.f32.mrb[151].mxu1  ;;  %v4691_v38 = vmul.f32 %v9917_v41, %v9917_v41 }
 0x442   : > { %v4650_v27 = vadd.f32 %v4649_v25, %v9922_v60  ;;  %v4689_v62 = vmul.f32 %v9922_v60, %v9922_v60  ;;  %v4719_v9 = vadd.f32 %v4718_v56, %v4688_v54  ;;  %v9932_v7 = vadd.f32 %v4587_v49, %v9767_v34 }
 0x443   : > { %v4692_v34 = vmul.f32 %v9926_v37, %v9926_v37 }
 0x444   : > { %v4720_v12 = vadd.f32 %v4719_v9, %v4689_v62  ;;  %v4651_v58 = vadd.f32 %v4650_v27, %v9932_v7  ;;  %v4690_v3 = vmul.f32 %v9932_v7, %v9932_v7 }
 0x446   : > { %v4652_v19 = vadd.f32 %v4651_v58, %v9917_v41  ;;  %v4721_v13 = vadd.f32 %v4720_v12, %v4690_v3  ;;  %v6319_v23 = vpop.f32.mrb[152].mxu1 }
 0x447   : > { %v9941_v48 = vadd.f32 %v6319_v23, %v9783_v11  ;;  %v4600_v59 = vpop.f32.mrb[153].mxu1 }
 0x448   : > { %v4722_v32 = vadd.f32 %v4721_v13, %v4691_v38  ;;  %v9946_v20 = vadd.f32 %v4600_v59, %v9777_v53  ;;  %v4653_v18 = vadd.f32 %v4652_v19, %v9926_v37  ;;  %v6320_v46 = vpop.f32.mrb[154].mxu1 }
 0x449   : > { %v9950_v43 = vadd.f32 %v6320_v46, %v9785_v39  ;;  %v4603_v55 = vpop.f32.mrb[155].mxu1  ;;  %v4695_v39 = vmul.f32 %v9941_v48, %v9941_v48 }
 0x44a   : > { %v4654_v35 = vadd.f32 %v4653_v18, %v9946_v20  ;;  %v4693_v11 = vmul.f32 %v9946_v20, %v9946_v20  ;;  %v4723_v44 = vadd.f32 %v4722_v32, %v4692_v34  ;;  %v9956_v51 = vadd.f32 %v4603_v55, %v9779_v16 }
 0x44b   : > { %v4696_v16 = vmul.f32 %v9950_v43, %v9950_v43 }
 0x44c   : > { %v4724_v21 = vadd.f32 %v4723_v44, %v4693_v11  ;;  %v4655_v53 = vadd.f32 %v4654_v35, %v9956_v51  ;;  %v4694_v50 = vmul.f32 %v9956_v51, %v9956_v51  ;;  %v6524_v35 = vld [vmem:[%s10442_s8] sm:$0xff]   ;;  %v6678_v11 = vmov 0.0  }
 0x44d   : > { %6325 = vmatprep.subr.bf16.mxu1 %v6678_v11  ;;  %6341 = vmatprep.mubr.msk.bf16.mxu1 %vm6679_vm3, %v6678_v11 }
 0x44e   : > { %v4656_v45 = vadd.f32 %v4655_v53, %v9941_v48  ;;  %v4725_v8 = vadd.f32 %v4724_v21, %v4694_v50  ;;  %v6323_v31 = vpop.f32.mrb[156].mxu1  ;;  %6326 = vmatpush3.bf16.msra.mxu1 %v6524_v35 }
 0x44f   : > { %v9965_v54 = vadd.f32 %v6323_v31, %v9795_v22  ;;  %v4616_v56 = vpop.f32.mrb[157].mxu1  ;;  %6327 = vmatprep.subr.bf16.mxu1 %v6678_v11 }
 0x450   : > { %v4726_v25 = vadd.f32 %v4725_v8, %v4695_v39  ;;  %v9970_v4 = vadd.f32 %v4616_v56, %v9789_v29  ;;  %v4657_v49 = vadd.f32 %v4656_v45, %v9950_v43  ;;  %v6324_v27 = vpop.f32.mrb[158].mxu1  ;;  %v6525_v39 = vld [vmem:[%s10442_s8 + $0x8] sm:$0xff]  }
 0x451   : > { %v9974_v62 = vadd.f32 %v6324_v27, %v9797_v36  ;;  %v4619_v9 = vpop.f32.mrb[159].mxu1  ;;  %v4699_v36 = vmul.f32 %v9965_v54, %v9965_v54  ;;  %v6527_v27 = vld [vmem:[%s10442_s8 + $0x18] sm:$0xff]  }
 0x452   : > { %v4658_v12 = vadd.f32 %v4657_v49, %v9970_v4  ;;  %v4697_v22 = vmul.f32 %v9970_v4, %v9970_v4  ;;  %v4727_v58 = vadd.f32 %v4726_v25, %v4696_v16  ;;  %v9980_v3 = vadd.f32 %v4619_v9, %v9791_v24  ;;  %6328 = vmatpush3.bf16.msra.mxu1 %v6525_v39  ;;  %v6526_v16 = vld [vmem:[%s10442_s8 + $0x10] sm:$0xff]  }
 0x453   : > { %v4700_v59 = vmul.f32 %v9974_v62, %v9974_v62  ;;  %6329 = vmatprep.subr.bf16.mxu1 %v6678_v11 }
 0x454   : > { %v4728_v38 = vadd.f32 %v4727_v58, %v4697_v22  ;;  %v4659_v29 = vadd.f32 %v4658_v12, %v9980_v3  ;;  %v4698_v19 = vmul.f32 %v9980_v3, %v9980_v3  ;;  %v6528_v58 = vld [vmem:[%s10442_s8 + $0x20] sm:$0xff]  }
 0x456   : > { %v4660_v13 = vadd.f32 %v4659_v29, %v9965_v54  ;;  %v4729_v23 = vadd.f32 %v4728_v38, %v4698_v19  ;;  %6330 = vmatpush3.bf16.msra.mxu1 %v6526_v16  ;;  %v6529_v19 = vld [vmem:[%s10442_s8 + $0x28] sm:$0xff]  }
 0x457   : > { %6331 = vmatprep.subr.bf16.mxu1 %v6678_v11 }
 0x458   : > { %v4661_v34 = vadd.f32 %v4660_v13, %v9974_v62  ;;  %v4730_v32 = vadd.f32 %v4729_v23, %v4699_v36  ;;  %v6530_v36 = vld [vmem:[%s10442_s8 + $0x30] sm:$0xff]   ;;  %v6531_v13 = vld [vmem:[%s10442_s8 + $0x38] sm:$0xff]   ;;  %v4742_v23 = vld [vmem:[%s10440_s6] sm:$0x1] }
 0x45a   : > { %v4662_v24 = vrot.slane %v4661_v34, 4  ;;  %v4731_v18 = vadd.f32 %v4730_v32, %v4700_v59  ;;  %6332 = vmatpush3.bf16.msra.mxu1 %v6527_v27  ;;  %v4746_v32 = vld [vmem:[%s10441_s7] sm:$0x1] }
 0x45b   : > { %6333 = vmatprep.subr.bf16.mxu1 %v6678_v11 }
 0x45c   : > { %v4663_v46 = vadd.f32 %v4662_v24, %v4661_v34  ;;  %v4732_v55 = vrot.slane %v4731_v18, 4 }
 0x45e   : > { %v4664_v44 = vrot.slane %v4663_v46, 2  ;;  %v4733_v21 = vadd.f32 %v4732_v55, %v4731_v18  ;;  %6334 = vmatpush3.bf16.msra.mxu1 %v6528_v58  ;;  %v11298_v18 = vld [vmem:[#allocation175_spill] sm:$0xff] }
 0x45f   : > { %6335 = vmatprep.subr.bf16.mxu1 %v6678_v11 }
 0x460   : > { %v4665_v53 = vadd.f32 %v4664_v44, %v4663_v46  ;;  %v4734_v50 = vrot.slane %v4733_v21, 2 }
 0x462   : > { %v4666_v45 = vrot.slane %v4665_v53, 1  ;;  %v4735_v8 = vadd.f32 %v4734_v50, %v4733_v21  ;;  %6336 = vmatpush3.bf16.msra.mxu1 %v6529_v19 }
 0x463   : > { %6337 = vmatprep.subr.bf16.mxu1 %v6678_v11 }
 0x464   : > { %v4667_v31 = vadd.f32 %v4666_v45, %v4665_v53  ;;  %v4736_v56 = vrot.slane %v4735_v8, 1 }
 0x466   : > { %v4668_v25 = vmul.f32 0.00390625, %v4667_v31  ;;  %v4737_v49 = vadd.f32 %v4736_v56, %v4735_v8  ;;  %6338 = vmatpush3.bf16.msra.mxu1 %v6530_v36 }
 0x467   : > { %6339 = vmatprep.subr.bf16.mxu1 %v6678_v11 }
 0x468   : > { %v4738_v9 = vmul.f32 0.00390625, %v4737_v49  ;;  %v4739_v12 = vmul.f32 %v4668_v25, %v4668_v25 }
 0x46a   : > { %v4740_v22 = vsub.f32 %v4738_v9, %v4739_v12  ;;  %6340 = vmatpush3.bf16.msra.mxu1 %v6531_v13 }
 0x46b   : > { %6345 = vmatprep.subr.bf16.mxu1 %v6678_v11 }
 0x46c   : > { %v4741_v38 = vmax.f32 %v4740_v22, 0.0 }
 0x46e   : > { %v4743_v29 = vadd.f32 1e-05, %v4741_v38 }
 0x470   : > { %6534 = vrsqrt.f32 %v4743_v29 }
 0x47a   : > { %v6535_v59 = vpop.eup %6534 }
 0x47b   : > { %v4745_v34 = vmul.f32 %v6535_v59, %v4742_v23 }
 0x47d   : > { %v4747_v24 = vmul.f32 %v4745_v34, %v4668_v25  ;;  %v4753_v46 = vrot.slane %v4745_v34, %v11298_v18 }
 0x47f   : > { %v4748_v55 = vsub.f32 %v4746_v32, %v4747_v24  ;;  %v4755_v35 = vmul.f32 %v4753_v46, %v9803_v33  ;;  %v4756_v44 = vmul.f32 %v4753_v46, %v9809_v2  ;;  %v4757_v21 = vmul.f32 %v4753_v46, %v9800_v0 }
 0x480   : > { %v4758_v53 = vmul.f32 %v4753_v46, %v9806_v61  ;;  %v4759_v50 = vmul.f32 %v4753_v46, %v9826_v5  ;;  %v4760_v39 = vmul.f32 %v4753_v46, %v9836_v42  ;;  %v4761_v45 = vmul.f32 %v4753_v46, %v9821_v17 }
 0x481   : > { %v4762_v8 = vmul.f32 %v4753_v46, %v9830_v63  ;;  %v4763_v31 = vmul.f32 %v4753_v46, %v9850_v6  ;;  %v4764_v56 = vmul.f32 %v4753_v46, %v9860_v10  ;;  %v4765_v33 = vmul.f32 %v4753_v46, %v9845_v30 }
 0x482   : > { %v4766_v2 = vmul.f32 %v4753_v46, %v9854_v26  ;;  %v4767_v0 = vmul.f32 %v4753_v46, %v9874_v28  ;;  %v4768_v61 = vmul.f32 %v4753_v46, %v9884_v47  ;;  %v4769_v5 = vmul.f32 %v4753_v46, %v9869_v14 }
 0x483   : > { %v4770_v42 = vmul.f32 %v4753_v46, %v9878_v15  ;;  %v4776_v17 = vmul.f32 %v4753_v46, %v9932_v7  ;;  %v4771_v63 = vmul.f32 %v4753_v46, %v9898_v57  ;;  %v4779_v6 = vmul.f32 %v4753_v46, %v9946_v20 }
 0x484   : > { %v4780_v10 = vmul.f32 %v4753_v46, %v9956_v51  ;;  %v4781_v30 = vmul.f32 %v4753_v46, %v9941_v48  ;;  %v4782_v26 = vmul.f32 %v4753_v46, %v9950_v43  ;;  %v4783_v28 = vmul.f32 %v4753_v46, %v9970_v4 }
 0x485   : > { %v4784_v47 = vmul.f32 %v4753_v46, %v9980_v3  ;;  %v4785_v14 = vmul.f32 %v4753_v46, %v9965_v54  ;;  %v4772_v15 = vmul.f32 %v4753_v46, %v9908_v40  ;;  %v4773_v7 = vmul.f32 %v4753_v46, %v9893_v1 }
 0x486   : > { %v4786_v57 = vmul.f32 %v4753_v46, %v9974_v62  ;;  %v4791_v20 = vrot.slane %v4748_v55, %v11298_v18  ;;  %v4774_v51 = vmul.f32 %v4753_v46, %v9902_v52  ;;  %v4775_v48 = vmul.f32 %v4753_v46, %v9922_v60 }
 0x487   : > { %v4777_v43 = vmul.f32 %v4753_v46, %v9917_v41  ;;  %v4778_v4 = vmul.f32 %v4753_v46, %v9926_v37 }
 0x488   : > { %v4793_v16 = vadd.f32 %v4791_v20, %v4755_v35  ;;  %v4794_v3 = vadd.f32 %v4791_v20, %v4756_v44  ;;  %v4795_v25 = vadd.f32 %v4791_v20, %v4757_v21  ;;  %v4796_v54 = vadd.f32 %v4791_v20, %v4758_v53 }
 0x489   : > { %v4797_v49 = vadd.f32 %v4791_v20, %v4759_v50  ;;  %v4798_v40 = vadd.f32 %v4791_v20, %v4760_v39  ;;  %v4799_v27 = vadd.f32 %v4791_v20, %v4761_v45  ;;  %v4800_v1 = vadd.f32 %v4791_v20, %v4762_v8 }
 0x48a   : > { %v4801_v9 = vadd.f32 %v4791_v20, %v4763_v31  ;;  %v10066_v62 = vadd.f32 %v4791_v20, %v4764_v56  ;;  %v10068_v12 = vadd.f32 %v4791_v20, %v4765_v33  ;;  %v10070_v52 = vadd.f32 %v4791_v20, %v4766_v2 }
 0x48b   : > { %v10072_v60 = vadd.f32 %v4791_v20, %v4767_v0  ;;  %v10074_v41 = vadd.f32 %v4791_v20, %v4768_v61  ;;  %v10076_v37 = vadd.f32 %v4791_v20, %v4769_v5  ;;  %v10078_v22 = vadd.f32 %v4791_v20, %v4770_v42 }
 0x48c   : > { %v10080_v58 = vadd.f32 %v4791_v20, %v4771_v63  ;;  %v10082_v38 = vadd.f32 %v4791_v20, %v4772_v15  ;;  %v10084_v29 = vadd.f32 %v4791_v20, %v4773_v7  ;;  %v10086_v19 = vadd.f32 %v4791_v20, %v4774_v51 }
 0x48d   : > { %v10088_v36 = vadd.f32 %v4791_v20, %v4775_v48  ;;  %v10090_v13 = vadd.f32 %v4791_v20, %v4776_v17  ;;  %v10092_v23 = vadd.f32 %v4791_v20, %v4777_v43  ;;  %v10094_v59 = vadd.f32 %v4791_v20, %v4778_v4 }
 0x48e   : > { %v10096_v34 = vadd.f32 %v4791_v20, %v4779_v6  ;;  %v10098_v32 = vadd.f32 %v4791_v20, %v4780_v10  ;;  %v10100_v24 = vadd.f32 %v4791_v20, %v4781_v30  ;;  %v10102_v46 = vadd.f32 %v4791_v20, %v4782_v26 }
 0x48f   : > { %v10104_v55 = vadd.f32 %v4791_v20, %v4783_v28  ;;  %v10106_v35 = vadd.f32 %v4791_v20, %v4784_v47  ;;  %v10108_v44 = vadd.f32 %v4791_v20, %v4785_v14  ;;  %v10110_v21 = vadd.f32 %v4791_v20, %v4786_v57 }
 0x490   : > { %v4857_v53 = vmul.f32 0.2, %v4793_v16  ;;  %v4858_v50 = vmul.f32 0.2, %v4794_v3  ;;  %vm4825_vm7 = vcmp.ge.f32.partialorder %v4793_v16, 0.0  ;;  %vm4826_vm2 = vcmp.ge.f32.partialorder %v4794_v3, 0.0 }
 0x491   : > { %v4859_v39 = vmul.f32 0.2, %v4795_v25  ;;  %vm4827_vm9 = vcmp.ge.f32.partialorder %v4795_v25, 0.0  ;;  %v4860_v31 = vmul.f32 0.2, %v4796_v54  ;;  %vm4828_vm8 = vcmp.ge.f32.partialorder %v4796_v54, 0.0 }
 0x492   : > { %v10112_v45 = vsel %vm4825_vm7, %v4793_v16, %v4857_v53  ;;  %v10114_v8 = vsel %vm4826_vm2, %v4794_v3, %v4858_v50  ;;  %v4861_v33 = vmul.f32 0.2, %v4797_v49  ;;  %vm4829_vm11 = vcmp.ge.f32.partialorder %v4797_v49, 0.0 }
 0x493   : > { %v4921_v56 = vadd.f32 %v10114_v8, %v10112_v45  ;;  %v10118_v2 = vsel %vm4827_vm9, %v4795_v25, %v4859_v39  ;;  %v4862_v61 = vmul.f32 0.2, %v4798_v40  ;;  %v10121_v5 = vsel %vm4828_vm8, %v4796_v54, %v4860_v31 }
 0x494   : > { %vm4830_vm0 = vcmp.ge.f32.partialorder %v4798_v40, 0.0  ;;  %v4863_v17 = vmul.f32 0.2, %v4799_v27  ;;  %v10124_v63 = vsel %vm4829_vm11, %v4797_v49, %v4861_v33  ;;  %vm4831_vm10 = vcmp.ge.f32.partialorder %v4799_v27, 0.0 }
 0x495   : > { %v4922_v0 = vadd.f32 %v4921_v56, %v10118_v2  ;;  %v4864_v10 = vmul.f32 0.2, %v4800_v1  ;;  %v10127_v30 = vsel %vm4830_vm0, %v4798_v40, %v4862_v61  ;;  %vm4832_vm6 = vcmp.ge.f32.partialorder %v4800_v1, 0.0 }
 0x496   : > { %v4865_v28 = vmul.f32 0.2, %v4801_v9  ;;  %v10130_v47 = vsel %vm4831_vm10, %v4799_v27, %v4863_v17  ;;  %vm4833_vm4 = vcmp.ge.f32.partialorder %v4801_v9, 0.0  ;;  %v4866_v15 = vmul.f32 0.2, %v10066_v62 }
 0x497   : > { %v4923_v42 = vadd.f32 %v4922_v0, %v10121_v5  ;;  %v10134_v7 = vsel %vm4832_vm6, %v4800_v1, %v4864_v10  ;;  %vm4834_vm13 = vcmp.ge.f32.partialorder %v10066_v62, 0.0  ;;  %v4867_v20 = vmul.f32 0.2, %v10068_v12 }
 0x498   : > { %v10139_v51 = vsel %vm4833_vm4, %v4801_v9, %v4865_v28  ;;  %vm4835_vm1 = vcmp.ge.f32.partialorder %v10068_v12, 0.0  ;;  %v4868_v43 = vmul.f32 0.2, %v10070_v52  ;;  %v10145_v4 = vsel %vm4834_vm13, %v10066_v62, %v4866_v15 }
 0x499   : > { %v4924_v6 = vadd.f32 %v4923_v42, %v10124_v63  ;;  %vm4836_vm15 = vcmp.ge.f32.partialorder %v10070_v52, 0.0  ;;  %v4869_v3 = vmul.f32 0.2, %v10072_v60  ;;  %v10151_v25 = vsel %vm4835_vm1, %v10068_v12, %v4867_v20 }
 0x49a   : > { %vm4837_vm14 = vcmp.ge.f32.partialorder %v10072_v60, 0.0  ;;  %v4870_v49 = vmul.f32 0.2, %v10074_v41  ;;  %v10157_v40 = vsel %vm4836_vm15, %v10070_v52, %v4868_v43  ;;  %vm4838_vm5 = vcmp.ge.f32.partialorder %v10074_v41, 0.0 }
 0x49b   : > { %v4925_v26 = vadd.f32 %v4924_v6, %v10127_v30  ;;  %v4871_v1 = vmul.f32 0.2, %v10076_v37  ;;  %v10163_v9 = vsel %vm4837_vm14, %v10072_v60, %v4869_v3  ;;  %vm4839_vm12 = vcmp.ge.f32.partialorder %v10076_v37, 0.0 }
 0x49c   : > { %v4872_v12 = vmul.f32 0.2, %v10078_v22  ;;  %v10169_v53 = vsel %vm4838_vm5, %v10074_v41, %v4870_v49  ;;  %vm4840_vm7 = vcmp.ge.f32.partialorder %v10078_v22, 0.0  ;;  %v4873_v50 = vmul.f32 0.2, %v10080_v58 }
 0x49d   : > { %v4926_v14 = vadd.f32 %v4925_v26, %v10130_v47  ;;  %v10175_v39 = vsel %vm4839_vm12, %v10076_v37, %v4871_v1  ;;  %vm4841_vm2 = vcmp.ge.f32.partialorder %v10080_v58, 0.0  ;;  %v4874_v31 = vmul.f32 0.2, %v10082_v38 }
 0x49e   : > { %v10181_v56 = vsel %vm4840_vm7, %v10078_v22, %v4872_v12  ;;  %vm4842_vm9 = vcmp.ge.f32.partialorder %v10082_v38, 0.0  ;;  %v4875_v33 = vmul.f32 0.2, %v10084_v29  ;;  %v10187_v0 = vsel %vm4841_vm2, %v10080_v58, %v4873_v50 }
 0x49f   : > { %v4927_v57 = vadd.f32 %v4926_v14, %v10134_v7  ;;  %vm4843_vm8 = vcmp.ge.f32.partialorder %v10084_v29, 0.0  ;;  %v4876_v61 = vmul.f32 0.2, %v10086_v19  ;;  %v10193_v42 = vsel %vm4842_vm9, %v10082_v38, %v4874_v31 }
 0x4a0   : > { %vm4844_vm11 = vcmp.ge.f32.partialorder %v10086_v19, 0.0  ;;  %v4877_v17 = vmul.f32 0.2, %v10088_v36  ;;  %v10199_v6 = vsel %vm4843_vm8, %v10084_v29, %v4875_v33  ;;  %vm4845_vm0 = vcmp.ge.f32.partialorder %v10088_v36, 0.0 }
 0x4a1   : > { %v4928_v48 = vadd.f32 %v4927_v57, %v10139_v51  ;;  %v4878_v10 = vmul.f32 0.2, %v10090_v13  ;;  %v10205_v26 = vsel %vm4844_vm11, %v10086_v19, %v4876_v61  ;;  %vm4846_vm10 = vcmp.ge.f32.partialorder %v10090_v13, 0.0 }
 0x4a2   : > { %v4879_v28 = vmul.f32 0.2, %v10092_v23  ;;  %v10211_v14 = vsel %vm4845_vm0, %v10088_v36, %v4877_v17  ;;  %vm4847_vm6 = vcmp.ge.f32.partialorder %v10092_v23, 0.0  ;;  %v4880_v15 = vmul.f32 0.2, %v10094_v59 }
 0x4a3   : > { %v4929_v16 = vadd.f32 %v4928_v48, %v10145_v4  ;;  %v10217_v57 = vsel %vm4846_vm10, %v10090_v13, %v4878_v10  ;;  %vm4848_vm4 = vcmp.ge.f32.partialorder %v10094_v59, 0.0  ;;  %v4881_v20 = vmul.f32 0.2, %v10096_v34 }
 0x4a4   : > { %v10223_v48 = vsel %vm4847_vm6, %v10092_v23, %v4879_v28  ;;  %vm4849_vm13 = vcmp.ge.f32.partialorder %v10096_v34, 0.0  ;;  %v4882_v43 = vmul.f32 0.2, %v10098_v32  ;;  %vm4850_vm1 = vcmp.ge.f32.partialorder %v10098_v32, 0.0  ;;  %v5098_v28 = vld [vmem:[%s10443_s9] sm:$0xf] }
 0x4a5   : > { %v4930_v54 = vadd.f32 %v4929_v16, %v10151_v25  ;;  %v10229_v16 = vsel %vm4848_vm4, %v10094_v59, %v4880_v15  ;;  %v4883_v3 = vmul.f32 0.2, %v10100_v24  ;;  %vm4851_vm15 = vcmp.ge.f32.partialorder %v10100_v24, 0.0 }
 0x4a6   : > { %v4884_v49 = vmul.f32 0.2, %v10102_v46  ;;  %vm4852_vm14 = vcmp.ge.f32.partialorder %v10102_v46, 0.0  ;;  %v4885_v1 = vmul.f32 0.2, %v10104_v55  ;;  %vm4853_vm5 = vcmp.ge.f32.partialorder %v10104_v55, 0.0 }
 0x4a7   : > { %v4931_v27 = vadd.f32 %v4930_v54, %v10157_v40  ;;  %v10235_v54 = vsel %vm4849_vm13, %v10096_v34, %v4881_v20  ;;  %v4886_v12 = vmul.f32 0.2, %v10106_v35  ;;  %vm4854_vm12 = vcmp.ge.f32.partialorder %v10106_v35, 0.0 }
 0x4a8   : > { %v4887_v50 = vmul.f32 0.2, %v10108_v44  ;;  %vm4855_vm7 = vcmp.ge.f32.partialorder %v10108_v44, 0.0  ;;  %v4888_v31 = vmul.f32 0.2, %v10110_v21  ;;  %vm4856_vm2 = vcmp.ge.f32.partialorder %v10110_v21, 0.0 }
 0x4a9   : > { %v4932_v62 = vadd.f32 %v4931_v27, %v10163_v9  ;;  %v10241_v27 = vsel %vm4850_vm1, %v10098_v32, %v4882_v43  ;;  %vm5103_vm9 = vcmask 1043456   ;;  %vm5099_vm8 = vcmask 64512  }
 0x4aa   : > { %v10270_v33 = vsel %vm4855_vm7, %v10108_v44, %v4887_v50  ;;  %v5105_v15 = vsel %vm5103_vm9, %v5098_v28, 0 }
 0x4ab   : > { %v4933_v52 = vadd.f32 %v4932_v62, %v10169_v53  ;;  %v10247_v62 = vsel %vm4851_vm15, %v10100_v24, %v4883_v3 }
 0x4ad   : > { %v4934_v60 = vadd.f32 %v4933_v52, %v10175_v39  ;;  %v10253_v52 = vsel %vm4852_vm14, %v10102_v46, %v4884_v49 }
 0x4af   : > { %v4935_v41 = vadd.f32 %v4934_v60, %v10181_v56  ;;  %v10259_v60 = vsel %vm4853_vm5, %v10104_v55, %v4885_v1  ;;  %v10274_v55 = vsel %vm4856_vm2, %v10110_v21, %v4888_v31 }
 0x4b1   : > { %v4936_v37 = vadd.f32 %v4935_v41, %v10187_v0  ;;  %v10265_v41 = vsel %vm4854_vm12, %v10106_v35, %v4886_v12 }
 0x4b3   : > { %v4937_v22 = vadd.f32 %v4936_v37, %v10193_v42 }
 0x4b5   : > { %v4938_v58 = vadd.f32 %v4937_v22, %v10199_v6 }
 0x4b7   : > { %v4939_v38 = vadd.f32 %v4938_v58, %v10205_v26 }
 0x4b9   : > { %v4940_v29 = vadd.f32 %v4939_v38, %v10211_v14 }
 0x4bb   : > { %v4941_v19 = vadd.f32 %v4940_v29, %v10217_v57 }
 0x4bd   : > { %v4942_v36 = vadd.f32 %v4941_v19, %v10223_v48 }
 0x4bf   : > { %v4943_v13 = vadd.f32 %v4942_v36, %v10229_v16 }
 0x4c1   : > { %v4944_v23 = vadd.f32 %v4943_v13, %v10235_v54 }
 0x4c3   : > { %v4945_v59 = vadd.f32 %v4944_v23, %v10241_v27 }
 0x4c5   : > { %v4946_v34 = vadd.f32 %v4945_v59, %v10247_v62 }
 0x4c7   : > { %v4947_v32 = vadd.f32 %v4946_v34, %v10253_v52 }
 0x4c9   : > { %v4948_v24 = vadd.f32 %v4947_v32, %v10259_v60 }
 0x4cb   : > { %v4949_v46 = vadd.f32 %v4948_v24, %v10265_v41 }
 0x4cd   : > { %v4950_v37 = vadd.f32 %v4949_v46, %v10270_v33 }
 0x4cf   : > { %v4951_v61 = vadd.f32 %v4950_v37, %v10274_v55 }
 0x4d1   : > { %v4952_v22 = vrot.slane %v4951_v61, 4 }
 0x4d3   : > { %v4953_v17 = vadd.f32 %v4952_v22, %v4951_v61 }
 0x4d5   : > { %v4954_v58 = vrot.slane %v4953_v17, 2 }
 0x4d7   : > { %v4955_v10 = vadd.f32 %v4954_v58, %v4953_v17 }
 0x4d9   : > { %v4956_v35 = vrot.slane %v4955_v10, 1 }
 0x4db   : > { %v4957_v38 = vadd.f32 %v4956_v35, %v4955_v10 }
 0x4dd   : > { %v4958_v44 = vmul.f32 0.00390625, %v4957_v38 }
 0x4df   : > { %v4991_v29 = vpack.c.bf16 %v4958_v44, %v4958_v44 }
 0x4e1   : > { %6342 = vmatmul.mubr.bf16.vlgmr.msra.gmra.mrb[160].mxu1 %v4991_v29 }
 0x4e2   : > { %6346 = vmatpush3.bf16.msra.mxu1 %v5105_v15  ;;  %6347 = vmatprep.mubr.msk.bf16.mxu1 %vm6679_vm3, %v6678_v11 }
 0x5b4   : > { %v5090_v21 = vpop.f32.mrb[160].mxu1 }
 0x5b5   : > { %v5096_v19 = vmax.f32 %v5090_v21, 0.0  ;;  %v6343_v20 = vpop.f32.mrb[161].mxu1  ;;  %v11306_v21 = vld [vmem:[#allocation97_spill] sm:$0xff] }
 0x5b6   : > { %v5093_v36 = vpop.f32.mrb[162].mxu1  ;;  %v11308_v20 = vld [vmem:[#allocation104_spill] sm:$0xff] }
 0x5b7   : > { %v5097_v43 = vpack.c.bf16 %v5096_v19, %v5096_v19  ;;  %v6344_v13 = vpop.f32.mrb[163].mxu1  ;;  %v11307_v19 = vld [vmem:[#allocation15_spill] sm:$0xff]  ;;  %v11309_v36 = vld [vmem:[#allocation17_spill] sm:$0xff] }
 0x5b8   : > { %v11310_v13 = vld [vmem:[#allocation109_spill] sm:$0xff] }
 0x5b9   : > { %6348 = vmatmul.mubr.msk.bf16.vlgmr.msra.gmra.mrb[164].mxu1 %vm5099_vm8, %v5097_v43 }
 0x68c   : > { %v5141_v3 = vpop.f32.mrb[164].mxu1 }
 0x68d   : > { %v5498_v23 = vmul.f32 -1.442695, %v5141_v3  ;;  %v6349_v49 = vpop.f32.mrb[165].mxu1 }
 0x68e   : > { %v5144_v59 = vpop.f32.mrb[166].mxu1 }
 0x68f   : > { %6536 = vpow2.f32 %v5498_v23  ;;  %v6350_v1 = vpop.f32.mrb[167].mxu1  ;;  %v11311_v23 = vld [vmem:[#allocation19_spill] sm:$0xff]  ;;  %v11312_v59 = vld [vmem:[#allocation114_spill] sm:$0xff] }
 0x699   : > { %v6537_v34 = vpop.eup %6536 }
 0x69a   : > { %v5150_v12 = vadd.f32 1.0, %v6537_v34  ;;  %v11313_v34 = vld [vmem:[#allocation22_spill] sm:$0xff] }
 0x69c   : > { %6538 = vrcp.f32 %v5150_v12 }
 0x6a6   : > { %v6539_v32 = vpop.eup %6538 }
 0x6a7   : > { %v5188_v11 = vrot.slane %v6539_v32, %v11298_v18  ;;  %v11314_v32 = vld [vmem:[#allocation117_spill] sm:$0xff] }
 0x6a9   : > { %v5189_v50 = vmul.f32 %v5188_v11, %v10112_v45  ;;  %v5190_v24 = vmul.f32 %v5188_v11, %v10114_v8  ;;  %v5191_v31 = vmul.f32 %v5188_v11, %v10118_v2  ;;  %v5192_v46 = vmul.f32 %v5188_v11, %v10121_v5 }
 0x6aa   : > { %v5193_v37 = vmul.f32 %v5188_v11, %v10124_v63  ;;  %v5194_v61 = vmul.f32 %v5188_v11, %v10127_v30  ;;  %v5195_v22 = vmul.f32 %v5188_v11, %v10130_v47  ;;  %v5196_v17 = vmul.f32 %v5188_v11, %v10134_v7 }
 0x6ab   : > { %v5197_v58 = vmul.f32 %v5188_v11, %v10139_v51  ;;  %v5198_v18 = vmul.f32 %v5188_v11, %v10145_v4  ;;  %v5199_v45 = vmul.f32 %v5188_v11, %v10151_v25  ;;  %v5200_v8 = vmul.f32 %v5188_v11, %v10157_v40 }
 0x6ac   : > { %v5201_v2 = vmul.f32 %v5188_v11, %v10163_v9  ;;  %v5202_v5 = vmul.f32 %v5188_v11, %v10169_v53  ;;  %v5203_v63 = vmul.f32 %v5188_v11, %v10175_v39  ;;  %v5204_v30 = vmul.f32 %v5188_v11, %v10181_v56 }
 0x6ad   : > { %v5205_v47 = vmul.f32 %v5188_v11, %v10187_v0  ;;  %v5206_v7 = vmul.f32 %v5188_v11, %v10193_v42  ;;  %v5207_v51 = vmul.f32 %v5188_v11, %v10199_v6  ;;  %v5208_v4 = vmul.f32 %v5188_v11, %v10205_v26 }
 0x6ae   : > { %v5209_v25 = vmul.f32 %v5188_v11, %v10211_v14  ;;  %v5210_v40 = vmul.f32 %v5188_v11, %v10217_v57  ;;  %v5211_v9 = vmul.f32 %v5188_v11, %v10223_v48  ;;  %v5212_v53 = vmul.f32 %v5188_v11, %v10229_v16  ;;  %v11299_v48 = vld [vmem:[#allocation77_spill] sm:$0xff]  ;;  %v11300_v16 = vld [vmem:[#allocation78_spill] sm:$0xff] }
 0x6af   : > { %v5213_v39 = vmul.f32 %v5188_v11, %v10235_v54  ;;  %v5214_v56 = vmul.f32 %v5188_v11, %v10241_v27  ;;  %v5215_v0 = vmul.f32 %v5188_v11, %v10247_v62  ;;  %v5216_v42 = vmul.f32 %v5188_v11, %v10253_v52  ;;  %v11301_v54 = vld [vmem:[#allocation83_spill] sm:$0xff]  ;;  %v11302_v27 = vld [vmem:[#allocation84_spill] sm:$0xff]  ;;  %v11303_v62 = vld [vmem:[#allocation89_spill] sm:$0xff] }
 0x6b0   : > { %v5217_v6 = vmul.f32 %v5188_v11, %v10259_v60  ;;  %v5218_v26 = vmul.f32 %v5188_v11, %v10265_v41  ;;  %v5219_v14 = vmul.f32 %v5188_v11, %v10270_v33  ;;  %v5220_v57 = vmul.f32 %v5188_v11, %v10274_v55  ;;  %v11304_v52 = vld [vmem:[#allocation90_spill] sm:$0xff]  ;;  %v11305_v60 = vld [vmem:[#allocation95_spill] sm:$0xff] }
 0x6b1   : > { %v5221_v10 = vadd.f32 %v5189_v50, %v11299_v48  ;;  %v5222_v35 = vadd.f32 %v5190_v24, %v11300_v16  ;;  %v5223_v38 = vadd.f32 %v5191_v31, %v11301_v54  ;;  %v5224_v28 = vadd.f32 %v5192_v46, %v11302_v27  ;;  %v11315_v50 = vld [vmem:[#allocation122_spill] sm:$0xff]  ;;  %v11316_v31 = vld [vmem:[#allocation123_spill] sm:$0xff]  ;;  %v11330_v16 = vld [vmem:[#allocation161_spill] sm:$0xff] }
 0x6b2   : > { %v5225_v44 = vadd.f32 %v5193_v37, %v11303_v62  ;;  %v5226_v29 = vadd.f32 %v5194_v61, %v11304_v52  ;;  %v5227_v15 = vadd.f32 %v5195_v22, %v11305_v60  ;;  %v5228_v41 = vadd.f32 %v5196_v17, %v11306_v21  ;;  %v11317_v37 = vld [vmem:[#allocation128_spill] sm:$0xff]  ;;  %v11318_v22 = vld [vmem:[#allocation129_spill] sm:$0xff]  ;;  %v11325_v48 = vld [vmem:[#allocation150_spill] sm:$0xff] }
 0x6b3   : > { %v5229_v33 = vadd.f32 %v5197_v58, %v11307_v19  ;;  %v5230_v55 = vadd.f32 %v5198_v18, %v11308_v20  ;;  %v5231_v43 = vadd.f32 %v5199_v45, %v11309_v36  ;;  %v5232_v3 = vadd.f32 %v5200_v8, %v11310_v13  ;;  %5253 = vst [vmem:[%s10329_s27] sm:$0xff] %v5221_v10  ;;  %v11319_v58 = vld [vmem:[#allocation134_spill] sm:$0xff]  ;;  %v11320_v45 = vld [vmem:[#allocation135_spill] sm:$0xff] }
 0x6b4   : > { %5254 = vst [vmem:[%s10329_s27 + $0x8] sm:$0xff] %v5222_v35  ;;  %5255 = vst [vmem:[%s10329_s27 + $0x10] sm:$0xff] %v5223_v38  ;;  %v5233_v49 = vadd.f32 %v5201_v2, %v11311_v23  ;;  %v5234_v1 = vadd.f32 %v5202_v5, %v11312_v59  ;;  %v5235_v12 = vadd.f32 %v5203_v63, %v11313_v34  ;;  %v11321_v2 = vld [vmem:[#allocation138_spill] sm:$0xff]  ;;  %v11322_v63 = vld [vmem:[#allocation140_spill] sm:$0xff] }
 0x6b5   : > { %5256 = vst [vmem:[%s10329_s27 + $0x18] sm:$0xff] %v5224_v28  ;;  %v5236_v11 = vadd.f32 %v5204_v30, %v11314_v32  ;;  %5257 = vst [vmem:[%s10329_s27 + $0x20] sm:$0xff] %v5225_v44  ;;  %v5237_v24 = vadd.f32 %v5205_v47, %v11315_v50  ;;  %v5238_v46 = vadd.f32 %v5206_v7, %v11316_v31  ;;  %v11323_v47 = vld [vmem:[#allocation144_spill] sm:$0xff]  ;;  %v11326_v10 = vld [vmem:[#allocation151_spill] sm:$0xff] }
 0x6b6   : > { %5258 = vst [vmem:[%s10329_s27 + $0x28] sm:$0xff] %v5226_v29  ;;  %5259 = vst [vmem:[%s10329_s27 + $0x30] sm:$0xff] %v5227_v15  ;;  %v5239_v61 = vadd.f32 %v5207_v51, %v11317_v37  ;;  %v5240_v17 = vadd.f32 %v5208_v4, %v11318_v22  ;;  %v5241_v18 = vadd.f32 %v5209_v25, %v11319_v58  ;;  %v11324_v51 = vld [vmem:[#allocation145_spill] sm:$0xff] }
 0x6b7   : > { %5260 = vst [vmem:[%s10329_s27 + $0x38] sm:$0xff] %v5228_v41  ;;  %5261 = vst [vmem:[%s10329_s27 + $0x40] sm:$0xff] %v5229_v33  ;;  %v5242_v8 = vadd.f32 %v5210_v40, %v11320_v45  ;;  %v5243_v5 = vadd.f32 %v5211_v9, %v11321_v2  ;;  %v5244_v30 = vadd.f32 %v5212_v53, %v11322_v63  ;;  %v11327_v9 = vld [vmem:[#allocation154_spill] sm:$0xff] }
 0x6b8   : > { %5262 = vst [vmem:[%s10329_s27 + $0x48] sm:$0xff] %v5230_v55  ;;  %5263 = vst [vmem:[%s10329_s27 + $0x50] sm:$0xff] %v5231_v43  ;;  %v5245_v7 = vadd.f32 %v5213_v39, %v11323_v47  ;;  %v5246_v4 = vadd.f32 %v5214_v56, %v11324_v51  ;;  %v5247_v25 = vadd.f32 %v5215_v0, %v11325_v48  ;;  %v11328_v39 = vld [vmem:[#allocation156_spill] sm:$0xff]  ;;  %v11329_v0 = vld [vmem:[#allocation159_spill] sm:$0xff] }
 0x6b9   : > { %5264 = vst [vmem:[%s10329_s27 + $0x58] sm:$0xff] %v5232_v3  ;;  %5265 = vst [vmem:[%s10329_s27 + $0x60] sm:$0xff] %v5233_v49  ;;  %v5248_v40 = vadd.f32 %v5216_v42, %v11326_v10  ;;  %v5249_v53 = vadd.f32 %v5217_v6, %v11327_v9  ;;  %v5250_v56 = vadd.f32 %v5218_v26, %v11328_v39 }
 0x6ba   : > { %5266 = vst [vmem:[%s10329_s27 + $0x68] sm:$0xff] %v5234_v1  ;;  %5267 = vst [vmem:[%s10329_s27 + $0x70] sm:$0xff] %v5235_v12  ;;  %v5251_v42 = vadd.f32 %v5219_v14, %v11329_v0  ;;  %v5252_v35 = vadd.f32 %v5220_v57, %v11330_v16 }
 0x6bb   : > { %5268 = vst [vmem:[%s10329_s27 + $0x78] sm:$0xff] %v5236_v11  ;;  %5269 = vst [vmem:[%s10329_s27 + $0x80] sm:$0xff] %v5237_v24 }
 0x6bc   : > { %5270 = vst [vmem:[%s10329_s27 + $0x88] sm:$0xff] %v5238_v46  ;;  %5271 = vst [vmem:[%s10329_s27 + $0x90] sm:$0xff] %v5239_v61 }
 0x6bd   : > { %5272 = vst [vmem:[%s10329_s27 + $0x98] sm:$0xff] %v5240_v17  ;;  %5273 = vst [vmem:[%s10329_s27 + $0xa0] sm:$0xff] %v5241_v18 }
 0x6be   : > { %5274 = vst [vmem:[%s10329_s27 + $0xa8] sm:$0xff] %v5242_v8  ;;  %5275 = vst [vmem:[%s10329_s27 + $0xb0] sm:$0xff] %v5243_v5 }
 0x6bf   : > { %5276 = vst [vmem:[%s10329_s27 + $0xb8] sm:$0xff] %v5244_v30  ;;  %5277 = vst [vmem:[%s10329_s27 + $0xc0] sm:$0xff] %v5245_v7 }
 0x6c0   : > { %5278 = vst [vmem:[%s10329_s27 + $0xc8] sm:$0xff] %v5246_v4  ;;  %5279 = vst [vmem:[%s10329_s27 + $0xd0] sm:$0xff] %v5247_v25 }
 0x6c1   : > { %5280 = vst [vmem:[%s10329_s27 + $0xd8] sm:$0xff] %v5248_v40  ;;  %5281 = vst [vmem:[%s10329_s27 + $0xe0] sm:$0xff] %v5249_v53 }
 0x6c2   : > { %5282 = vst [vmem:[%s10329_s27 + $0xe8] sm:$0xff] %v5250_v56  ;;  %5283 = vst [vmem:[%s10329_s27 + $0xf0] sm:$0xff] %v5251_v42 }
 0x6c3   : > { %5284 = vst [vmem:[%s10329_s27 + $0xf8] sm:$0xff] %v5252_v35 }
 0x6c4   : > { %6611 = shalt.err (!%p6608_p7)
}
 0x6c5   : > { %s6612_s19 = scalar_lea.hbm %s10372_s20, 4096  ;;  %s6616_s27 = scalar_lea.hbm %s10444_s10, 8192 }
 0x6c6   : > { %p6613_p9 = scmp.ne.s32.totalorder %s10372_s20, %s6612_s19  ;;  %p6617_p5 = scmp.lt.u32.totalorder %s10372_s20, %s10444_s10 }
 0x6c7   : > { %p6618_p11 = scmp.lt.u32.totalorder %s6616_s27, %s6612_s19  ;;  %p6620_p4 = scmp.lt.u32.totalorder %s6612_s19, %s10372_s20 }
 0x6c8   : > { %p6614_p2 = pnand %p6613_p9, %p6829_p12 }
 0x6c9   : > { %p6619_p1 = por %p6618_p11, %p6617_p5 }
 0x6ca   : > { %p6615_p0 = pneg %p6614_p2 }
 0x6cb   : > { %p6621_p6 = por %p6620_p4, %p6619_p1 }
 0x6cd   : > { %p6622_p8 = pnand %p6621_p6, %p6615_p0 }
 0x6cf   : > { %6625 = shalt.err (!%p6622_p8)
}
 0x6d0   : > { %s6681_s13 = smov 128   ;;  %s6682_s11 = smov 8  }
 0x6d1   : > { %6357 = dma.vmem_to_hbm [thread:$0]  (%p6829_p12), %s10374_s28, 4096, %s10372_s20, %s5286_s29, %s6681_s13, %s6681_s13, %s6682_s11  }
 0x6d2 PF: > { %s11331_s18 = sld [smem:[#allocation12_spill]]  ;;  %s11332_s21 = sld [smem:[#allocation13_spill]] }
 0x6d3   : > { %p11334_p13 = scmp.ge.s32.totalorder %s6668_s16, 2 }
 0x6d8   : > { %s5314_s30 = sand.u32 1, %s11331_s18   ;;  %p11333_p10 = scmp.ne.s32.totalorder %s11332_s21, 0 }
 0x6d9   : > { %s5315_s19 = scalar_lea.sflag [#allocation5], %s5314_s30 }
 0x6da   : > { %p6368_p3 = pnand %p11334_p13, %p11333_p10 }
 0x6dc   : > { %6651 = dma.done.wait (!%p6368_p3), %s5315_s19, 4096  }
 0x6dd   : > { %6653 = vsyncadd (!%p6368_p3), %s5315_s19, 4294963200  ;;  %s11335_s16 = sld [smem:[#allocation14_spill]]  ;;  %s11336_s13 = smov %s6660_s14 }
 0x6de   : > { %s11337_s14 = smov %s6664_s15  ;;  %s11338_s15 = smov %s6825_s25 }
 0x6e3   : > { %p24_p7 = scmp.ge.s32.totalorder %s11335_s16, 4  }
 0x6e5   :  { %26 = sbr.rel (!%p24_p7) target bundleno = 6 (0x6), region = 109 }
 0x6ec   :  { %5320 = vsyncpa [#allocation4], 1 }
 0x6ed   :  { %5322 = vsyncpa [#allocation4 + $0x1], 1 }
 0x6ee   :  { %5323 = vsyncpa [#allocation7], 1 }
 0x6ef   :  { %5324 = vsyncpa [#allocation5], 1 }
 0x6f0   :  { %5326 = vsyncpa [#allocation5 + $0x1], 1 }

</bundles_post_ra>
